<compile_context>
chip_gen: v6e
topology: v6e:2x2x1
jax: 0.10.0
libtpu: 0.0.40
codegen_flags: <defaults>
</compile_context>

<pallas_src>
import math

import jax
import jax.numpy as jnp
import numpy as np
from jax.experimental import pallas as pl
from jax.experimental.pallas import tpu as pltpu

NEG_SLOPE = 0.1
BN_EPS = 1e-5
_LANE = 128


def _leaky_relu(x):
    return jnp.where(x > 0, x, NEG_SLOPE * x)


def _pool2x2(y, W):
    """MaxPool2d(2, 2) on (R*W, C) rows laid out row-major (h, w); R, W even.

    Width pairs are adjacent flat rows, height pairs are blocks W//2 rows apart;
    the lane (C) dimension is never moved, so each step is a plain VPU max.
    """
    M, C = y.shape
    W2 = W // 2
    R = M // W
    yw = jnp.max(y.reshape(M // 2, 2, C), axis=1)        # width pairs
    yh = jnp.max(yw.reshape(R // 2, 2, W2, C), axis=1)   # height pairs
    return yh.reshape((R // 2) * W2, C)


def make_resblock_kernel(W, down, has_proj, fuse_proj, cout_p):
    def kernel(*refs):
        if has_proj and fuse_proj:
            x_ref, w1s_ref, w2_ref, t2_ref, ts_ref, o_ref = refs
        elif has_proj:
            x_ref, w1_ref, w2_ref, t2_ref, ws_ref, ts_ref, o_ref = refs
        else:
            x_ref, w1_ref, w2_ref, t2_ref, o_ref = refs

        x = x_ref[...]                                    # (TILE_M, Cin_p)

        if has_proj and fuse_proj:
            # One MXU dot for both the residual conv1 and the shortcut conv:
            # fills the 256-wide MXU when Cout_p == 128; slices are lane-aligned.
            hg = jnp.dot(x, w1s_ref[...], preferred_element_type=jnp.float32)
            h = hg[:, :cout_p]
            g = hg[:, cout_p:]
        else:
            h = jnp.dot(x, w1_ref[...], preferred_element_type=jnp.float32)
            if has_proj:
                g = jnp.dot(x, ws_ref[...], preferred_element_type=jnp.float32)

        # Residual: conv2 (BN1 shift already folded through w2 into t2), +shift,
        # LeakyReLU.  f32 accumulation + f32 epilogue.
        res = jnp.dot(h.astype(w2_ref.dtype), w2_ref[...],
                      preferred_element_type=jnp.float32)
        res = _leaky_relu(res + t2_ref[...])

        # Shortcut.
        if has_proj:
            sc = _leaky_relu(g + ts_ref[...])
        else:
            sc = x.astype(jnp.float32)                    # identity

        # Pooling applied per branch (as in the PyTorch module), then summed.
        if down:
            res = _pool2x2(res, W)
            sc = _pool2x2(sc, W)

        o_ref[...] = (res + sc).astype(o_ref.dtype)

    return kernel


# ---------------- host-side helpers -------------------------------------------


def _divisors(n):
    out = []
    i = 1
    while i * i <= n:
        if n % i == 0:
            out.append(i)
            if i * i != n:
                out.append(n // i)
        i += 1
    return sorted(out)


def _choose_tile_m(N, HW, W, down, cin_p, cout_p, in_bytes, out_bytes,
                   act_budget_bytes):
    """Pick the largest VMEM-fitting row tile that keeps grid_m >= 2.

    Constraints: divides N*HW; multiple of 8 (and tile//4 multiple of 8 when
    pooling) unless it covers the whole array; for down=True it is a multiple of
    2*W and either divides HW or is a multiple of HW, so 2x2 pooling windows and
    image boundaries never cross a tile seam.
    """
    total = N * HW
    pool = 4 if down else 1

    def valid(t):
        if down:
            if t % (2 * W):
                return False
            if (HW % t) and (t % HW):       # neither divides the other
                return False
        if t != total and (t % 8 or (t // pool) % 8):
            return False
        return True

    def tile_bytes(t):          # double-buffered x tile + double-buffered out tile
        return 2 * t * cin_p * in_bytes + 2 * (t // pool) * cout_p * out_bytes

    cands = [t for t in _divisors(total) if valid(t)]
    assert cands, "no valid row tile for this (N, H, W, down)"
    fits = [t for t in cands if tile_bytes(t) <= act_budget_bytes]
    if not fits:
        return min(cands)                    # VMEM-aware fallback: smallest tile
    multi = [t for t in fits if total // t >= 2]
    if not multi:
        return max(fits)
    best = max(multi)
    even = [t for t in multi if (total // t) % 2 == 0]    # v7x 2-TC sharding
    if even and max(even) * 2 >= best:
        best = max(even)
    return best


def _vmem_capacity_bytes():
    try:
        cap = getattr(pltpu.get_tpu_info(), "vmem_capacity_bytes", None)
        if cap:
            return int(cap)
    except Exception:
        pass
    return 64 * 1024 * 1024   # conservative: v7x per-TensorCore VMEM


def _fold_conv_bn(w, b, bn):
    """Fold inference-mode BN + conv bias into the matmul weight / a shift."""
    scale = bn["gamma"] / jnp.sqrt(bn["var"] + BN_EPS)
    w_f = w * scale[None, :]
    shift = (b - bn["mean"]) * scale + bn["beta"]
    return w_f, shift


def _pad2(a, rows, cols):
    r, c = a.shape
    if r == rows and c == cols:
        return a
    return jnp.pad(a, ((0, rows - r), (0, cols - c)))


# ---------------- entry points -------------------------------------------------


def resblock_forward_flat(x_flat, params, *, N, H, W, down,
                          compute_dtype=jnp.float32, out_dtype=None,
                          lane_pad=False):
    """x_flat: (N*H*W, Cin) NHWC-flattened activation -> (N*Ho*Wo, Cout[_padded]).

    compute_dtype: MXU input dtype (f32 accumulation regardless).
    out_dtype: HBM write dtype (defaults to x_flat.dtype); pass bf16 for chained
      bandwidth-bound blocks.
    lane_pad: pad channels to a multiple of 128 (lane-dense, unmasked stores);
      output keeps the padded channel count (extra channels are zero).
    """
    total_m, cin_in = x_flat.shape
    assert total_m == N * H * W
    Cin, Cout = params["w1"].shape
    assert cin_in == Cin, "feed activations with exactly Cin channels"
    has_proj = (Cin != Cout) or down
    if down:
        assert H % 2 == 0 and W % 2 == 0
    if not has_proj:
        assert Cin == Cout
    out_dtype = x_flat.dtype if out_dtype is None else out_dtype
    pool = 4 if down else 1

    # Host-side BN folding; the first BN shift is collapsed through conv2.
    w1f, t1 = _fold_conv_bn(params["w1"], params["b1"], params["bn1"])
    w2f, t2b = _fold_conv_bn(params["w2"], params["b2"], params["bn2"])
    t2 = t1[None, :] @ w2f + t2b[None, :]                 # (1, Cout), f32
    if has_proj:
        wsf, ts1 = _fold_conv_bn(params["ws"], params["bs"], params["bns"])
        ts = ts1[None, :]

    # Optional lane padding (Cout < 128 -> masked vst otherwise).
    if lane_pad:
        Cin_p = -(-Cin // _LANE) * _LANE
        Cout_p = -(-Cout // _LANE) * _LANE
    else:
        Cin_p, Cout_p = Cin, Cout
    if Cin_p != Cin:
        x_flat = jnp.pad(x_flat, ((0, 0), (0, Cin_p - Cin)))
    w1f = _pad2(w1f, Cin_p, Cout_p)
    w2f = _pad2(w2f, Cout_p, Cout_p)
    t2 = _pad2(t2, 1, Cout_p)
    if has_proj:
        wsf = _pad2(wsf, Cin_p, Cout_p)
        ts = _pad2(ts, 1, Cout_p)

    # Fuse the residual conv1 and shortcut conv into one MXU dot when the output
    # lanes line up with 128-wide tiles (fills the 256-wide MXU on v6e/v7x).
    fuse_proj = has_proj and (Cout_p % _LANE == 0)

    in_bytes = jnp.dtype(compute_dtype).itemsize
    out_bytes = jnp.dtype(out_dtype).itemsize

    # Operand list (x first, then grid-invariant weights/shifts).
    if fuse_proj:
        w1s = jnp.concatenate([w1f, wsf], axis=1)
        weight_ops = [w1s.astype(compute_dtype), w2f.astype(compute_dtype),
                      t2.astype(jnp.float32), ts.astype(jnp.float32)]
    elif has_proj:
        weight_ops = [w1f.astype(compute_dtype), w2f.astype(compute_dtype),
                      t2.astype(jnp.float32), wsf.astype(compute_dtype),
                      ts.astype(jnp.float32)]
    else:
        weight_ops = [w1f.astype(compute_dtype), w2f.astype(compute_dtype),
                      t2.astype(jnp.float32)]
    inputs = [x_flat.astype(compute_dtype)] + weight_ops

    wt_bytes = sum(int(w.size) * jnp.dtype(w.dtype).itemsize for w in weight_ops)
    # Only single-buffer the (grid-invariant) weights when they are big enough to
    # matter for the VMEM budget; at C=64-256 double-buffering them is free.
    single_buffer_weights = wt_bytes > (4 << 20)
    weight_vmem = wt_bytes * (1 if single_buffer_weights else 2)

    # VMEM budget / tile choice (co-tuned with vmem_limit_bytes).
    vmem_cap = _vmem_capacity_bytes()
    vmem_limit = min(int(vmem_cap) * 3 // 4, 96 * 1024 * 1024)
    act_budget = max(vmem_limit - weight_vmem - (2 << 20), 1 << 20)
    tile_m = _choose_tile_m(N, H * W, W, down, Cin_p, Cout_p,
                            in_bytes, out_bytes, act_budget)
    grid_m = total_m // tile_m
    tile_out = tile_m // pool

    def _w_spec(shape):
        if single_buffer_weights:
            return pl.BlockSpec(shape, lambda i: (0, 0),
                                pipeline_mode=pl.Buffered(1))
        return pl.BlockSpec(shape, lambda i: (0, 0))

    in_specs = [pl.BlockSpec((tile_m, Cin_p), lambda i: (i, 0))]
    in_specs += [_w_spec(tuple(int(d) for d in w.shape)) for w in weight_ops]

    # Advisory cost estimate for XLA scheduling when chained inside a larger jit.
    flops = 2 * total_m * (Cin_p * Cout_p + Cout_p * Cout_p)
    if has_proj:
        flops += 2 * total_m * Cin_p * Cout_p
    bytes_accessed = (total_m * Cin_p * in_bytes
                      + (total_m // pool) * Cout_p * out_bytes + wt_bytes)

    out = pl.pallas_call(
        make_resblock_kernel(W, down, has_proj, fuse_proj, Cout_p),
        out_shape=jax.ShapeDtypeStruct((total_m // pool, Cout_p), out_dtype),
        grid_spec=pltpu.PrefetchScalarGridSpec(
            num_scalar_prefetch=0,
            grid=(grid_m,),
            in_specs=in_specs,
            out_specs=pl.BlockSpec((tile_out, Cout_p), lambda i: (i, 0)),
        ),
        compiler_params=pltpu.CompilerParams(
            dimension_semantics=("parallel",),
            vmem_limit_bytes=vmem_limit),
        cost_estimate=pl.CostEstimate(flops=flops, transcendentals=0,
                                      bytes_accessed=bytes_accessed),
    )(*inputs)
    return out


def resblock_forward(x_nchw, params, *, down, compute_dtype=jnp.float32,
                     out_dtype=None, lane_pad=False):
    """PyTorch-interface wrapper: (N, Cin, H, W) -> (N, Cout, Ho, Wo).

    NOTE: for chained ResBlocks keep activations flat (and padded / bf16 if
    chosen) and call resblock_forward_flat directly, skipping the HBM transposes.
    """
    N, Cin, H, W = x_nchw.shape
    Cout = params["w1"].shape[1]
    x_flat = jnp.transpose(x_nchw, (0, 2, 3, 1)).reshape(N * H * W, Cin)
    out_flat = resblock_forward_flat(x_flat, params, N=N, H=H, W=W, down=down,
                                     compute_dtype=compute_dtype,
                                     out_dtype=out_dtype, lane_pad=lane_pad)
    out_flat = out_flat[:, :Cout]            # drop lane padding, if any
    Ho, Wo = (H // 2, W // 2) if down else (H, W)
    return jnp.transpose(out_flat.reshape(N, Ho, Wo, Cout), (0, 3, 1, 2))


# ---------------- parameter construction (deterministic, synthetic) -------------


def _xavier_uniform(key, fan_in, fan_out, gain):
    bound = gain * math.sqrt(6.0 / (fan_in + fan_out))
    # stored as (Cin, Cout) matmul matrix for the 1x1 conv
    return jax.random.uniform(key, (fan_in, fan_out), jnp.float32, -bound, bound)


def _bn_defaults(cout):
    # torch BatchNorm2d defaults: gamma=1, beta=0, running_mean=0, running_var=1
    return {"gamma": jnp.ones((cout,), jnp.float32),
            "beta": jnp.zeros((cout,), jnp.float32),
            "mean": jnp.zeros((cout,), jnp.float32),
            "var": jnp.ones((cout,), jnp.float32)}


def make_resblock_params(key, cin, cout, down):
    k1, k2, ks = jax.random.split(key, 3)
    zeros = jnp.zeros((cout,), jnp.float32)   # res_arch_init zeros conv biases
    params = {
        "w1": _xavier_uniform(k1, cin, cout, math.sqrt(2.0)),   # 'residual' convs
        "b1": zeros, "bn1": _bn_defaults(cout),
        "w2": _xavier_uniform(k2, cout, cout, math.sqrt(2.0)),
        "b2": zeros, "bn2": _bn_defaults(cout),
    }
    if (cin != cout) or down:
        params.update({"ws": _xavier_uniform(ks, cin, cout, 1.0),  # shortcut conv
                       "bs": zeros, "bns": _bn_defaults(cout)})
    return params


# ---------------- pure-JAX reference (unfused module semantics) -----------------


def resblock_ref(x_nchw, params, *, down):
    N, Cin, H, W = x_nchw.shape
    Cout = params["w1"].shape[1]
    has_proj = (Cin != Cout) or down
    x = jnp.transpose(x_nchw, (0, 2, 3, 1)).astype(jnp.float32)   # NHWC

    def conv_bn(a, w, b, bn):
        y = jnp.einsum("nhwc,cd->nhwd", a, w) + b
        s = bn["gamma"] / jnp.sqrt(bn["var"] + BN_EPS)
        return (y - bn["mean"]) * s + bn["beta"]

    h = conv_bn(x, params["w1"], params["b1"], params["bn1"])
    h = conv_bn(h, params["w2"], params["b2"], params["bn2"])
    res = jnp.where(h > 0, h, NEG_SLOPE * h)
    if has_proj:
        g = conv_bn(x, params["ws"], params["bs"], params["bns"])
        sc = jnp.where(g > 0, g, NEG_SLOPE * g)
    else:
        sc = x

    def pool(y):
        n, hh, ww, c = y.shape
        return y.reshape(n, hh // 2, 2, ww // 2, 2, c).max(axis=(2, 4))

    if down:
        res, sc = pool(res), pool(sc)
    return jnp.transpose(res + sc, (0, 3, 1, 2))


if __name__ == "__main__":
    key = jax.random.PRNGKey(0)
    k_x1, k_x2, k_p1, k_p2 = jax.random.split(key, 4)

    # Case 1: ResBlock(64 -> 128, down=True) — projection shortcut (fused w1||ws
    # single MXU dot since Cout is a multiple of 128) + 2x2 maxpool.
    x1 = jax.random.normal(k_x1, (2, 64, 16, 16), jnp.float32)
    p1 = make_resblock_params(k_p1, 64, 128, down=True)
    out1 = jax.block_until_ready(resblock_forward(x1, p1, down=True))
    ref1 = resblock_ref(x1, p1, down=True)
    np.testing.assert_allclose(np.asarray(out1), np.asarray(ref1),
                               rtol=2e-5, atol=2e-5)
    assert out1.shape == (2, 128, 8, 8)

    # Case 2: ResBlock(64 -> 64, down=False) — identity shortcut.
    x2 = jax.random.normal(k_x2, (2, 64, 16, 16), jnp.float32)
    p2 = make_resblock_params(k_p2, 64, 64, down=False)
    out2 = jax.block_until_ready(resblock_forward(x2, p2, down=False))
    ref2 = resblock_ref(x2, p2, down=False)
    np.testing.assert_allclose(np.asarray(out2), np.asarray(ref2),
                               rtol=2e-5, atol=2e-5)
    assert out2.shape == (2, 64, 16, 16)

    # Case 3: bf16 activation I/O (bf16 MXU inputs, f32 accumulation/epilogue,
    # bf16 HBM write) — the bandwidth-bound configuration for v5e.
    x1b = x1.astype(jnp.bfloat16)
    p1b = jax.tree_util.tree_map(
        lambda a: a.astype(jnp.bfloat16).astype(jnp.float32), p1)
    out3 = jax.block_until_ready(
        resblock_forward(x1b, p1b, down=True, compute_dtype=jnp.bfloat16,
                         out_dtype=jnp.bfloat16))
    ref3 = resblock_ref(x1b.astype(jnp.float32), p1b, down=True)
    np.testing.assert_allclose(np.asarray(out3.astype(jnp.float32)),
                               np.asarray(ref3), rtol=5e-2, atol=5e-2)
    assert out3.dtype == jnp.bfloat16 and out3.shape == (2, 128, 8, 8)

    # Case 4: lane-dense output for a Cout < 128 block (channels padded to 128
    # inside the kernel; wrapper slices back to 64).
    out4 = jax.block_until_ready(
        resblock_forward(x2, p2, down=False, lane_pad=True))
    np.testing.assert_allclose(np.asarray(out4), np.asarray(ref2),
                               rtol=2e-5, atol=2e-5)
    assert out4.shape == (2, 64, 16, 16)

    print("KERNEL_OK")
</pallas_src>

<mosaic_0001>
module attributes {stable_mosaic.version = 11 : i64} {
  func.func @kernel(%arg0: i32, %arg1: memref<256x64xf32, #tpu.memory_space<vmem>>, %arg2: memref<64x256xf32, #tpu.memory_space<vmem>>, %arg3: memref<128x128xf32, #tpu.memory_space<vmem>>, %arg4: memref<1x128xf32, #tpu.memory_space<vmem>>, %arg5: memref<1x128xf32, #tpu.memory_space<vmem>>, %arg6: memref<64x128xf32, #tpu.memory_space<vmem>>) attributes {dimension_semantics = [#tpu.dimension_semantics<parallel>], iteration_bounds = array<i64: 2>, scalar_prefetch = 0 : i64, scratch_operands = 0 : i64, tpu.core_type = #tpu.core_type<tc>, window_params = [{transform_indices = @transform_0, window_bounds = array<i64: 256, 64>}, {pipeline_mode = #tpu.pipeline_mode<synchronous>, transform_indices = @transform_1, window_bounds = array<i64: 64, 256>}, {pipeline_mode = #tpu.pipeline_mode<synchronous>, transform_indices = @transform_2, window_bounds = array<i64: 128, 128>}, {pipeline_mode = #tpu.pipeline_mode<synchronous>, transform_indices = @transform_3, window_bounds = array<i64: 1, 128>}, {pipeline_mode = #tpu.pipeline_mode<synchronous>, transform_indices = @transform_4, window_bounds = array<i64: 1, 128>}, {transform_indices = @transform_5, window_bounds = array<i64: 64, 128>}]} {
    %c0 = arith.constant 0 : index
    %c0_0 = arith.constant 0 : index
    %0 = vector.load %arg1[%c0, %c0_0] : memref<256x64xf32, #tpu.memory_space<vmem>>, vector<256x64xf32>
    %c0_1 = arith.constant 0 : index
    %c0_2 = arith.constant 0 : index
    %1 = vector.load %arg2[%c0_1, %c0_2] : memref<64x256xf32, #tpu.memory_space<vmem>>, vector<64x256xf32>
    %cst = arith.constant dense<0.000000e+00> : vector<256x256xf32>
    %2 = tpu.matmul %0, %1, %cst {dimension_numbers = #tpu.dot_dimension_numbers<[1], [0], [0], [1], [0, 0, 1, 1], [], []>} : vector<256x64xf32>, vector<64x256xf32>, vector<256x256xf32> -> vector<256x256xf32>
    %3 = vector.extract_strided_slice %2 {offsets = [0, 0], sizes = [256, 128], strides = [1, 1]} : vector<256x256xf32> to vector<256x128xf32>
    %4 = vector.extract_strided_slice %2 {offsets = [0, 128], sizes = [256, 128], strides = [1, 1]} : vector<256x256xf32> to vector<256x128xf32>
    %c0_3 = arith.constant 0 : index
    %c0_4 = arith.constant 0 : index
    %5 = vector.load %arg3[%c0_3, %c0_4] : memref<128x128xf32, #tpu.memory_space<vmem>>, vector<128x128xf32>
    %cst_5 = arith.constant dense<0.000000e+00> : vector<256x128xf32>
    %6 = tpu.matmul %3, %5, %cst_5 {dimension_numbers = #tpu.dot_dimension_numbers<[1], [0], [0], [1], [0, 0, 1, 1], [], []>} : vector<256x128xf32>, vector<128x128xf32>, vector<256x128xf32> -> vector<256x128xf32>
    %c0_6 = arith.constant 0 : index
    %c0_7 = arith.constant 0 : index
    %7 = vector.load %arg4[%c0_6, %c0_7] : memref<1x128xf32, #tpu.memory_space<vmem>>, vector<1x128xf32>
    %8 = vector.broadcast %7 : vector<1x128xf32> to vector<256x128xf32>
    %9 = arith.addf %6, %8 : vector<256x128xf32>
    %cst_8 = arith.constant 0.000000e+00 : f32
    %10 = vector.broadcast %cst_8 : f32 to vector<256x128xf32>
    %11 = arith.cmpf ogt, %9, %10 : vector<256x128xf32>
    %cst_9 = arith.constant 1.000000e-01 : f32
    %12 = vector.broadcast %cst_9 : f32 to vector<256x128xf32>
    %13 = arith.mulf %12, %9 : vector<256x128xf32>
    %14 = arith.select %11, %9, %13 : vector<256x128xi1>, vector<256x128xf32>
    %c0_10 = arith.constant 0 : index
    %c0_11 = arith.constant 0 : index
    %15 = vector.load %arg5[%c0_10, %c0_11] : memref<1x128xf32, #tpu.memory_space<vmem>>, vector<1x128xf32>
    %16 = vector.broadcast %15 : vector<1x128xf32> to vector<256x128xf32>
    %17 = arith.addf %4, %16 : vector<256x128xf32>
    %cst_12 = arith.constant 0.000000e+00 : f32
    %18 = vector.broadcast %cst_12 : f32 to vector<256x128xf32>
    %19 = arith.cmpf ogt, %17, %18 : vector<256x128xf32>
    %cst_13 = arith.constant 1.000000e-01 : f32
    %20 = vector.broadcast %cst_13 : f32 to vector<256x128xf32>
    %21 = arith.mulf %20, %17 : vector<256x128xf32>
    %22 = arith.select %19, %17, %21 : vector<256x128xi1>, vector<256x128xf32>
    %23 = vector.shape_cast %14 : vector<256x128xf32> to vector<128x2x128xf32>
    %cst_14 = arith.constant dense<0xFF800000> : vector<128x128xf32>
    %24 = vector.multi_reduction <maximumf>, %23, %cst_14 [1] : vector<128x2x128xf32> to vector<128x128xf32>
    %25 = vector.shape_cast %24 : vector<128x128xf32> to vector<8x2x8x128xf32>
    %cst_15 = arith.constant dense<0xFF800000> : vector<8x8x128xf32>
    %26 = vector.multi_reduction <maximumf>, %25, %cst_15 [1] : vector<8x2x8x128xf32> to vector<8x8x128xf32>
    %27 = vector.shape_cast %26 : vector<8x8x128xf32> to vector<64x128xf32>
    %28 = vector.shape_cast %22 : vector<256x128xf32> to vector<128x2x128xf32>
    %cst_16 = arith.constant dense<0xFF800000> : vector<128x128xf32>
    %29 = vector.multi_reduction <maximumf>, %28, %cst_16 [1] : vector<128x2x128xf32> to vector<128x128xf32>
    %30 = vector.shape_cast %29 : vector<128x128xf32> to vector<8x2x8x128xf32>
    %cst_17 = arith.constant dense<0xFF800000> : vector<8x8x128xf32>
    %31 = vector.multi_reduction <maximumf>, %30, %cst_17 [1] : vector<8x2x8x128xf32> to vector<8x8x128xf32>
    %32 = vector.shape_cast %31 : vector<8x8x128xf32> to vector<64x128xf32>
    %33 = arith.addf %27, %32 : vector<64x128xf32>
    %c0_18 = arith.constant 0 : index
    %c0_19 = arith.constant 0 : index
    %34 = vector.load %arg6[%c0_18, %c0_19] : memref<64x128xf32, #tpu.memory_space<vmem>>, vector<64x128xf32>
    tpu.vector_store %arg6[%c0_18, %c0_19], %33 {strides = array<i32>} : memref<64x128xf32, #tpu.memory_space<vmem>>, vector<64x128xf32>,
    return
  }
  func.func @transform_0(%arg0: i32) -> (i32, i32) {
    %c0_i32 = arith.constant 0 : i32
    %c0_i32_0 = arith.constant 0 : i32
    return %arg0, %c0_i32 : i32, i32
  }
  func.func @transform_1(%arg0: i32) -> (i32, i32) {
    %c0_i32 = arith.constant 0 : i32
    %c0_i32_0 = arith.constant 0 : i32
    %c0_i32_1 = arith.constant 0 : i32
    return %c0_i32, %c0_i32_0 : i32, i32
  }
  func.func @transform_2(%arg0: i32) -> (i32, i32) {
    %c0_i32 = arith.constant 0 : i32
    %c0_i32_0 = arith.constant 0 : i32
    %c0_i32_1 = arith.constant 0 : i32
    return %c0_i32, %c0_i32_0 : i32, i32
  }
  func.func @transform_3(%arg0: i32) -> (i32, i32) {
    %c0_i32 = arith.constant 0 : i32
    %c0_i32_0 = arith.constant 0 : i32
    %c0_i32_1 = arith.constant 0 : i32
    return %c0_i32, %c0_i32_0 : i32, i32
  }
  func.func @transform_4(%arg0: i32) -> (i32, i32) {
    %c0_i32 = arith.constant 0 : i32
    %c0_i32_0 = arith.constant 0 : i32
    %c0_i32_1 = arith.constant 0 : i32
    return %c0_i32, %c0_i32_0 : i32, i32
  }
  func.func @transform_5(%arg0: i32) -> (i32, i32) {
    %c0_i32 = arith.constant 0 : i32
    %c0_i32_0 = arith.constant 0 : i32
    return %arg0, %c0_i32 : i32, i32
  }
}

</mosaic_0001>

<bundles_post_ra>
// kernel: tpu_custom_call.1
= control target key start
LH: loop header
LB: loop body
LE: loop exit
PB: predicated region body
PF: predicated region fallthrough
CT: control target
= control target key end

     0   :  { %10 = vsyncpa [#allocation3], 0  ;;  %s6914_s0 = inlined_call_operand.vmem [shape: f32[512,64], index: 0, kind: input, shape index: {}]   ;;  %s6915_s1 = inlined_call_operand.vmem [shape: f32[64,256], index: 1, kind: input, shape index: {}]   ;;  %s6916_s2 = inlined_call_operand.vmem [shape: f32[128,128], index: 2, kind: input, shape index: {}]   ;;  %s6917_s3 = inlined_call_operand.vmem [shape: f32[1,128], index: 3, kind: input, shape index: {}]   ;;  %s6918_s4 = inlined_call_operand.vmem [shape: f32[1,128], index: 4, kind: input, shape index: {}]   ;;  %s6919_s5 = inlined_call_operand.hbm [shape: f32[128,128], index: 5, kind: output, shape index: {}]  }
   0x1   :  { %12 = vsyncpa [#allocation3 + $0x1], 0  ;;  %s5054_s18 = smov 0   ;;  %s5056_s19 = smov 0  }
   0x2   :  { %s5058_s20 = smov 0   ;;  %s5060_s21 = smov 0  }
   0x3 LB: > { %s5075_s22 = sadd.s32 4294967295, %s5017_s21   ;;  %s4719_s23 = sadd.s32 4294967294, %s5017_s21   ;;  %s5017_s21 = sphi %s5060_s21, %s7306_s21   ;;  %s5013_s20 = sphi %s5058_s20, %s7305_s20   ;;  %s5009_s19 = sphi %s5056_s19, %s7304_s19   ;;  %s5005_s18 = sphi %s5054_s18, %s7303_s18  }
   0x4   : > { %s5079_s24 = sadd.s32 1, %s5017_s21   ;;  %s135_s25 = sadd.s32 1, %s5013_s20 }
   0x5   : > { %s132_s26 = ssub.s32 %s5017_s21, %s5079_s24  ;;  %p145_p0 = scmp.ne.s32.totalorder %s5013_s20, %s5009_s19 }
   0x6   : > { %p133_p1 = scmp.eq.s32.totalorder %s132_s26, 0  ;;  %p146_p2 = scmp.eq.s32.totalorder %s5075_s22, 1 }
   0x7   : > { %p151_p3 = scmp.ne.s32.totalorder %s5009_s19, %s5005_s18  ;;  %p152_p4 = scmp.eq.s32.totalorder %s4719_s23, 1 }
   0x8   : > { %s5090_s27 = scalar_select %p133_p1, %s5013_s20, %s135_s25  }
   0x9   : > { %p5092_p5 = por %p146_p2, %p145_p0  ;;  %p5096_p6 = por %p152_p4, %p151_p3 }
   0xa   : > { %p4722_p7 = scmp.ge.s32.totalorder %s5017_s21, 1  ;;  %p191_p8 = scmp.lt.s32.totalorder %s5017_s21, 3 }
   0xc   : > { %p192_p9 = pnand %p4722_p7, %p191_p8 }
   0xe   : > { %195 = sbr.rel (%p192_p9) target bundleno = 912 (0x390), region = 40 }
  0x13   : > { %v273_v0 = vld [vmem:[%s6915_s1 + $0x78] sm:$0xff]  ;;  %v272_v1 = vld [vmem:[%s6915_s1 + $0x70] sm:$0xff]  ;;  %v271_v2 = vld [vmem:[%s6915_s1 + $0x68] sm:$0xff]  ;;  %s4724_s11 = sshll.u32 %s5075_s22, 5  ;;  %v5019_v4 = vmov 0.0   ;;  %vm274_vm0 = vcmask 523264  }
  0x14   : > { %387 = vmatprep.subr.mxu0 %v273_v0  ;;  %v270_v3 = vld [vmem:[%s6915_s1 + $0x60] sm:$0xff]  ;;  %435 = vmatprep.mubr.f32.mxu0 %v5019_v4  ;;  %p220_p10 = scmp.lt.s32.totalorder %s4724_s11, 63  ;;  %v269_v5 = vld [vmem:[%s6915_s1 + $0x58] sm:$0xff]  ;;  %v268_v6 = vld [vmem:[%s6915_s1 + $0x50] sm:$0xff]  ;;  %vm1811_vm2 = vcmask 1041408   ;;  %s216_s26 = sand.u32 1, %s5009_s19  }
  0x15   : > { %388 = vmatpush1.msra.mxu0 %v272_v1  ;;  %4894 = vmatprep.subr.mxu1 %v273_v0  ;;  %v267_v7 = vld [vmem:[%s6915_s1 + $0x48] sm:$0xff]  ;;  %v266_v8 = vld [vmem:[%s6915_s1 + $0x40] sm:$0xff]  ;;  %v265_v9 = vld [vmem:[%s6915_s1 + $0x38] sm:$0xff]  ;;  %s4765_s12 = sshll.u32 %s5075_s22, 10  ;;  %s6874_s22 = scalar_lea.sflag [#allocation3], %s216_s26 }
  0x16   : > { %389 = vmatprep.subr.mxu0 %v271_v2  ;;  %4902 = vmatpush1.msra.mxu1 %v272_v1  ;;  %s7308_s11 = smov (!%p220_p10, %s4724_s11), 63  ;;  %v264_v10 = vld [vmem:[%s6915_s1 + $0x30] sm:$0xff]  ;;  %v263_v11 = vld [vmem:[%s6915_s1 + $0x28] sm:$0xff]  ;;  %v262_v12 = vld [vmem:[%s6915_s1 + $0x20] sm:$0xff]  ;;  %v5020_v1 = vmov 1983009808   ;;  %s6865_s15 = scalar_lea.hbm %s6919_s5, %s4765_s12 }
  0x17   : > { %390 = vmatpush1.msra.mxu0 %v270_v3  ;;  %4895 = vmatprep.subr.mxu1 %v271_v2  ;;  %s4725_s13 = sshll.u32 %s7308_s11, 3  ;;  %v261_v13 = vld [vmem:[%s6915_s1 + $0x18] sm:$0xff]  ;;  %v260_v14 = vld [vmem:[%s6915_s1 + $0x10] sm:$0xff]  ;;  %v259_v15 = vld [vmem:[%s6915_s1 + $0x8] sm:$0xff]  ;;  %v1141_v2 = vunpack.c.l.s4 %v5020_v1  ;;  %s4723_s11 = sshll.u32 %s216_s26, 6 }
  0x18   : > { %391 = vmatprep.subr.mxu0 %v269_v5  ;;  %4903 = vmatpush1.msra.mxu1 %v270_v3  ;;  %s5149_s30 = scalar_lea.vmem %s6914_s0, %s4725_s13  ;;  %v258_v16 = vld [vmem:[%s6915_s1] sm:$0xff]  ;;  %v643_v19 = vld [vmem:[%s6916_s2 + $0x78] sm:$0xff]  ;;  %v642_v21 = vld [vmem:[%s6916_s2 + $0x70] sm:$0xff]  ;;  %v1143_v3 = vlaneseq  ;;  %s6151_s6 = scalar_lea.vmem [#allocation2], %s4723_s11 }
  0x19   : > { %392 = vmatpush1.msra.mxu0 %v268_v6  ;;  %4896 = vmatprep.subr.mxu1 %v269_v5  ;;  %v226_v17 = vld [vmem:[%s5149_s30] sm:$0xff]  ;;  %v227_v20 = vld [vmem:[%s5149_s30 + $0x8] sm:$0xff]  ;;  %v228_v24 = vld [vmem:[%s5149_s30 + $0x10] sm:$0xff]  ;;  %s4657_s13 = sshll.u32 %s6151_s6, 4  ;;  %s5021_s17 = smov [#allocation2]   ;;  %s6867_s13 = int_to_ptr.vmem [resolvable:$true] %s4657_s13 }
  0x1a   : > { %393 = vmatprep.subr.mxu0 %v267_v7  ;;  %4904 = vmatpush1.msra.mxu1 %v268_v6  ;;  %v250_v18 = vld [vmem:[%s5149_s30 + $0xc0] sm:$0xff]  ;;  %v251_v22 = vld [vmem:[%s5149_s30 + $0xc8] sm:$0xff]  ;;  %v252_v26 = vld [vmem:[%s5149_s30 + $0xd0] sm:$0xff]  ;;  %s4957_s16 = scalar_lea.vmem %s6867_s13, 1024  ;;  %s4961_s23 = sshll.u32 %s5021_s17, 4  ;;  %s4962_s23 = int_to_ptr.vmem [resolvable:$false] %s4961_s23 }
  0x1b   : > { %394 = vmatpush1.msra.mxu0 %v266_v8  ;;  %4897 = vmatprep.subr.mxu1 %v267_v7  ;;  %v641_v23 = vld [vmem:[%s6916_s2 + $0x68] sm:$0xff]  ;;  %v640_v25 = vld [vmem:[%s6916_s2 + $0x60] sm:$0xff]  ;;  %v639_v27 = vld [vmem:[%s6916_s2 + $0x58] sm:$0xff]  ;;  %v1142_v7 = vunpack.c.0.s8 %v1141_v2  ;;  %p4958_p11 = scmp.ne.s32.totalorder %s6867_s13, %s4957_s16  ;;  %s4963_s25 = scalar_lea.vmem %s4962_s23, 2048 }
  0x1c   : > { %395 = vmatprep.subr.mxu0 %v265_v9  ;;  %4905 = vmatpush1.msra.mxu1 %v266_v8  ;;  %v229_v28 = vld [vmem:[%s5149_s30 + $0x18] sm:$0xff]  ;;  %v638_v29 = vld [vmem:[%s6916_s2 + $0x50] sm:$0xff]  ;;  %v637_v31 = vld [vmem:[%s6916_s2 + $0x48] sm:$0xff]  ;;  %v1144_v8 = vshrl.u32 %v1143_v3, 7  ;;  %p4964_p0 = scmp.lt.s32.totalorder %s6867_s13, %s4962_s23  ;;  %p4965_p1 = scmp.lt.s32.totalorder %s4963_s25, %s4957_s16 }
  0x1d   : > { %396 = vmatpush1.msra.mxu0 %v264_v10  ;;  %4898 = vmatprep.subr.mxu1 %v265_v9  ;;  %v253_v30 = vld [vmem:[%s5149_s30 + $0xd8] sm:$0xff]  ;;  %v230_v32 = vld [vmem:[%s5149_s30 + $0x20] sm:$0xff]  ;;  %v231_v36 = vld [vmem:[%s5149_s30 + $0x28] sm:$0xff]  ;;  %p4959_p12 = pnand %p4958_p11, %p5092_p5 }
  0x1e   : > { %397 = vmatprep.subr.mxu0 %v263_v11  ;;  %4906 = vmatpush1.msra.mxu1 %v264_v10  ;;  %v636_v33 = vld [vmem:[%s6916_s2 + $0x40] sm:$0xff]  ;;  %v635_v35 = vld [vmem:[%s6916_s2 + $0x38] sm:$0xff]  ;;  %v634_v37 = vld [vmem:[%s6916_s2 + $0x30] sm:$0xff]  ;;  %p4966_p2 = por %p4965_p1, %p4964_p0 }
  0x1f   : > { %398 = vmatpush1.msra.mxu0 %v262_v12  ;;  %4899 = vmatprep.subr.mxu1 %v263_v11  ;;  %v254_v34 = vld [vmem:[%s5149_s30 + $0xe0] sm:$0xff]  ;;  %v255_v38 = vld [vmem:[%s5149_s30 + $0xe8] sm:$0xff]  ;;  %v232_v40 = vld [vmem:[%s5149_s30 + $0x30] sm:$0xff]  ;;  %v5306_v11 = vsub.s32 %v1142_v7, %v1144_v8  ;;  %p4960_p13 = pneg %p4959_p12 }
  0x20   : > { %399 = vmatprep.subr.mxu0 %v261_v13  ;;  %4907 = vmatpush1.msra.mxu1 %v262_v12  ;;  %v633_v39 = vld [vmem:[%s6916_s2 + $0x28] sm:$0xff]  ;;  %v632_v41 = vld [vmem:[%s6916_s2 + $0x20] sm:$0xff]  ;;  %v256_v42 = vld [vmem:[%s5149_s30 + $0xf0] sm:$0xff] }
  0x21   : > { %400 = vmatpush1.msra.mxu0 %v260_v14  ;;  %4900 = vmatprep.subr.mxu1 %v261_v13  ;;  %v631_v43 = vld [vmem:[%s6916_s2 + $0x18] sm:$0xff]  ;;  %v630_v45 = vld [vmem:[%s6916_s2 + $0x10] sm:$0xff]  ;;  %v234_v47 = vld [vmem:[%s5149_s30 + $0x40] sm:$0xff]  ;;  %p4967_p3 = pnand %p4966_p2, %p4960_p13 }
  0x22   : > { %401 = vmatprep.subr.mxu0 %v259_v15  ;;  %4908 = vmatpush1.msra.mxu1 %v260_v14  ;;  %v233_v44 = vld [vmem:[%s5149_s30 + $0x38] sm:$0xff]  ;;  %v235_v48 = vld [vmem:[%s5149_s30 + $0x48] sm:$0xff]  ;;  %v236_v49 = vld [vmem:[%s5149_s30 + $0x50] sm:$0xff] }
  0x23   : > { %402 = vmatpush1.msra.mxu0 %v258_v16  ;;  %4901 = vmatprep.subr.mxu1 %v259_v15  ;;  %v257_v46 = vld [vmem:[%s5149_s30 + $0xf8] sm:$0xff]  ;;  %v238_v51 = vld [vmem:[%s5149_s30 + $0x60] sm:$0xff]  ;;  %v239_v52 = vld [vmem:[%s5149_s30 + $0x68] sm:$0xff] }
  0x24   : > { %4726 = vmatmul.mubr.msk.f32.vlgmr.msra.gmra.mxu0 %vm274_vm0, %v226_v17  ;;  %4909 = vmatpush1.msra.mxu1 %v258_v16  ;;  %v237_v50 = vld [vmem:[%s5149_s30 + $0x58] sm:$0xff]  ;;  %v240_v53 = vld [vmem:[%s5149_s30 + $0x70] sm:$0xff]  ;;  %v242_v55 = vld [vmem:[%s5149_s30 + $0x80] sm:$0xff] }
  0x25   : > { %441 = vmatprep.mubr.f32.mxu0 %v5019_v4  ;;  %579 = vmatprep.mubr.f32.mxu1 %v5019_v4  ;;  %v241_v54 = vld [vmem:[%s5149_s30 + $0x78] sm:$0xff]  ;;  %v629_v56 = vld [vmem:[%s6916_s2 + $0x8] sm:$0xff]  ;;  %v628_v58 = vld [vmem:[%s6916_s2] sm:$0xff] }
  0x26   : > { %4750 = vmatmul.mubr.msk.f32.vlgmr.msra.gmra.mxu1 %vm274_vm0, %v250_v18  ;;  %4814 = vmatprep.subr.mxu1 %v643_v19  ;;  %v243_v57 = vld [vmem:[%s5149_s30 + $0x88] sm:$0xff]  ;;  %v244_v59 = vld [vmem:[%s5149_s30 + $0x90] sm:$0xff]  ;;  %v245_v60 = vld [vmem:[%s5149_s30 + $0x98] sm:$0xff] }
  0x27   : > { %585 = vmatprep.mubr.f32.mxu1 %v5019_v4  ;;  %4815 = vmatpush3.msra.mxu1 %v643_v19  ;;  %v246_v61 = vld [vmem:[%s5149_s30 + $0xa0] sm:$0xff]  ;;  %v247_v62 = vld [vmem:[%s5149_s30 + $0xa8] sm:$0xff]  ;;  %v248_v63 = vld [vmem:[%s5149_s30 + $0xb0] sm:$0xff] }
  0x28   : > { %4727 = vmatmul.mubr.msk.f32.gmra.mxu0 %vm274_vm0, %v227_v20  ;;  %4816 = vmatprep.subr.mxu1 %v642_v21  ;;  %v249_v0 = vld [vmem:[%s5149_s30 + $0xb8] sm:$0xff]  ;;  %v5303_v6 = vld [vmem:[%s6918_s4] ss:$0 sm:$0xff] }
  0x29   : > { %447 = vmatprep.mubr.f32.mxu0 %v5019_v4  ;;  %4817 = vmatpush3.msra.mxu1 %v642_v21 }
  0x2a   : > { %4751 = vmatmul.mubr.msk.f32.gmra.mxu1 %vm274_vm0, %v251_v22  ;;  %4818 = vmatprep.subr.mxu1 %v641_v23 }
  0x2b   : > { %591 = vmatprep.mubr.f32.mxu1 %v5019_v4  ;;  %4819 = vmatpush3.msra.mxu1 %v641_v23 }
  0x2c   : > { %4728 = vmatmul.mubr.msk.f32.gmra.mxu0 %vm274_vm0, %v228_v24  ;;  %4820 = vmatprep.subr.mxu1 %v640_v25 }
  0x2d   : > { %453 = vmatprep.mubr.f32.mxu0 %v5019_v4  ;;  %4821 = vmatpush3.msra.mxu1 %v640_v25 }
  0x2e   : > { %4752 = vmatmul.mubr.msk.f32.gmra.mxu1 %vm274_vm0, %v252_v26  ;;  %4822 = vmatprep.subr.mxu1 %v639_v27 }
  0x2f   : > { %597 = vmatprep.mubr.f32.mxu1 %v5019_v4  ;;  %4823 = vmatpush3.msra.mxu1 %v639_v27 }
  0x30   : > { %4729 = vmatmul.mubr.msk.f32.gmra.mxu0 %vm274_vm0, %v229_v28  ;;  %4824 = vmatprep.subr.mxu1 %v638_v29 }
  0x31   : > { %459 = vmatprep.mubr.f32.mxu0 %v5019_v4  ;;  %4825 = vmatpush3.msra.mxu1 %v638_v29 }
  0x32   : > { %4753 = vmatmul.mubr.msk.f32.gmra.mxu1 %vm274_vm0, %v253_v30  ;;  %4826 = vmatprep.subr.mxu1 %v637_v31 }
  0x33   : > { %603 = vmatprep.mubr.f32.mxu1 %v5019_v4  ;;  %4827 = vmatpush3.msra.mxu1 %v637_v31 }
  0x34   : > { %4730 = vmatmul.mubr.msk.f32.gmra.mxu0 %vm274_vm0, %v230_v32  ;;  %4828 = vmatprep.subr.mxu1 %v636_v33 }
  0x35   : > { %465 = vmatprep.mubr.f32.mxu0 %v5019_v4  ;;  %4829 = vmatpush3.msra.mxu1 %v636_v33 }
  0x36   : > { %4754 = vmatmul.mubr.msk.f32.gmra.mxu1 %vm274_vm0, %v254_v34  ;;  %4830 = vmatprep.subr.mxu1 %v635_v35 }
  0x37   : > { %609 = vmatprep.mubr.f32.mxu1 %v5019_v4  ;;  %4831 = vmatpush3.msra.mxu1 %v635_v35 }
  0x38   : > { %4731 = vmatmul.mubr.msk.f32.gmra.mxu0 %vm274_vm0, %v231_v36  ;;  %4832 = vmatprep.subr.mxu1 %v634_v37 }
  0x39   : > { %471 = vmatprep.mubr.f32.mxu0 %v5019_v4  ;;  %4833 = vmatpush3.msra.mxu1 %v634_v37 }
  0x3a   : > { %4755 = vmatmul.mubr.msk.f32.gmra.mxu1 %vm274_vm0, %v255_v38  ;;  %4834 = vmatprep.subr.mxu1 %v633_v39 }
  0x3b   : > { %615 = vmatprep.mubr.f32.mxu1 %v5019_v4  ;;  %4835 = vmatpush3.msra.mxu1 %v633_v39 }
  0x3c   : > { %4732 = vmatmul.mubr.msk.f32.gmra.mxu0 %vm274_vm0, %v232_v40  ;;  %4836 = vmatprep.subr.mxu1 %v632_v41 }
  0x3d   : > { %477 = vmatprep.mubr.f32.mxu0 %v5019_v4  ;;  %4837 = vmatpush3.msra.mxu1 %v632_v41 }
  0x3e   : > { %4756 = vmatmul.mubr.msk.f32.gmra.mxu1 %vm274_vm0, %v256_v42  ;;  %4838 = vmatprep.subr.mxu1 %v631_v43 }
  0x3f   : > { %621 = vmatprep.mubr.f32.mxu1 %v5019_v4  ;;  %4839 = vmatpush3.msra.mxu1 %v631_v43 }
  0x40   : > { %4733 = vmatmul.mubr.msk.f32.gmra.mxu0 %vm274_vm0, %v233_v44  ;;  %4840 = vmatprep.subr.mxu1 %v630_v45 }
  0x41   : > { %483 = vmatprep.mubr.f32.mxu0 %v5019_v4  ;;  %4841 = vmatpush3.msra.mxu1 %v630_v45 }
  0x42   : > { %4757 = vmatmul.mubr.msk.f32.gmra.mxu1 %vm274_vm0, %v257_v46  ;;  %4842 = vmatprep.subr.mxu1 %v629_v56 }
  0x43   : > { %4843 = vmatpush3.msra.mxu1 %v629_v56 }
  0x44   : > { %4734 = vmatmul.mubr.msk.f32.gmra.mxu0 %vm274_vm0, %v234_v47  ;;  %4844 = vmatprep.subr.mxu1 %v628_v58 }
  0x45   : > { %489 = vmatprep.mubr.f32.mxu0 %v5019_v4  ;;  %4845 = vmatpush3.msra.mxu1 %v628_v58 }
  0x48   : > { %4735 = vmatmul.mubr.msk.f32.gmra.mxu0 %vm274_vm0, %v235_v48 }
  0x49   : > { %495 = vmatprep.mubr.f32.mxu0 %v5019_v4 }
  0x4c   : > { %4736 = vmatmul.mubr.msk.f32.gmra.mxu0 %vm274_vm0, %v236_v49 }
  0x4d   : > { %501 = vmatprep.mubr.f32.mxu0 %v5019_v4 }
  0x50   : > { %4737 = vmatmul.mubr.msk.f32.gmra.mxu0 %vm274_vm0, %v237_v50 }
  0x51   : > { %507 = vmatprep.mubr.f32.mxu0 %v5019_v4 }
  0x54   : > { %4738 = vmatmul.mubr.msk.f32.gmra.mxu0 %vm274_vm0, %v238_v51 }
  0x55   : > { %513 = vmatprep.mubr.f32.mxu0 %v5019_v4 }
  0x58   : > { %4739 = vmatmul.mubr.msk.f32.gmra.mxu0 %vm274_vm0, %v239_v52 }
  0x59   : > { %519 = vmatprep.mubr.f32.mxu0 %v5019_v4 }
  0x5c   : > { %4740 = vmatmul.mubr.msk.f32.gmra.mxu0 %vm274_vm0, %v240_v53 }
  0x5d   : > { %525 = vmatprep.mubr.f32.mxu0 %v5019_v4 }
  0x60   : > { %4741 = vmatmul.mubr.msk.f32.gmra.mxu0 %vm274_vm0, %v241_v54 }
  0x61   : > { %531 = vmatprep.mubr.f32.mxu0 %v5019_v4 }
  0x64   : > { %4742 = vmatmul.mubr.msk.f32.gmra.mxu0 %vm274_vm0, %v242_v55 }
  0x65   : > { %537 = vmatprep.mubr.f32.mxu0 %v5019_v4 }
  0x68   : > { %4743 = vmatmul.mubr.msk.f32.gmra.mxu0 %vm274_vm0, %v243_v57 }
  0x69   : > { %543 = vmatprep.mubr.f32.mxu0 %v5019_v4 }
  0x6c   : > { %4744 = vmatmul.mubr.msk.f32.gmra.mxu0 %vm274_vm0, %v244_v59 }
  0x6d   : > { %549 = vmatprep.mubr.f32.mxu0 %v5019_v4 }
  0x70   : > { %4745 = vmatmul.mubr.msk.f32.gmra.mxu0 %vm274_vm0, %v245_v60 }
  0x71   : > { %555 = vmatprep.mubr.f32.mxu0 %v5019_v4 }
  0x74   : > { %4746 = vmatmul.mubr.msk.f32.gmra.mxu0 %vm274_vm0, %v246_v61 }
  0x75   : > { %561 = vmatprep.mubr.f32.mxu0 %v5019_v4 }
  0x78   : > { %4747 = vmatmul.mubr.msk.f32.gmra.mxu0 %vm274_vm0, %v247_v62 }
  0x79   : > { %567 = vmatprep.mubr.f32.mxu0 %v5019_v4 }
  0x7c   : > { %4748 = vmatmul.mubr.msk.f32.gmra.mxu0 %vm274_vm0, %v248_v63 }
  0x7d   : > { %573 = vmatprep.mubr.f32.mxu0 %v5019_v4 }
  0x80   : > { %4749 = vmatmul.mubr.msk.f32.gmra.mxu0 %vm274_vm0, %v249_v0 }
  0xe4   : > { %v437_v5 = vpop.f32.mrf.mxu0 }
  0xe5   : > { %4846 = vmatprep.mubr.f32.mxu1 %v437_v5 }
  0xe6   : > { %v439_v9 = vpop.f32.mrf.mxu0 }
  0xe7   : > { %v979_v10 = vadd.f32 %v5303_v6, %v439_v9 }
  0xe8   : > { %v443_v4 = vpop.f32.mrf.mxu0 }
  0xe9   : > { %vm1011_vm1 = vcmp.gt.f32.partialorder %v979_v10, 0.0  ;;  %v1043_v12 = vmul.f32 0.1, %v979_v10  ;;  %4847 = vmatmul.mubr.f32.vlgmr.msra.gmra.mxu1 %v443_v4 }
  0xea   : > { %v445_v13 = vpop.f32.mrf.mxu0 }
  0xeb   : > { %v1075_v14 = vsel %vm1011_vm1, %v979_v10, %v1043_v12  ;;  %v980_v15 = vadd.f32 %v5303_v6, %v445_v13 }
  0xec   : > { %v2804_v16 = vcombine.high %v1075_v14, %v1075_v14  ;;  %v2811_v17 = vrot.slane %v1075_v14, %v5306_v11  ;;  %v449_v18 = vpop.f32.mrf.mxu0 }
  0xed   : > { %vm1012_vm3 = vcmp.gt.f32.partialorder %v980_v15, 0.0  ;;  %v1044_v19 = vmul.f32 0.1, %v980_v15  ;;  %4849 = vmatprep.mubr.f32.mxu1 %v449_v18 }
  0xee   : > { %v2818_v20 = vrot.slane %v2804_v16, %v5306_v11  ;;  %v2819_v21 = vcombine.high %v2811_v17, %v2811_v17  ;;  %v3476_v22 = vsel %vm1811_vm2, %v2811_v17, -inf  ;;  %v451_v23 = vpop.f32.mrf.mxu0 }
  0xef   : > { %v3477_v24 = vrot.slane %v3476_v22, 4  ;;  %v1076_v25 = vsel %vm1012_vm3, %v980_v15, %v1044_v19  ;;  %v981_v26 = vadd.f32 %v5303_v6, %v451_v23 }
  0xf0   : > { %v2820_v27 = vcombine.high %v2818_v20, %v2818_v20  ;;  %v3483_v28 = vsel %vm1811_vm2, %v2819_v21, -inf  ;;  %v3490_v29 = vsel %vm1811_vm2, %v2818_v20, -inf  ;;  %v2821_v30 = vcombine.high %v1076_v25, %v1076_v25  ;;  %v455_v31 = vpop.f32.mrf.mxu0 }
  0xf1   : > { %v3478_v32 = vmax.f32 %v3476_v22, %v3477_v24  ;;  %v3484_v33 = vrot.slane %v3483_v28, 4  ;;  %v3491_v34 = vrot.slane %v3490_v29, 4  ;;  %v2828_v35 = vrot.slane %v1076_v25, %v5306_v11  ;;  %4850 = vmatmul.mubr.f32.gmra.mxu1 %v455_v31 }
  0xf2   : > { %v3497_v36 = vsel %vm1811_vm2, %v2820_v27, -inf  ;;  %v2835_v37 = vrot.slane %v2821_v30, %v5306_v11  ;;  %vm1013_vm4 = vcmp.gt.f32.partialorder %v981_v26, 0.0  ;;  %v1045_v38 = vmul.f32 0.1, %v981_v26  ;;  %v457_v39 = vpop.f32.mrf.mxu0 }
  0xf3   : > { %v3479_v40 = vrot.slane %v3478_v32, 2  ;;  %v3485_v41 = vmax.f32 %v3483_v28, %v3484_v33  ;;  %v3492_v42 = vmax.f32 %v3490_v29, %v3491_v34  ;;  %v3498_v43 = vrot.slane %v3497_v36, 4 }
  0xf4   : > { %v2836_v44 = vcombine.high %v2828_v35, %v2828_v35  ;;  %v2837_v45 = vcombine.high %v2835_v37, %v2835_v37  ;;  %v3504_v46 = vsel %vm1811_vm2, %v2828_v35, -inf  ;;  %v3518_v47 = vsel %vm1811_vm2, %v2835_v37, -inf  ;;  %v461_v48 = vpop.f32.mrf.mxu0 }
  0xf5   : > { %v3480_v49 = vmax.f32 %v3478_v32, %v3479_v40  ;;  %v3486_v50 = vrot.slane %v3485_v41, 2  ;;  %v3493_v51 = vrot.slane %v3492_v42, 2  ;;  %v3499_v52 = vmax.f32 %v3497_v36, %v3498_v43  ;;  %4852 = vmatprep.mubr.f32.mxu1 %v461_v48 }
  0xf6   : > { %v3505_v53 = vrot.slane %v3504_v46, 4  ;;  %v3511_v54 = vsel %vm1811_vm2, %v2836_v44, -inf  ;;  %v3519_v55 = vrot.slane %v3518_v47, 4  ;;  %v3525_v56 = vsel %vm1811_vm2, %v2837_v45, -inf  ;;  %v463_v57 = vpop.f32.mrf.mxu0 }
  0xf7   : > { %v3481_v58 = vrot.slane %v3480_v49, 1  ;;  %v3487_v59 = vmax.f32 %v3485_v41, %v3486_v50  ;;  %v3494_v60 = vmax.f32 %v3492_v42, %v3493_v51  ;;  %v3500_v61 = vrot.slane %v3499_v52, 2 }
  0xf8   : > { %v3506_v62 = vmax.f32 %v3504_v46, %v3505_v53  ;;  %v3512_v63 = vrot.slane %v3511_v54, 4  ;;  %v3520_v0 = vmax.f32 %v3518_v47, %v3519_v55  ;;  %v3526_v1 = vrot.slane %v3525_v56, 4  ;;  %v467_v2 = vpop.f32.mrf.mxu0 }
  0xf9   : > { %v3488_v3 = vrot.slane %v3487_v59, 1  ;;  %v3495_v5 = vrot.slane %v3494_v60, 1  ;;  %v3501_v7 = vmax.f32 %v3499_v52, %v3500_v61  ;;  %4853 = vmatmul.mubr.f32.gmra.mxu1 %v467_v2  ;;  %v5322_v13 = vmax.f32 %v3480_v49, %v3481_v58 }
  0xfa   : > { %v3507_v8 = vrot.slane %v3506_v62, 2  ;;  %v3513_v9 = vmax.f32 %v3511_v54, %v3512_v63  ;;  %v3521_v10 = vrot.slane %v3520_v0, 2  ;;  %v3527_v4 = vmax.f32 %v3525_v56, %v3526_v1  ;;  %v469_v12 = vpop.f32.mrf.mxu0 }
  0xfb   : > { %7027 = vst [vmem:[#allocation5_spill] sm:$0xff] %v5322_v13  ;;  %v5324_v14 = vmax.f32 %v3487_v59, %v3488_v3  ;;  %v3502_v15 = vrot.slane %v3501_v7, 1  ;;  %v1077_v16 = vsel %vm1013_vm4, %v981_v26, %v1045_v38  ;;  %v5327_v22 = vmax.f32 %v3494_v60, %v3495_v5 }
  0xfc   : > { %v3508_v17 = vmax.f32 %v3506_v62, %v3507_v8  ;;  %v3514_v18 = vrot.slane %v3513_v9, 2  ;;  %v3522_v19 = vmax.f32 %v3520_v0, %v3521_v10  ;;  %v3528_v20 = vrot.slane %v3527_v4, 2  ;;  %v473_v21 = vpop.f32.mrf.mxu0 }
  0xfd   : > { %7028 = vst [vmem:[#allocation6_spill] sm:$0xff] %v5324_v14  ;;  %7029 = vst [vmem:[#allocation7_spill] sm:$0xff] %v5327_v22  ;;  %v2838_v23 = vcombine.high %v1077_v16, %v1077_v16  ;;  %v2845_v24 = vrot.slane %v1077_v16, %v5306_v11  ;;  %v982_v25 = vadd.f32 %v5303_v6, %v457_v39  ;;  %4855 = vmatprep.mubr.f32.mxu1 %v473_v21 }
  0xfe   : > { %v3509_v27 = vrot.slane %v3508_v17, 1  ;;  %v3515_v28 = vmax.f32 %v3513_v9, %v3514_v18  ;;  %v3523_v29 = vrot.slane %v3522_v19, 1  ;;  %v3529_v30 = vmax.f32 %v3527_v4, %v3528_v20  ;;  %v5331_v31 = vpop.f32.mrf.mxu0 }
  0xff   : > { %v5333_v26 = vmax.f32 %v3501_v7, %v3502_v15  ;;  %v2852_v32 = vrot.slane %v2838_v23, %v5306_v11  ;;  %v2853_v33 = vcombine.high %v2845_v24, %v2845_v24  ;;  %v3532_v34 = vsel %vm1811_vm2, %v2845_v24, -inf }
 0x100   : > { %v5337_v35 = vmax.f32 %v3508_v17, %v3509_v27  ;;  %v3516_v36 = vrot.slane %v3515_v28, 1  ;;  %v3530_v37 = vrot.slane %v3529_v30, 1  ;;  %vm1014_vm5 = vcmp.gt.f32.partialorder %v982_v25, 0.0  ;;  %v479_v38 = vpop.f32.mrf.mxu0 }
 0x101   : > { %7030 = vst [vmem:[#allocation8_spill] sm:$0xff] %v5333_v26  ;;  %v2854_v39 = vcombine.high %v2852_v32, %v2852_v32  ;;  %v3533_v40 = vrot.slane %v3532_v34, 4  ;;  %v3539_v41 = vsel %vm1811_vm2, %v2853_v33, -inf  ;;  %v3546_v42 = vsel %vm1811_vm2, %v2852_v32, -inf  ;;  %4856 = vmatmul.mubr.f32.gmra.mxu1 %v479_v38 }
 0x102   : > { %v5341_v43 = vmax.f32 %v3515_v28, %v3516_v36  ;;  %v5343_v44 = vmax.f32 %v3522_v19, %v3523_v29  ;;  %v3540_v45 = vrot.slane %v3539_v41, 4  ;;  %v3547_v46 = vrot.slane %v3546_v42, 4  ;;  %v5345_v47 = vpop.f32.mrf.mxu0 }
 0x103   : > { %v3534_v48 = vmax.f32 %v3532_v34, %v3533_v40  ;;  %v3553_v49 = vsel %vm1811_vm2, %v2854_v39, -inf  ;;  %v1046_v50 = vmul.f32 0.1, %v982_v25  ;;  %v983_v51 = vadd.f32 %v5303_v6, %v463_v57 }
 0x104   : > { %7031 = vst [vmem:[#allocation9_spill] sm:$0xff] %v5341_v43  ;;  %7032 = vst [vmem:[#allocation10_spill] sm:$0xff] %v5343_v44  ;;  %v5349_v52 = vmax.f32 %v3529_v30, %v3530_v37  ;;  %v3541_v53 = vmax.f32 %v3539_v41, %v3540_v45  ;;  %v3548_v54 = vmax.f32 %v3546_v42, %v3547_v46  ;;  %v3554_v55 = vrot.slane %v3553_v49, 4  ;;  %v485_v56 = vpop.f32.mrf.mxu0 }
 0x105   : > { %v3535_v58 = vrot.slane %v3534_v48, 2  ;;  %v1078_v59 = vsel %vm1014_vm5, %v982_v25, %v1046_v50  ;;  %vm1015_vm6 = vcmp.gt.f32.partialorder %v983_v51, 0.0  ;;  %v1047_v60 = vmul.f32 0.1, %v983_v51  ;;  %4858 = vmatprep.mubr.f32.mxu1 %v485_v56 }
 0x106   : > { %7033 = vst [vmem:[#allocation11_spill] sm:$0xff] %v5349_v52  ;;  %v3542_v61 = vrot.slane %v3541_v53, 2  ;;  %v3549_v62 = vrot.slane %v3548_v54, 2  ;;  %v3555_v63 = vmax.f32 %v3553_v49, %v3554_v55  ;;  %v2855_v0 = vcombine.high %v1078_v59, %v1078_v59  ;;  %v5352_v1 = vpop.f32.mrf.mxu0 }
 0x107   : > { %v3536_v2 = vmax.f32 %v3534_v48, %v3535_v58  ;;  %v2862_v57 = vrot.slane %v1078_v59, %v5306_v11  ;;  %v1079_v3 = vsel %vm1015_vm6, %v983_v51, %v1047_v60  ;;  %v5356_v5 = vadd.f32 %v5303_v6, %v469_v12 }
 0x108   : > { %v3543_v7 = vmax.f32 %v3541_v53, %v3542_v61  ;;  %v3550_v8 = vmax.f32 %v3548_v54, %v3549_v62  ;;  %v3556_v9 = vrot.slane %v3555_v63, 2  ;;  %v2869_v10 = vrot.slane %v2855_v0, %v5306_v11  ;;  %v491_v4 = vpop.f32.mrf.mxu0 }
 0x109   : > { %v3537_v15 = vrot.slane %v3536_v2, 1  ;;  %v2870_v16 = vcombine.high %v2862_v57, %v2862_v57  ;;  %v3560_v17 = vsel %vm1811_vm2, %v2862_v57, -inf  ;;  %v2872_v18 = vcombine.high %v1079_v3, %v1079_v3  ;;  %4859 = vmatmul.mubr.f32.gmra.mxu1 %v491_v4 }
 0x10a   : > { %v3544_v19 = vrot.slane %v3543_v7, 1  ;;  %v3551_v20 = vrot.slane %v3550_v8, 1  ;;  %v3557_v21 = vmax.f32 %v3555_v63, %v3556_v9  ;;  %v2871_v23 = vcombine.high %v2869_v10, %v2869_v10  ;;  %v5360_v24 = vpop.f32.mrf.mxu0 }
 0x10b   : > { %v5362_v12 = vmax.f32 %v3536_v2, %v3537_v15  ;;  %v3561_v25 = vrot.slane %v3560_v17, 4  ;;  %v3567_v27 = vsel %vm1811_vm2, %v2870_v16, -inf  ;;  %v3574_v28 = vsel %vm1811_vm2, %v2869_v10, -inf }
 0x10c   : > { %v5366_v29 = vmax.f32 %v3543_v7, %v3544_v19  ;;  %v5368_v30 = vmax.f32 %v3550_v8, %v3551_v20  ;;  %v3558_v32 = vrot.slane %v3557_v21, 1  ;;  %v3568_v33 = vrot.slane %v3567_v27, 4  ;;  %v497_v34 = vpop.f32.mrf.mxu0 }
 0x10d   : > { %7034 = vst [vmem:[#allocation12_spill] sm:$0xff] %v5362_v12  ;;  %v3562_v37 = vmax.f32 %v3560_v17, %v3561_v25  ;;  %v3575_v38 = vrot.slane %v3574_v28, 4  ;;  %v3581_v39 = vsel %vm1811_vm2, %v2871_v23, -inf  ;;  %4861 = vmatprep.mubr.f32.mxu1 %v497_v34  ;;  %vm1016_vm7 = vcmp.gt.f32.partialorder %v5356_v5, 0.0 }
 0x10e   : > { %7035 = vst [vmem:[#allocation13_spill] sm:$0xff] %v5366_v29  ;;  %7036 = vst [vmem:[#allocation14_spill] sm:$0xff] %v5368_v30  ;;  %v5373_v40 = vmax.f32 %v3557_v21, %v3558_v32  ;;  %v3569_v45 = vmax.f32 %v3567_v27, %v3568_v33  ;;  %v5380_v46 = vpop.f32.mrf.mxu0  ;;  %v3582_v50 = vrot.slane %v3581_v39, 4  ;;  %v2879_v51 = vrot.slane %v1079_v3, %v5306_v11 }
 0x10f   : > { %v3563_v48 = vrot.slane %v3562_v37, 2  ;;  %v3576_v49 = vmax.f32 %v3574_v28, %v3575_v38  ;;  %v2886_v55 = vrot.slane %v2872_v18, %v5306_v11  ;;  %v1048_v56 = vmul.f32 0.1, %v5356_v5 }
 0x110   : > { %7037 = vst [vmem:[#allocation15_spill] sm:$0xff] %v5373_v40  ;;  %v3570_v54 = vrot.slane %v3569_v45, 2  ;;  %v503_v58 = vpop.f32.mrf.mxu0  ;;  %v3583_v61 = vmax.f32 %v3581_v39, %v3582_v50  ;;  %v2887_v62 = vcombine.high %v2879_v51, %v2879_v51  ;;  %v3588_v2 = vsel %vm1811_vm2, %v2879_v51, -inf }
 0x111   : > { %v3564_v59 = vmax.f32 %v3562_v37, %v3563_v48  ;;  %v3577_v60 = vrot.slane %v3576_v49, 2  ;;  %4862 = vmatmul.mubr.f32.gmra.mxu1 %v503_v58  ;;  %v2888_v0 = vcombine.high %v2886_v55, %v2886_v55  ;;  %v3602_v57 = vsel %vm1811_vm2, %v2886_v55, -inf }
 0x112   : > { %v3571_v63 = vmax.f32 %v3569_v45, %v3570_v54  ;;  %v5389_v3 = vpop.f32.mrf.mxu0  ;;  %v3584_v9 = vrot.slane %v3583_v61, 2  ;;  %v3589_v10 = vrot.slane %v3588_v2, 4  ;;  %v3595_v15 = vsel %vm1811_vm2, %v2887_v62, -inf }
 0x113   : > { %v3565_v7 = vrot.slane %v3564_v59, 1  ;;  %v3578_v8 = vmax.f32 %v3576_v49, %v3577_v60  ;;  %v3603_v16 = vrot.slane %v3602_v57, 4  ;;  %v3609_v17 = vsel %vm1811_vm2, %v2888_v0, -inf }
 0x114   : > { %v3572_v4 = vrot.slane %v3571_v63, 1  ;;  %v509_v18 = vpop.f32.mrf.mxu0  ;;  %v3585_v21 = vmax.f32 %v3583_v61, %v3584_v9  ;;  %v3590_v23 = vmax.f32 %v3588_v2, %v3589_v10  ;;  %v3596_v27 = vrot.slane %v3595_v15, 4 }
 0x115   : > { %v5393_v19 = vmax.f32 %v3564_v59, %v3565_v7  ;;  %v3579_v20 = vrot.slane %v3578_v8, 1  ;;  %4864 = vmatprep.mubr.f32.mxu1 %v509_v18  ;;  %v3604_v28 = vmax.f32 %v3602_v57, %v3603_v16  ;;  %v3610_v32 = vrot.slane %v3609_v17, 4 }
 0x116   : > { %v5395_v25 = vmax.f32 %v3571_v63, %v3572_v4  ;;  %v5397_v33 = vpop.f32.mrf.mxu0  ;;  %v3586_v37 = vrot.slane %v3585_v21, 1  ;;  %v3591_v39 = vrot.slane %v3590_v23, 2  ;;  %v3597_v48 = vmax.f32 %v3595_v15, %v3596_v27 }
 0x117   : > { %v5399_v34 = vmax.f32 %v3578_v8, %v3579_v20  ;;  %v3605_v49 = vrot.slane %v3604_v28, 2  ;;  %v3611_v50 = vmax.f32 %v3609_v17, %v3610_v32  ;;  %v1080_v59 = vsel %vm1016_vm7, %v5356_v5, %v1048_v56 }
 0x118   : > { %7038 = vst [vmem:[#allocation16_spill] sm:$0xff] %v5395_v25  ;;  %v515_v51 = vpop.f32.mrf.mxu0  ;;  %v5405_v54 = vmax.f32 %v3585_v21, %v3586_v37  ;;  %v3592_v58 = vmax.f32 %v3590_v23, %v3591_v39  ;;  %v3598_v60 = vrot.slane %v3597_v48, 2  ;;  %v2889_v63 = vcombine.high %v1080_v59, %v1080_v59 }
 0x119   : > { %7039 = vst [vmem:[#allocation17_spill] sm:$0xff] %v5399_v34  ;;  %4865 = vmatmul.mubr.f32.gmra.mxu1 %v515_v51  ;;  %v3606_v61 = vmax.f32 %v3604_v28, %v3605_v49  ;;  %v3612_v62 = vrot.slane %v3611_v50, 2  ;;  %v2896_v7 = vrot.slane %v1080_v59, %v5306_v11  ;;  %v985_v8 = vadd.f32 %v5303_v6, %v5331_v31 }
 0x11a   : > { %7040 = vst [vmem:[#allocation18_spill] sm:$0xff] %v5405_v54  ;;  %v5412_v0 = vpop.f32.mrf.mxu0  ;;  %v3593_v57 = vrot.slane %v3592_v58, 1  ;;  %v3599_v9 = vmax.f32 %v3597_v48, %v3598_v60  ;;  %v2903_v5 = vrot.slane %v2889_v63, %v5306_v11 }
 0x11b   : > { %v3607_v10 = vrot.slane %v3606_v61, 1  ;;  %v3613_v4 = vmax.f32 %v3611_v50, %v3612_v62  ;;  %v2904_v16 = vcombine.high %v2896_v7, %v2896_v7  ;;  %v3616_v17 = vsel %vm1811_vm2, %v2896_v7, -inf }
 0x11c   : > { %v521_v56 = vpop.f32.mrf.mxu0  ;;  %v5420_v15 = vmax.f32 %v3592_v58, %v3593_v57  ;;  %vm1017_vm8 = vcmp.gt.f32.partialorder %v985_v8, 0.0  ;;  %v3600_v18 = vrot.slane %v3599_v9, 1  ;;  %v2905_v23 = vcombine.high %v2903_v5, %v2903_v5 }
 0x11d   : > { %4867 = vmatprep.mubr.f32.mxu1 %v521_v56  ;;  %v5423_v20 = vmax.f32 %v3606_v61, %v3607_v10  ;;  %v3614_v21 = vrot.slane %v3613_v4, 1  ;;  %v3617_v31 = vrot.slane %v3616_v17, 4  ;;  %v3623_v28 = vsel %vm1811_vm2, %v2904_v16, -inf }
 0x11e   : > { %7041 = vst [vmem:[#allocation19_spill] sm:$0xff] %v5420_v15  ;;  %v5425_v27 = vpop.f32.mrf.mxu0  ;;  %v3630_v32 = vsel %vm1811_vm2, %v2903_v5, -inf  ;;  %v1049_v37 = vmul.f32 0.1, %v985_v8  ;;  %v5429_v39 = vmax.f32 %v3599_v9, %v3600_v18  ;;  %v3624_v49 = vrot.slane %v3623_v28, 4 }
 0x11f   : > { %7042 = vst [vmem:[#allocation20_spill] sm:$0xff] %v5423_v20  ;;  %v5431_v48 = vmax.f32 %v3613_v4, %v3614_v21  ;;  %v3631_v50 = vrot.slane %v3630_v32, 4  ;;  %v3618_v58 = vmax.f32 %v3616_v17, %v3617_v31  ;;  %v3637_v59 = vsel %vm1811_vm2, %v2905_v23, -inf }
 0x120   : > { %7043 = vst [vmem:[#allocation21_spill] sm:$0xff] %v5429_v39  ;;  %v527_v51 = vpop.f32.mrf.mxu0  ;;  %v1081_v60 = vsel %vm1017_vm8, %v985_v8, %v1049_v37  ;;  %v986_v61 = vadd.f32 %v5303_v6, %v5345_v47  ;;  %v3625_v62 = vmax.f32 %v3623_v28, %v3624_v49  ;;  %v3638_v57 = vrot.slane %v3637_v59, 4 }
 0x121   : > { %7044 = vst [vmem:[#allocation22_spill] sm:$0xff] %v5431_v48  ;;  %4868 = vmatmul.mubr.f32.gmra.mxu1 %v527_v51  ;;  %v3632_v63 = vmax.f32 %v3630_v32, %v3631_v50  ;;  %v2906_v7 = vcombine.high %v1081_v60, %v1081_v60  ;;  %v3619_v10 = vrot.slane %v3618_v58, 2  ;;  %v2913_v4 = vrot.slane %v1081_v60, %v5306_v11 }
 0x122   : > { %v5437_v9 = vpop.f32.mrf.mxu0  ;;  %vm1018_vm9 = vcmp.gt.f32.partialorder %v986_v61, 0.0  ;;  %v1050_v5 = vmul.f32 0.1, %v986_v61  ;;  %v3626_v56 = vrot.slane %v3625_v62, 2  ;;  %v3639_v17 = vmax.f32 %v3637_v59, %v3638_v57 }
 0x123   : > { %v3633_v16 = vrot.slane %v3632_v63, 2  ;;  %v2920_v8 = vrot.slane %v2906_v7, %v5306_v11  ;;  %v3620_v21 = vmax.f32 %v3618_v58, %v3619_v10  ;;  %v2921_v47 = vcombine.high %v2913_v4, %v2913_v4 }
 0x124   : > { %v533_v18 = vpop.f32.mrf.mxu0  ;;  %v3644_v23 = vsel %vm1811_vm2, %v2913_v4, -inf  ;;  %v1082_v31 = vsel %vm1018_vm9, %v986_v61, %v1050_v5  ;;  %v3627_v28 = vmax.f32 %v3625_v62, %v3626_v56  ;;  %v3640_v37 = vrot.slane %v3639_v17, 2 }
 0x125   : > { %4870 = vmatprep.mubr.f32.mxu1 %v533_v18  ;;  %v3634_v32 = vmax.f32 %v3632_v63, %v3633_v16  ;;  %v2922_v49 = vcombine.high %v2920_v8, %v2920_v8  ;;  %v3621_v51 = vrot.slane %v3620_v21, 1  ;;  %v3645_v60 = vrot.slane %v3644_v23, 4 }
 0x126   : > { %v5442_v50 = vpop.f32.mrf.mxu0  ;;  %v3651_v53 = vsel %vm1811_vm2, %v2921_v47, -inf  ;;  %v3658_v59 = vsel %vm1811_vm2, %v2920_v8, -inf  ;;  %v3628_v57 = vrot.slane %v3627_v28, 1  ;;  %v3641_v58 = vmax.f32 %v3639_v17, %v3640_v37 }
 0x127   : > { %v3635_v7 = vrot.slane %v3634_v32, 1  ;;  %v3652_v10 = vrot.slane %v3651_v53, 4  ;;  %v5446_v4 = vmax.f32 %v3620_v21, %v3621_v51  ;;  %v3646_v61 = vmax.f32 %v3644_v23, %v3645_v60 }
 0x128   : > { %v539_v42 = vpop.f32.mrf.mxu0  ;;  %v3659_v62 = vrot.slane %v3658_v59, 4  ;;  %v3665_v63 = vsel %vm1811_vm2, %v2922_v49, -inf  ;;  %v5449_v5 = vmax.f32 %v3627_v28, %v3628_v57  ;;  %v3642_v16 = vrot.slane %v3641_v58, 1 }
 0x129   : > { %7045 = vst [vmem:[#allocation23_spill] sm:$0xff] %v5446_v4  ;;  %4871 = vmatmul.mubr.f32.gmra.mxu1 %v539_v42  ;;  %v5451_v56 = vmax.f32 %v3634_v32, %v3635_v7  ;;  %v3653_v18 = vmax.f32 %v3651_v53, %v3652_v10  ;;  %v3647_v8 = vrot.slane %v3646_v61, 2  ;;  %v3666_v17 = vrot.slane %v3665_v63, 4 }
 0x12a   : > { %7046 = vst [vmem:[#allocation24_spill] sm:$0xff] %v5449_v5  ;;  %v5453_v47 = vpop.f32.mrf.mxu0  ;;  %v3660_v41 = vmax.f32 %v3658_v59, %v3659_v62  ;;  %v2923_v37 = vcombine.high %v1082_v31, %v1082_v31  ;;  %v5455_v36 = vmax.f32 %v3641_v58, %v3642_v16  ;;  %v2930_v23 = vrot.slane %v1082_v31, %v5306_v11 }
 0x12b   : > { %7047 = vst [vmem:[#allocation25_spill] sm:$0xff] %v5451_v56  ;;  %v3654_v21 = vrot.slane %v3653_v18, 2  ;;  %v987_v42 = vadd.f32 %v5303_v6, %v5352_v1  ;;  %v3648_v49 = vmax.f32 %v3646_v61, %v3647_v8  ;;  %v3667_v51 = vmax.f32 %v3665_v63, %v3666_v17 }
 0x12c   : > { %7048 = vst [vmem:[#allocation26_spill] sm:$0xff] %v5455_v36  ;;  %v545_v28 = vpop.f32.mrf.mxu0  ;;  %v3661_v32 = vrot.slane %v3660_v41, 2  ;;  %v2937_v53 = vrot.slane %v2923_v37, %v5306_v11  ;;  %v2938_v57 = vcombine.high %v2930_v23, %v2930_v23  ;;  %v3672_v59 = vsel %vm1811_vm2, %v2930_v23, -inf }
 0x12d   : > { %4873 = vmatprep.mubr.f32.mxu1 %v545_v28  ;;  %v3655_v60 = vmax.f32 %v3653_v18, %v3654_v21  ;;  %vm1019_vm10 = vcmp.gt.f32.partialorder %v987_v42, 0.0  ;;  %v3649_v58 = vrot.slane %v3648_v49, 1  ;;  %v3668_v31 = vrot.slane %v3667_v51, 2 }
 0x12e   : > { %v5462_v7 = vpop.f32.mrf.mxu0  ;;  %v3662_v10 = vmax.f32 %v3660_v41, %v3661_v32  ;;  %v2939_v62 = vcombine.high %v2937_v53, %v2937_v53  ;;  %v3673_v1 = vrot.slane %v3672_v59, 4  ;;  %v3679_v61 = vsel %vm1811_vm2, %v2938_v57, -inf }
 0x12f   : > { %v3656_v16 = vrot.slane %v3655_v60, 1  ;;  %v3686_v63 = vsel %vm1811_vm2, %v2937_v53, -inf  ;;  %v5466_v17 = vmax.f32 %v3648_v49, %v3649_v58  ;;  %v3669_v37 = vmax.f32 %v3667_v51, %v3668_v31 }
 0x130   : > { %v551_v8 = vpop.f32.mrf.mxu0  ;;  %v3663_v18 = vrot.slane %v3662_v10, 1  ;;  %v3680_v21 = vrot.slane %v3679_v61, 4  ;;  %v3674_v28 = vmax.f32 %v3672_v59, %v3673_v1  ;;  %v3687_v2 = vrot.slane %v3686_v63, 4 }
 0x131   : > { %7049 = vst [vmem:[#allocation27_spill] sm:$0xff] %v5466_v17  ;;  %4874 = vmatmul.mubr.f32.gmra.mxu1 %v551_v8  ;;  %v5468_v23 = vmax.f32 %v3655_v60, %v3656_v16  ;;  %v3693_v41 = vsel %vm1811_vm2, %v2939_v62, -inf  ;;  %v3670_v55 = vrot.slane %v3669_v37, 1  ;;  %v1051_v62 = vmul.f32 0.1, %v987_v42 }
 0x132   : > { %v5471_v32 = vmax.f32 %v3662_v10, %v3663_v18  ;;  %v3681_v53 = vmax.f32 %v3679_v61, %v3680_v21  ;;  %v3675_v58 = vrot.slane %v3674_v28, 2  ;;  %v3688_v51 = vmax.f32 %v3686_v63, %v3687_v2 }
 0x133   : > { %7050 = vst [vmem:[#allocation28_spill] sm:$0xff] %v5468_v23  ;;  %v3694_v31 = vrot.slane %v3693_v41, 4  ;;  %v5477_v8 = vmax.f32 %v3669_v37, %v3670_v55  ;;  %v988_v18 = vadd.f32 %v5303_v6, %v5360_v24  ;;  %v1083_v2 = vsel %vm1019_vm10, %v987_v42, %v1051_v62 }
 0x134   : > { %7051 = vst [vmem:[#allocation29_spill] sm:$0xff] %v5471_v32  ;;  %v3682_v59 = vrot.slane %v3681_v53, 2  ;;  %v3676_v10 = vmax.f32 %v3674_v28, %v3675_v58  ;;  %v3689_v16 = vrot.slane %v3688_v51, 2  ;;  %v5488_v55 = vadd.f32 %v5303_v6, %v5380_v46 }
 0x135   : > { %7052 = vst [vmem:[#allocation30_spill] sm:$0xff] %v5477_v8  ;;  %v3695_v1 = vmax.f32 %v3693_v41, %v3694_v31  ;;  %v2940_v49 = vcombine.high %v1083_v2, %v1083_v2  ;;  %v2947_v41 = vrot.slane %v1083_v2, %v5306_v11  ;;  %vm1020_vm11 = vcmp.gt.f32.partialorder %v988_v18, 0.0  ;;  %v5511_v2 = vpop.f32.mrf.mxu0 }
 0x136   : > { %v3683_v21 = vmax.f32 %v3681_v53, %v3682_v59  ;;  %v3677_v63 = vrot.slane %v3676_v10, 1  ;;  %v3690_v37 = vmax.f32 %v3688_v51, %v3689_v16  ;;  %v1052_v58 = vmul.f32 0.1, %v988_v18 }
 0x137   : > { %v3696_v60 = vrot.slane %v3695_v1, 2  ;;  %v2954_v53 = vrot.slane %v2940_v49, %v5306_v11  ;;  %v2955_v59 = vcombine.high %v2947_v41, %v2947_v41  ;;  %v3700_v46 = vsel %vm1811_vm2, %v2947_v41, -inf }
 0x138   : > { %v3684_v28 = vrot.slane %v3683_v21, 1  ;;  %v5491_v24 = vmax.f32 %v3676_v10, %v3677_v63  ;;  %v3691_v31 = vrot.slane %v3690_v37, 1  ;;  %v1084_v62 = vsel %vm1020_vm11, %v988_v18, %v1052_v58 }
 0x139   : > { %v3697_v61 = vmax.f32 %v3695_v1, %v3696_v60  ;;  %v2956_v57 = vcombine.high %v2954_v53, %v2954_v53  ;;  %v3701_v63 = vrot.slane %v3700_v46, 4  ;;  %v3707_v60 = vsel %vm1811_vm2, %v2955_v59, -inf  ;;  %v557_v59 = vpop.f32.mrf.mxu0 }
 0x13a   : > { %7053 = vst [vmem:[#allocation31_spill] sm:$0xff] %v5491_v24  ;;  %v5494_v42 = vmax.f32 %v3683_v21, %v3684_v28  ;;  %v5497_v51 = vmax.f32 %v3690_v37, %v3691_v31  ;;  %v3714_v49 = vsel %vm1811_vm2, %v2954_v53, -inf  ;;  %v3708_v21 = vrot.slane %v3707_v60, 4  ;;  %4876 = vmatprep.mubr.f32.mxu1 %v557_v59 }
 0x13b   : > { %v3698_v16 = vrot.slane %v3697_v61, 1  ;;  %v3715_v37 = vrot.slane %v3714_v49, 4  ;;  %v3702_v28 = vmax.f32 %v3700_v46, %v3701_v63  ;;  %v3721_v41 = vsel %vm1811_vm2, %v2956_v57, -inf }
 0x13c   : > { %7054 = vst [vmem:[#allocation32_spill] sm:$0xff] %v5494_v42  ;;  %7055 = vst [vmem:[#allocation33_spill] sm:$0xff] %v5497_v51  ;;  %v2957_v58 = vcombine.high %v1084_v62, %v1084_v62  ;;  %v2964_v31 = vrot.slane %v1084_v62, %v5306_v11  ;;  %v3709_v10 = vmax.f32 %v3707_v60, %v3708_v21  ;;  %vm1021_vm12 = vcmp.gt.f32.partialorder %v5488_v55, 0.0 }
 0x13d   : > { %v5505_v1 = vmax.f32 %v3697_v61, %v3698_v16  ;;  %v3716_v53 = vmax.f32 %v3714_v49, %v3715_v37  ;;  %v3722_v61 = vrot.slane %v3721_v41, 4  ;;  %v3703_v16 = vrot.slane %v3702_v28, 2 }
 0x13e   : > { %v2971_v45 = vrot.slane %v2957_v58, %v5306_v11  ;;  %v2972_v18 = vcombine.high %v2964_v31, %v2964_v31  ;;  %v3728_v38 = vsel %vm1811_vm2, %v2964_v31, -inf  ;;  %v3710_v46 = vrot.slane %v3709_v10, 2 }
 0x13f   : > { %7056 = vst [vmem:[#allocation34_spill] sm:$0xff] %v5505_v1  ;;  %v3717_v63 = vrot.slane %v3716_v53, 2  ;;  %v3723_v57 = vmax.f32 %v3721_v41, %v3722_v61  ;;  %v3729_v8 = vrot.slane %v3728_v38, 4  ;;  %v3704_v48 = vmax.f32 %v3702_v28, %v3703_v16 }
 0x140   : > { %v2973_v62 = vcombine.high %v2971_v45, %v2971_v45  ;;  %v3735_v32 = vsel %vm1811_vm2, %v2972_v18, -inf  ;;  %v3742_v20 = vsel %vm1811_vm2, %v2971_v45, -inf  ;;  %v3711_v60 = vmax.f32 %v3709_v10, %v3710_v46 }
 0x141   : > { %v3718_v49 = vmax.f32 %v3716_v53, %v3717_v63  ;;  %v3724_v21 = vrot.slane %v3723_v57, 2  ;;  %v3730_v37 = vmax.f32 %v3728_v38, %v3729_v8  ;;  %v3705_v58 = vrot.slane %v3704_v48, 1 }
 0x142   : > { %v3736_v23 = vrot.slane %v3735_v32, 4  ;;  %v3743_v39 = vrot.slane %v3742_v20, 4  ;;  %v3749_v31 = vsel %vm1811_vm2, %v2973_v62, -inf  ;;  %v3712_v18 = vrot.slane %v3711_v60, 1 }
 0x143   : > { %v3725_v17 = vmax.f32 %v3723_v57, %v3724_v21  ;;  %v3731_v41 = vrot.slane %v3730_v37, 2  ;;  %v3750_v16 = vrot.slane %v3749_v31, 4  ;;  %v5520_v15 = vmax.f32 %v3704_v48, %v3705_v58 }
 0x144   : > { %v3737_v61 = vmax.f32 %v3735_v32, %v3736_v23  ;;  %v3744_v28 = vmax.f32 %v3742_v20, %v3743_v39  ;;  %v3719_v45 = vrot.slane %v3718_v49, 1  ;;  %v1053_v59 = vmul.f32 0.1, %v5488_v55 }
 0x145   : > { %7057 = vst [vmem:[#allocation35_spill] sm:$0xff] %v5520_v15  ;;  %v3732_v1 = vmax.f32 %v3730_v37, %v3731_v41  ;;  %v3751_v46 = vmax.f32 %v3749_v31, %v3750_v16  ;;  %v3726_v38 = vrot.slane %v3725_v17, 1  ;;  %v990_v63 = vadd.f32 %v5303_v6, %v5389_v3 }
 0x146   : > { %v3738_v10 = vrot.slane %v3737_v61, 2  ;;  %v3745_v53 = vrot.slane %v3744_v28, 2  ;;  %v5530_v48 = vadd.f32 %v5303_v6, %v5397_v33  ;;  %v5532_v32 = vmax.f32 %v3711_v60, %v3712_v18 }
 0x147   : > { %v3733_v8 = vrot.slane %v3732_v1, 1  ;;  %v3752_v39 = vrot.slane %v3751_v46, 2  ;;  %v1085_v57 = vsel %vm1021_vm12, %v5488_v55, %v1053_v59  ;;  %vm1022_vm13 = vcmp.gt.f32.partialorder %v990_v63, 0.0 }
 0x148   : > { %v3739_v23 = vmax.f32 %v3737_v61, %v3738_v10  ;;  %v5526_v20 = vmax.f32 %v3744_v28, %v3745_v53  ;;  %7058 = vst [vmem:[#allocation36_spill] sm:$0xff] %v5532_v32  ;;  %v1054_v62 = vmul.f32 0.1, %v990_v63  ;;  %v5535_v21 = vmax.f32 %v3718_v49, %v3719_v45 }
 0x149   : > { %v5537_v58 = vmax.f32 %v3751_v46, %v3752_v39  ;;  %v2974_v3 = vcombine.high %v1085_v57, %v1085_v57  ;;  %v5539_v31 = vmax.f32 %v3725_v17, %v3726_v38  ;;  %v5541_v41 = vmax.f32 %v3732_v1, %v3733_v8 }
 0x14a   : > { %7059 = vst [vmem:[#allocation37_spill] sm:$0xff] %v5535_v21  ;;  %v3740_v37 = vrot.slane %v3739_v23, 1  ;;  %v2981_v61 = vrot.slane %v1085_v57, %v5306_v11  ;;  %v1086_v6 = vsel %vm1022_vm13, %v990_v63, %v1054_v62  ;;  %v5549_v49 = vmul.f32 0.1, %v5530_v48 }
 0x14b   : > { %7060 = vst [vmem:[#allocation38_spill] sm:$0xff] %v5539_v31  ;;  %7061 = vst [vmem:[#allocation39_spill] sm:$0xff] %v5541_v41  ;;  %v2988_v55 = vrot.slane %v2974_v3, %v5306_v11  ;;  %v2991_v18 = vcombine.high %v1086_v6, %v1086_v6  ;;  %v2998_v17 = vrot.slane %v1086_v6, %v5306_v11  ;;  %vm1023_vm14 = vcmp.gt.f32.partialorder %v5530_v48, 0.0 }
 0x14c   : > { %v5544_v33 = vmax.f32 %v3739_v23, %v3740_v37  ;;  %v2989_v28 = vcombine.high %v2981_v61, %v2981_v61  ;;  %v3756_v16 = vsel %vm1811_vm2, %v2981_v61, -inf }
 0x14d   : > { %v2990_v45 = vcombine.high %v2988_v55, %v2988_v55  ;;  %v3757_v10 = vrot.slane %v3756_v16, 4  ;;  %v3770_v53 = vsel %vm1811_vm2, %v2988_v55, -inf  ;;  %v3005_v8 = vrot.slane %v2991_v18, %v5306_v11  ;;  %v5562_v18 = vpop.f32.mrf.mxu0 }
 0x14e   : > { %7062 = vst [vmem:[#allocation40_spill] sm:$0xff] %v5544_v33  ;;  %v3763_v46 = vsel %vm1811_vm2, %v2989_v28, -inf  ;;  %v3771_v38 = vrot.slane %v3770_v53, 4  ;;  %v3006_v59 = vcombine.high %v2998_v17, %v2998_v17  ;;  %v3784_v57 = vsel %vm1811_vm2, %v2998_v17, -inf }
 0x14f   : > { %v3758_v63 = vmax.f32 %v3756_v16, %v3757_v10  ;;  %v3764_v23 = vrot.slane %v3763_v46, 4  ;;  %v3777_v39 = vsel %vm1811_vm2, %v2990_v45, -inf  ;;  %v3007_v3 = vcombine.high %v3005_v8, %v3005_v8  ;;  %v563_v4 = vpop.f32.mrf.mxu0 }
 0x150   : > { %v3772_v62 = vmax.f32 %v3770_v53, %v3771_v38  ;;  %v3778_v37 = vrot.slane %v3777_v39, 4  ;;  %v3785_v61 = vrot.slane %v3784_v57, 4  ;;  %v3791_v28 = vsel %vm1811_vm2, %v3006_v59, -inf  ;;  %4877 = vmatmul.mubr.f32.gmra.mxu1 %v563_v4 }
 0x151   : > { %v3759_v6 = vrot.slane %v3758_v63, 2  ;;  %v3765_v55 = vmax.f32 %v3763_v46, %v3764_v23  ;;  %v3798_v1 = vsel %vm1811_vm2, %v3005_v8, -inf  ;;  %v3792_v45 = vrot.slane %v3791_v28, 4  ;;  %v5565_v46 = vpop.f32.mrf.mxu1 }
 0x152   : > { %v3773_v16 = vrot.slane %v3772_v62, 2  ;;  %v3779_v10 = vmax.f32 %v3777_v39, %v3778_v37  ;;  %v3786_v60 = vmax.f32 %v3784_v57, %v3785_v61  ;;  %v3799_v53 = vrot.slane %v3798_v1, 4 }
 0x153   : > { %v3760_v36 = vmax.f32 %v3758_v63, %v3759_v6  ;;  %v3766_v17 = vrot.slane %v3765_v55, 2  ;;  %v3805_v38 = vsel %vm1811_vm2, %v3007_v3, -inf  ;;  %v3793_v56 = vmax.f32 %v3791_v28, %v3792_v45  ;;  %v5571_v26 = vpop.f32.mrf.mxu1 }
 0x154   : > { %v3774_v42 = vmax.f32 %v3772_v62, %v3773_v16  ;;  %v3780_v5 = vrot.slane %v3779_v10, 2  ;;  %v3787_v51 = vrot.slane %v3786_v60, 2  ;;  %v3800_v8 = vmax.f32 %v3798_v1, %v3799_v53 }
 0x155   : > { %v3761_v59 = vrot.slane %v3760_v36, 1  ;;  %v3767_v23 = vmax.f32 %v3765_v55, %v3766_v17  ;;  %v3806_v24 = vrot.slane %v3805_v38, 4  ;;  %v3794_v37 = vrot.slane %v3793_v56, 2 }
 0x156   : > { %v3775_v40 = vrot.slane %v3774_v42, 1  ;;  %v3781_v39 = vmax.f32 %v3779_v10, %v3780_v5  ;;  %v3788_v57 = vmax.f32 %v3786_v60, %v3787_v51  ;;  %v3801_v3 = vrot.slane %v3800_v8, 2 }
 0x157   : > { %v5567_v63 = vmax.f32 %v3760_v36, %v3761_v59  ;;  %v3768_v61 = vrot.slane %v3767_v23, 1  ;;  %v3807_v62 = vmax.f32 %v3805_v38, %v3806_v24  ;;  %v3795_v45 = vmax.f32 %v3793_v56, %v3794_v37 }
 0x158   : > { %v5569_v6 = vmax.f32 %v3774_v42, %v3775_v40  ;;  %v3782_v28 = vrot.slane %v3781_v39, 1  ;;  %v3789_v16 = vrot.slane %v3788_v57, 1  ;;  %v3802_v51 = vmax.f32 %v3800_v8, %v3801_v3 }
 0x159   : > { %7063 = vst [vmem:[#allocation41_spill] sm:$0xff] %v5567_v63  ;;  %v5573_v1 = vmax.f32 %v3767_v23, %v3768_v61  ;;  %v3808_v60 = vrot.slane %v3807_v62, 2  ;;  %v3796_v40 = vrot.slane %v3795_v45, 1  ;;  %v1087_v10 = vsel %vm1023_vm14, %v5530_v48, %v5549_v49  ;;  %v5595_v23 = vpop.f32.mrf.mxu1  ;;  %v5607_v48 = vld [vmem:[%s6918_s4] ss:$0 sm:$0xff] }
 0x15a   : > { %7064 = vst [vmem:[#allocation42_spill] sm:$0xff] %v5569_v6  ;;  %v5577_v4 = vmax.f32 %v3781_v39, %v3782_v28  ;;  %v5581_v24 = vmax.f32 %v3788_v57, %v3789_v16  ;;  %v3803_v42 = vrot.slane %v3802_v51, 1  ;;  %v3008_v59 = vcombine.high %v1087_v10, %v1087_v10 }
 0x15b   : > { %7065 = vst [vmem:[#allocation43_spill] sm:$0xff] %v5573_v1  ;;  %v3809_v55 = vmax.f32 %v3807_v62, %v3808_v60  ;;  %v5591_v53 = vmax.f32 %v3795_v45, %v3796_v40  ;;  %v7069_v8 = vrot.slane %v5526_v20, 1  ;;  %v992_v49 = vadd.f32 %v5607_v48, %v5412_v0 }
 0x15c   : > { %7066 = vst [vmem:[#allocation44_spill] sm:$0xff] %v5577_v4  ;;  %7067 = vst [vmem:[#allocation45_spill] sm:$0xff] %v5581_v24  ;;  %v5602_v57 = vmax.f32 %v3802_v51, %v3803_v42  ;;  %v3015_v3 = vrot.slane %v1087_v10, %v5306_v11  ;;  %v7072_v62 = vrot.slane %v5537_v58, 1  ;;  %v993_v45 = vadd.f32 %v5607_v48, %v5425_v27  ;;  %v5626_v51 = vpop.f32.mrf.mxu1  ;;  %v5634_v27 = vpop.f32.mrf.mxu0 }
 0x15d   : > { %7068 = vst [vmem:[#allocation46_spill] sm:$0xff] %v5591_v53  ;;  %v5600_v39 = vmax.f32 %v5526_v20, %v7069_v8  ;;  %v3810_v37 = vrot.slane %v3809_v55, 1  ;;  %v3022_v0 = vrot.slane %v3008_v59, %v5306_v11  ;;  %vm1024_vm15 = vcmp.gt.f32.partialorder %v992_v49, 0.0 }
 0x15e   : > { %7071 = vst [vmem:[#allocation48_spill] sm:$0xff] %v5602_v57  ;;  %v5617_v20 = vmax.f32 %v5537_v58, %v7072_v62  ;;  %v1056_v40 = vmul.f32 0.1, %v992_v49  ;;  %v3023_v42 = vcombine.high %v3015_v3, %v3015_v3  ;;  %v3812_v58 = vsel %vm1811_vm2, %v3015_v3, -inf  ;;  %v5632_v62 = vpop.f32.mrf.mxu1 }
 0x15f   : > { %7070 = vst [vmem:[#allocation47_spill] sm:$0xff] %v5600_v39  ;;  %v5619_v28 = vmax.f32 %v3809_v55, %v3810_v37  ;;  %vm1025_vm0 = vcmp.gt.f32.partialorder %v993_v45, 0.0  ;;  %v1057_v10 = vmul.f32 0.1, %v993_v45  ;;  %v3024_v8 = vcombine.high %v3022_v0, %v3022_v0 }
 0x160   : > { %7073 = vst [vmem:[#allocation49_spill] sm:$0xff] %v5617_v20  ;;  %v1088_v55 = vsel %vm1024_vm15, %v992_v49, %v1056_v40  ;;  %v3826_v37 = vsel %vm1811_vm2, %v3022_v0, -inf  ;;  %v3813_v17 = vrot.slane %v3812_v58, 4  ;;  %v3819_v36 = vsel %vm1811_vm2, %v3023_v42, -inf  ;;  %v5639_v49 = vpop.f32.mrf.mxu1  ;;  %v569_v40 = vpop.f32.mrf.mxu0 }
 0x161   : > { %7074 = vst [vmem:[#allocation50_spill] sm:$0xff] %v5619_v28  ;;  %v3032_v59 = vrot.slane %v1088_v55, %v5306_v11  ;;  %v3025_v56 = vcombine.high %v1088_v55, %v1088_v55  ;;  %v1089_v5 = vsel %vm1025_vm0, %v993_v45, %v1057_v10  ;;  %v3827_v60 = vrot.slane %v3826_v37, 4  ;;  %4879 = vmatprep.mubr.f32.mxu1 %v569_v40 }
 0x162   : > { %v3833_v3 = vsel %vm1811_vm2, %v3024_v8, -inf  ;;  %v3820_v16 = vrot.slane %v3819_v36, 4  ;;  %v3042_v0 = vcombine.high %v1089_v5, %v1089_v5  ;;  %v3814_v38 = vmax.f32 %v3812_v58, %v3813_v17  ;;  %v5645_v42 = vpop.f32.mrf.mxu1 }
 0x163   : > { %v3040_v61 = vcombine.high %v3032_v59, %v3032_v59  ;;  %v3039_v4 = vrot.slane %v3025_v56, %v5306_v11  ;;  %v3828_v31 = vmax.f32 %v3826_v37, %v3827_v60  ;;  %v3834_v6 = vrot.slane %v3833_v3, 4 }
 0x164   : > { %v3840_v21 = vsel %vm1811_vm2, %v3032_v59, -inf  ;;  %v994_v45 = vadd.f32 %v5607_v48, %v5437_v9  ;;  %v3821_v55 = vmax.f32 %v3819_v36, %v3820_v16  ;;  %v3049_v8 = vrot.slane %v1089_v5, %v5306_v11  ;;  %v5652_v36 = vpop.f32.mrf.mxu1 }
 0x165   : > { %v3847_v10 = vsel %vm1811_vm2, %v3040_v61, -inf  ;;  %v3056_v1 = vrot.slane %v3042_v0, %v5306_v11  ;;  %v3815_v40 = vrot.slane %v3814_v38, 2  ;;  %v3041_v17 = vcombine.high %v3039_v4, %v3039_v4 }
 0x166   : > { %v3841_v58 = vrot.slane %v3840_v21, 4  ;;  %v3829_v56 = vrot.slane %v3828_v31, 2  ;;  %v3835_v60 = vmax.f32 %v3833_v3, %v3834_v6  ;;  %v3854_v37 = vsel %vm1811_vm2, %v3039_v4, -inf  ;;  %v5658_v33 = vpop.f32.mrf.mxu1 }
 0x167   : > { %v3057_v59 = vcombine.high %v3049_v8, %v3049_v8  ;;  %v3848_v32 = vrot.slane %v3847_v10, 4  ;;  %v3058_v63 = vcombine.high %v3056_v1, %v3056_v1  ;;  %v3868_v9 = vsel %vm1811_vm2, %v3049_v8, -inf }
 0x168   : > { %v1058_v15 = vmul.f32 0.1, %v994_v45  ;;  %v3822_v61 = vrot.slane %v3821_v55, 2  ;;  %vm1026_vm1 = vcmp.gt.f32.partialorder %v994_v45, 0.0  ;;  %v3842_v5 = vmax.f32 %v3840_v21, %v3841_v58 }
 0x169   : > { %v3855_v16 = vrot.slane %v3854_v37, 4  ;;  %v3861_v0 = vsel %vm1811_vm2, %v3041_v17, -inf  ;;  %v3875_v28 = vsel %vm1811_vm2, %v3057_v59, -inf  ;;  %v3816_v20 = vmax.f32 %v3814_v38, %v3815_v40 }
 0x16a   : > { %v3830_v6 = vmax.f32 %v3828_v31, %v3829_v56  ;;  %v3869_v3 = vrot.slane %v3868_v9, 4  ;;  %v3882_v4 = vsel %vm1811_vm2, %v3056_v1, -inf  ;;  %v3836_v57 = vrot.slane %v3835_v60, 2 }
 0x16b   : > { %v3849_v39 = vmax.f32 %v3847_v10, %v3848_v32  ;;  %v3889_v8 = vsel %vm1811_vm2, %v3058_v63, -inf  ;;  %v1090_v53 = vsel %vm1026_vm1, %v994_v45, %v1058_v15  ;;  %v3823_v24 = vmax.f32 %v3821_v55, %v3822_v61  ;;  %v5661_v10 = vpop.f32.mrf.mxu1  ;;  %v5663_v15 = vpop.f32.mrf.mxu0 }
 0x16c   : > { %v3862_v41 = vrot.slane %v3861_v0, 4  ;;  %v3876_v21 = vrot.slane %v3875_v28, 4  ;;  %v3843_v58 = vrot.slane %v3842_v5, 2  ;;  %v3856_v30 = vmax.f32 %v3854_v37, %v3855_v16 }
 0x16d   : > { %v3883_v17 = vrot.slane %v3882_v4, 4  ;;  %v3066_v59 = vrot.slane %v1090_v53, %v5306_v11  ;;  %v3870_v38 = vmax.f32 %v3868_v9, %v3869_v3  ;;  %v3890_v31 = vrot.slane %v3889_v8, 4 }
 0x16e   : > { %v3059_v40 = vcombine.high %v1090_v53, %v1090_v53  ;;  %v3817_v56 = vrot.slane %v3816_v20, 1  ;;  %v3831_v1 = vrot.slane %v3830_v6, 1  ;;  %v3837_v22 = vmax.f32 %v3835_v60, %v3836_v57 }
 0x16f   : > { %v3850_v32 = vrot.slane %v3849_v39, 2  ;;  %v3824_v63 = vrot.slane %v3823_v24, 1  ;;  %v3863_v45 = vmax.f32 %v3861_v0, %v3862_v41  ;;  %v3877_v55 = vmax.f32 %v3875_v28, %v3876_v21  ;;  %v5673_v28 = vpop.f32.mrf.mxu1  ;;  %v575_v0 = vpop.f32.mrf.mxu0 }
 0x170   : > { %v3896_v61 = vsel %vm1811_vm2, %v3066_v59, -inf  ;;  %v3844_v37 = vmax.f32 %v3842_v5, %v3843_v58  ;;  %v3857_v16 = vrot.slane %v3856_v30, 2  ;;  %v3884_v29 = vmax.f32 %v3882_v4, %v3883_v17  ;;  %4880 = vmatmul.mubr.f32.gmra.mxu1 %v575_v0 }
 0x171   : > { %v3074_v14 = vcombine.high %v3066_v59, %v3066_v59  ;;  %v3871_v9 = vrot.slane %v3870_v38, 2  ;;  %v3891_v3 = vmax.f32 %v3889_v8, %v3890_v31  ;;  %v3073_v53 = vrot.slane %v3059_v40, %v5306_v11  ;;  %4882 = vmatprep.mubr.f32.mxu1 %v5565_v46 }
 0x172   : > { %v1003_v57 = vadd.f32 %v5607_v48, %v5571_v26  ;;  %v5669_v60 = vmax.f32 %v3816_v20, %v3817_v56  ;;  %v5671_v12 = vmax.f32 %v3830_v6, %v3831_v1  ;;  %v3851_v13 = vmax.f32 %v3849_v39, %v3850_v32  ;;  %v5680_v1 = vpop.f32.mrf.mxu1 }
 0x173   : > { %v3897_v41 = vrot.slane %v3896_v61, 4  ;;  %v5675_v5 = vmax.f32 %v3823_v24, %v3824_v63  ;;  %v3838_v4 = vrot.slane %v3837_v22, 1  ;;  %v3864_v21 = vrot.slane %v3863_v45, 2 }
 0x174   : > { %7075 = vst [vmem:[#allocation51_spill] sm:$0xff] %v5669_v60  ;;  %7076 = vst [vmem:[#allocation52_spill] sm:$0xff] %v5671_v12  ;;  %v3878_v58 = vrot.slane %v3877_v55, 2  ;;  %v3845_v8 = vrot.slane %v3844_v37, 1  ;;  %v3858_v17 = vmax.f32 %v3856_v30, %v3857_v16  ;;  %v3885_v59 = vrot.slane %v3884_v29, 2  ;;  %4883 = vmatmul.mubr.f32.gmra.mxu1 %v5595_v23 }
 0x175   : > { %7077 = vst [vmem:[#allocation53_spill] sm:$0xff] %v5675_v5  ;;  %v3903_v26 = vsel %vm1811_vm2, %v3074_v14, -inf  ;;  %v3872_v20 = vmax.f32 %v3870_v38, %v3871_v9  ;;  %v3892_v6 = vrot.slane %v3891_v3, 2  ;;  %v3910_v39 = vsel %vm1811_vm2, %v3073_v53, -inf  ;;  %4885 = vmatprep.mubr.f32.mxu1 %v5632_v62 }
 0x176   : > { %vm1035_vm3 = vcmp.gt.f32.partialorder %v1003_v57, 0.0  ;;  %v3852_v31 = vrot.slane %v3851_v13, 1  ;;  %v3075_v40 = vcombine.high %v3073_v53, %v3073_v53  ;;  %v3898_v24 = vmax.f32 %v3896_v61, %v3897_v41 }
 0x177   : > { %v1067_v56 = vmul.f32 0.1, %v1003_v57  ;;  %v3865_v32 = vmax.f32 %v3863_v45, %v3864_v21  ;;  %v3879_v63 = vmax.f32 %v3877_v55, %v3878_v58  ;;  %v3904_v0 = vrot.slane %v3903_v26, 4  ;;  %v617_v21 = vpop.f32.mrf.mxu1 }
 0x178   : > { %v995_v30 = vadd.f32 %v5607_v48, %v5442_v50  ;;  %v3859_v14 = vrot.slane %v3858_v17, 1  ;;  %v3886_v46 = vmax.f32 %v3884_v29, %v3885_v59  ;;  %v3911_v38 = vrot.slane %v3910_v39, 4  ;;  %4886 = vmatmul.mubr.f32.gmra.mxu1 %v5645_v42 }
 0x179   : > { %v1099_v16 = vsel %vm1035_vm3, %v1003_v57, %v1067_v56  ;;  %v3873_v9 = vrot.slane %v3872_v20, 1  ;;  %v3893_v53 = vmax.f32 %v3891_v3, %v3892_v6  ;;  %v3899_v54 = vrot.slane %v3898_v24, 2  ;;  %4888 = vmatprep.mubr.f32.mxu1 %v5658_v33 }
 0x17a   : > { %v3212_v61 = vcombine.high %v1099_v16, %v1099_v16  ;;  %v3219_v41 = vrot.slane %v1099_v16, %v5306_v11  ;;  %v3917_v45 = vsel %vm1811_vm2, %v3075_v40, -inf  ;;  %vm1027_vm4 = vcmp.gt.f32.partialorder %v995_v30, 0.0 }
 0x17b   : > { %v1059_v55 = vmul.f32 0.1, %v995_v30  ;;  %v5688_v50 = vmax.f32 %v3837_v22, %v3838_v4  ;;  %v3866_v23 = vrot.slane %v3865_v32, 1  ;;  %v3880_v58 = vrot.slane %v3879_v63, 1 }
 0x17c   : > { %v3905_v29 = vmax.f32 %v3903_v26, %v3904_v0  ;;  %v5691_v57 = vmax.f32 %v3844_v37, %v3845_v8  ;;  %v3887_v62 = vrot.slane %v3886_v46, 1  ;;  %v3912_v3 = vmax.f32 %v3910_v39, %v3911_v38  ;;  %v5702_v37 = vpop.f32.mrf.mxu1  ;;  %4889 = vmatmul.mubr.f32.gmra.mxu1 %v5673_v28 }
 0x17d   : > { %7078 = vst [vmem:[#allocation54_spill] sm:$0xff] %v5688_v50  ;;  %v3226_v59 = vrot.slane %v3212_v61, %v5306_v11  ;;  %v3894_v6 = vrot.slane %v3893_v53, 1  ;;  %v3918_v40 = vrot.slane %v3917_v45, 4  ;;  %v3227_v56 = vcombine.high %v3219_v41, %v3219_v41  ;;  %4891 = vmatprep.mubr.f32.mxu1 %v617_v21 }
 0x17e   : > { %7079 = vst [vmem:[#allocation55_spill] sm:$0xff] %v5691_v57  ;;  %v1091_v16 = vsel %vm1027_vm4, %v995_v30, %v1059_v55  ;;  %v5696_v22 = vmax.f32 %v3851_v13, %v3852_v31  ;;  %v5698_v4 = vmax.f32 %v3858_v17, %v3859_v14  ;;  %v5700_v26 = vmax.f32 %v3872_v20, %v3873_v9  ;;  %v623_v28 = vpop.f32.mrf.mxu1 }
 0x17f   : > { %v3900_v42 = vmax.f32 %v3898_v24, %v3899_v54  ;;  %v5704_v8 = vmax.f32 %v3865_v32, %v3866_v23  ;;  %v5706_v39 = vmax.f32 %v3879_v63, %v3880_v58  ;;  %v3906_v0 = vrot.slane %v3905_v29, 2 }
 0x180   : > { %7080 = vst [vmem:[#allocation56_spill] sm:$0xff] %v5696_v22  ;;  %7081 = vst [vmem:[#allocation57_spill] sm:$0xff] %v5698_v4  ;;  %v4148_v33 = vsel %vm1811_vm2, %v3219_v41, -inf  ;;  %v5710_v38 = vmax.f32 %v3886_v46, %v3887_v62  ;;  %v3913_v13 = vrot.slane %v3912_v3, 2  ;;  %v3228_v31 = vcombine.high %v3226_v59, %v3226_v59  ;;  %4892 = vmatmul.mubr.f32.gmra.mxu1 %v623_v28 }
 0x181   : > { %7082 = vst [vmem:[#allocation58_spill] sm:$0xff] %v5700_v26  ;;  %7083 = vst [vmem:[#allocation59_spill] sm:$0xff] %v5704_v8  ;;  %v3083_v17 = vrot.slane %v1091_v16, %v5306_v11  ;;  %v5713_v20 = vmax.f32 %v3893_v53, %v3894_v6  ;;  %v3919_v54 = vmax.f32 %v3917_v45, %v3918_v40  ;;  %v4155_v24 = vsel %vm1811_vm2, %v3227_v56, -inf }
 0x182   : > { %7084 = vst [vmem:[#allocation60_spill] sm:$0xff] %v5706_v39  ;;  %7085 = vst [vmem:[#allocation61_spill] sm:$0xff] %v5710_v38  ;;  %v3076_v32 = vcombine.high %v1091_v16, %v1091_v16  ;;  %v3901_v30 = vrot.slane %v3900_v42, 1  ;;  %v4149_v14 = vrot.slane %v4148_v33, 4  ;;  %v3907_v61 = vmax.f32 %v3905_v29, %v3906_v0 }
 0x183   : > { %7086 = vst [vmem:[#allocation62_spill] sm:$0xff] %v5713_v20  ;;  %v3091_v9 = vcombine.high %v3083_v17, %v3083_v17  ;;  %v4162_v41 = vsel %vm1811_vm2, %v3226_v59, -inf  ;;  %v1004_v53 = vadd.f32 %v5607_v48, %v5626_v51  ;;  %v3914_v45 = vmax.f32 %v3912_v3, %v3913_v13 }
 0x184   : > { %v4156_v55 = vrot.slane %v4155_v24, 4  ;;  %v4169_v21 = vsel %vm1811_vm2, %v3228_v31, -inf  ;;  %v3924_v23 = vsel %vm1811_vm2, %v3083_v17, -inf  ;;  %v3920_v6 = vrot.slane %v3919_v54, 2 }
 0x185   : > { %v3090_v29 = vrot.slane %v3076_v32, %v5306_v11  ;;  %v5730_v59 = vmax.f32 %v3900_v42, %v3901_v30  ;;  %v4150_v40 = vmax.f32 %v4148_v33, %v4149_v14  ;;  %v4163_v51 = vrot.slane %v4162_v41, 4 }
 0x186   : > { %v3931_v3 = vsel %vm1811_vm2, %v3091_v9, -inf  ;;  %v4170_v56 = vrot.slane %v4169_v21, 4  ;;  %v3925_v16 = vrot.slane %v3924_v23, 4  ;;  %vm1036_vm5 = vcmp.gt.f32.partialorder %v1004_v53, 0.0 }
 0x187   : > { %7087 = vst [vmem:[#allocation63_spill] sm:$0xff] %v5730_v59  ;;  %v996_v0 = vadd.f32 %v5607_v48, %v5453_v47  ;;  %v3908_v13 = vrot.slane %v3907_v61, 1  ;;  %v3915_v31 = vrot.slane %v3914_v45, 1  ;;  %v4157_v17 = vmax.f32 %v4155_v24, %v4156_v55 }
 0x188   : > { %v1068_v28 = vmul.f32 0.1, %v1004_v53  ;;  %v3921_v62 = vmax.f32 %v3919_v54, %v3920_v6  ;;  %v3092_v58 = vcombine.high %v3090_v29, %v3090_v29  ;;  %v3932_v46 = vrot.slane %v3931_v3, 4 }
 0x189   : > { %v3938_v42 = vsel %vm1811_vm2, %v3090_v29, -inf  ;;  %v4151_v32 = vrot.slane %v4150_v40, 2  ;;  %v4164_v30 = vmax.f32 %v4162_v41, %v4163_v51  ;;  %v4171_v9 = vmax.f32 %v4169_v21, %v4170_v56 }
 0x18a   : > { %v1100_v14 = vsel %vm1036_vm5, %v1004_v53, %v1068_v28  ;;  %v3926_v63 = vmax.f32 %v3924_v23, %v3925_v16  ;;  %v5739_v50 = vmax.f32 %v3907_v61, %v3908_v13  ;;  %v5741_v24 = vmax.f32 %v3914_v45, %v3915_v31 }
 0x18b   : > { %v3229_v20 = vcombine.high %v1100_v14, %v1100_v14  ;;  %v3236_v47 = vrot.slane %v1100_v14, %v5306_v11  ;;  %v4158_v54 = vrot.slane %v4157_v17, 2  ;;  %v3939_v55 = vrot.slane %v3938_v42, 4 }
 0x18c   : > { %7088 = vst [vmem:[#allocation64_spill] sm:$0xff] %v5739_v50  ;;  %7089 = vst [vmem:[#allocation65_spill] sm:$0xff] %v5741_v24  ;;  %v3922_v6 = vrot.slane %v3921_v62, 1  ;;  %v3933_v38 = vmax.f32 %v3931_v3, %v3932_v46  ;;  %v3945_v29 = vsel %vm1811_vm2, %v3092_v58, -inf  ;;  %v4152_v12 = vmax.f32 %v4150_v40, %v4151_v32 }
 0x18d   : > { %v3243_v33 = vrot.slane %v3229_v20, %v5306_v11  ;;  %v4165_v41 = vrot.slane %v4164_v30, 2  ;;  %v3244_v53 = vcombine.high %v3236_v47, %v3236_v47  ;;  %v1060_v21 = vmul.f32 0.1, %v996_v0 }
 0x18e   : > { %v4172_v23 = vrot.slane %v4171_v9, 2  ;;  %v3927_v51 = vrot.slane %v3926_v63, 2  ;;  %v4176_v56 = vsel %vm1811_vm2, %v3236_v47, -inf  ;;  %vm1028_vm6 = vcmp.gt.f32.partialorder %v996_v0, 0.0 }
 0x18f   : > { %v4159_v61 = vmax.f32 %v4157_v17, %v4158_v54  ;;  %v3940_v45 = vmax.f32 %v3938_v42, %v3939_v55  ;;  %v3946_v16 = vrot.slane %v3945_v29, 4  ;;  %v3245_v13 = vcombine.high %v3243_v33, %v3243_v33 }
 0x190   : > { %v5746_v31 = vmax.f32 %v3921_v62, %v3922_v6  ;;  %v3934_v58 = vrot.slane %v3933_v38, 2  ;;  %v4166_v40 = vmax.f32 %v4164_v30, %v4165_v41  ;;  %v4177_v3 = vrot.slane %v4176_v56, 4 }
 0x191   : > { %v4183_v28 = vsel %vm1811_vm2, %v3244_v53, -inf  ;;  %v1092_v32 = vsel %vm1028_vm6, %v996_v0, %v1060_v21  ;;  %v4153_v14 = vrot.slane %v4152_v12, 1  ;;  %v4173_v47 = vmax.f32 %v4171_v9, %v4172_v23 }
 0x192   : > { %7090 = vst [vmem:[#allocation66_spill] sm:$0xff] %v5746_v31  ;;  %v3928_v17 = vmax.f32 %v3926_v63, %v3927_v51  ;;  %v4190_v42 = vsel %vm1811_vm2, %v3243_v33, -inf  ;;  %v4160_v54 = vrot.slane %v4159_v61, 1  ;;  %v3941_v62 = vrot.slane %v3940_v45, 2 }
 0x193   : > { %v3947_v55 = vmax.f32 %v3945_v29, %v3946_v16  ;;  %v4197_v6 = vsel %vm1811_vm2, %v3245_v13, -inf  ;;  %v3935_v20 = vmax.f32 %v3933_v38, %v3934_v58  ;;  %v4184_v39 = vrot.slane %v4183_v28, 4 }
 0x194   : > { %v3100_v30 = vrot.slane %v1092_v32, %v5306_v11  ;;  %v4167_v41 = vrot.slane %v4166_v40, 1  ;;  %v4178_v53 = vmax.f32 %v4176_v56, %v4177_v3  ;;  %v4191_v0 = vrot.slane %v4190_v42, 4 }
 0x195   : > { %v3093_v21 = vcombine.high %v1092_v32, %v1092_v32  ;;  %v4174_v9 = vrot.slane %v4173_v47, 1  ;;  %v3929_v63 = vrot.slane %v3928_v17, 1  ;;  %v4198_v23 = vrot.slane %v4197_v6, 4 }
 0x196   : > { %v1005_v33 = vadd.f32 %v5607_v48, %v5639_v49  ;;  %v5760_v29 = vmax.f32 %v4152_v12, %v4153_v14  ;;  %v5762_v51 = vmax.f32 %v4159_v61, %v4160_v54  ;;  %v3942_v16 = vmax.f32 %v3940_v45, %v3941_v62 }
 0x197   : > { %v3948_v13 = vrot.slane %v3947_v55, 2  ;;  %v3936_v38 = vrot.slane %v3935_v20, 1  ;;  %v4185_v58 = vmax.f32 %v4183_v28, %v4184_v39  ;;  %v3108_v46 = vcombine.high %v3100_v30, %v3100_v30 }
 0x198   : > { %7091 = vst [vmem:[#allocation67_spill] sm:$0xff] %v5760_v29  ;;  %7092 = vst [vmem:[#allocation68_spill] sm:$0xff] %v5762_v51  ;;  %v3952_v31 = vsel %vm1811_vm2, %v3100_v30, -inf  ;;  %v5765_v56 = vmax.f32 %v4166_v40, %v4167_v41  ;;  %v4179_v3 = vrot.slane %v4178_v53, 2  ;;  %v4192_v32 = vmax.f32 %v4190_v42, %v4191_v0 }
 0x199   : > { %v3107_v8 = vrot.slane %v3093_v21, %v5306_v11  ;;  %v5768_v5 = vmax.f32 %v4173_v47, %v4174_v9  ;;  %v5770_v49 = vmax.f32 %v3928_v17, %v3929_v63  ;;  %v4199_v12 = vmax.f32 %v4197_v6, %v4198_v23 }
 0x19a   : > { %7093 = vst [vmem:[#allocation69_spill] sm:$0xff] %v5765_v56  ;;  %vm1037_vm7 = vcmp.gt.f32.partialorder %v1005_v33, 0.0  ;;  %v3943_v61 = vrot.slane %v3942_v16, 1  ;;  %v3949_v45 = vmax.f32 %v3947_v55, %v3948_v13  ;;  %v3953_v14 = vrot.slane %v3952_v31, 4 }
 0x19b   : > { %7094 = vst [vmem:[#allocation70_spill] sm:$0xff] %v5768_v5  ;;  %v1069_v54 = vmul.f32 0.1, %v1005_v33  ;;  %v5772_v39 = vmax.f32 %v3935_v20, %v3936_v38  ;;  %v4186_v28 = vrot.slane %v4185_v58, 2  ;;  %v3959_v40 = vsel %vm1811_vm2, %v3108_v46, -inf }
 0x19c   : > { %v997_v42 = vadd.f32 %v5607_v48, %v5462_v7  ;;  %v4180_v62 = vmax.f32 %v4178_v53, %v4179_v3  ;;  %v4193_v30 = vrot.slane %v4192_v32, 2  ;;  %v3966_v47 = vsel %vm1811_vm2, %v3107_v8, -inf }
 0x19d   : > { %v1101_v17 = vsel %vm1037_vm7, %v1005_v33, %v1069_v54  ;;  %v4200_v41 = vrot.slane %v4199_v12, 2  ;;  %v3109_v6 = vcombine.high %v3107_v8, %v3107_v8  ;;  %v3954_v21 = vmax.f32 %v3952_v31, %v3953_v14 }
 0x19e   : > { %v3246_v0 = vcombine.high %v1101_v17, %v1101_v17  ;;  %v3253_v55 = vrot.slane %v1101_v17, %v5306_v11  ;;  %v3960_v9 = vrot.slane %v3959_v40, 4  ;;  %vm1029_vm8 = vcmp.gt.f32.partialorder %v997_v42, 0.0 }
 0x19f   : > { %v1061_v20 = vmul.f32 0.1, %v997_v42  ;;  %v4187_v63 = vmax.f32 %v4185_v58, %v4186_v28  ;;  %v3967_v23 = vrot.slane %v3966_v47, 4  ;;  %v3950_v53 = vrot.slane %v3949_v45, 1 }
 0x1a0   : > { %v3260_v46 = vrot.slane %v3246_v0, %v5306_v11  ;;  %v4204_v7 = vsel %vm1811_vm2, %v3253_v55, -inf  ;;  %v4181_v13 = vrot.slane %v4180_v62, 1  ;;  %v3261_v38 = vcombine.high %v3253_v55, %v3253_v55 }
 0x1a1   : > { %v1093_v3 = vsel %vm1029_vm8, %v997_v42, %v1061_v20  ;;  %v4194_v33 = vmax.f32 %v4192_v32, %v4193_v30  ;;  %v3973_v8 = vsel %vm1811_vm2, %v3109_v6, -inf  ;;  %v4205_v54 = vrot.slane %v4204_v7, 4 }
 0x1a2   : > { %v3110_v26 = vcombine.high %v1093_v3, %v1093_v3  ;;  %v4201_v17 = vmax.f32 %v4199_v12, %v4200_v41  ;;  %v3955_v31 = vrot.slane %v3954_v21, 2  ;;  %v3961_v14 = vmax.f32 %v3959_v40, %v3960_v9 }
 0x1a3   : > { %v3262_v60 = vcombine.high %v3260_v46, %v3260_v46  ;;  %v5782_v24 = vmax.f32 %v3942_v16, %v3943_v61  ;;  %v4188_v58 = vrot.slane %v4187_v63, 1  ;;  %v3968_v28 = vmax.f32 %v3966_v47, %v3967_v23 }
 0x1a4   : > { %v3117_v0 = vrot.slane %v1093_v3, %v5306_v11  ;;  %v3974_v4 = vrot.slane %v3973_v8, 4  ;;  %v4211_v50 = vsel %vm1811_vm2, %v3261_v38, -inf  ;;  %v4218_v42 = vsel %vm1811_vm2, %v3260_v46, -inf }
 0x1a5   : > { %v3124_v32 = vrot.slane %v3110_v26, %v5306_v11  ;;  %v5788_v30 = vmax.f32 %v3949_v45, %v3950_v53  ;;  %v5790_v6 = vmax.f32 %v4180_v62, %v4181_v13  ;;  %v4195_v12 = vrot.slane %v4194_v33, 1 }
 0x1a6   : > { %v4206_v40 = vmax.f32 %v4204_v7, %v4205_v54  ;;  %v4202_v41 = vrot.slane %v4201_v17, 1  ;;  %v3956_v16 = vmax.f32 %v3954_v21, %v3955_v31  ;;  %v3962_v61 = vrot.slane %v3961_v14, 2 }
 0x1a7   : > { %7095 = vst [vmem:[#allocation71_spill] sm:$0xff] %v5790_v6  ;;  %v4225_v47 = vsel %vm1811_vm2, %v3262_v60, -inf  ;;  %v3969_v55 = vrot.slane %v3968_v28, 2  ;;  %v4212_v9 = vrot.slane %v4211_v50, 4  ;;  %v4219_v20 = vrot.slane %v4218_v42, 4 }
 0x1a8   : > { %v3980_v23 = vsel %vm1811_vm2, %v3117_v0, -inf  ;;  %v5794_v38 = vmax.f32 %v4187_v63, %v4188_v58  ;;  %v3975_v46 = vmax.f32 %v3973_v8, %v3974_v4  ;;  %v3125_v26 = vcombine.high %v3117_v0, %v3117_v0 }
 0x1a9   : > { %v3126_v45 = vcombine.high %v3124_v32, %v3124_v32  ;;  %v5796_v53 = vmax.f32 %v4194_v33, %v4195_v12  ;;  %v4207_v62 = vrot.slane %v4206_v40, 2  ;;  %v4226_v13 = vrot.slane %v4225_v47, 4 }
 0x1aa   : > { %7096 = vst [vmem:[#allocation72_spill] sm:$0xff] %v5794_v38  ;;  %v1006_v21 = vadd.f32 %v5607_v48, %v5652_v36  ;;  %v3957_v7 = vrot.slane %v3956_v16, 1  ;;  %v3963_v3 = vmax.f32 %v3961_v14, %v3962_v61  ;;  %v3981_v60 = vrot.slane %v3980_v23, 4 }
 0x1ab   : > { %7097 = vst [vmem:[#allocation73_spill] sm:$0xff] %v5796_v53  ;;  %v3994_v54 = vsel %vm1811_vm2, %v3124_v32, -inf  ;;  %v5801_v31 = vmax.f32 %v4201_v17, %v4202_v41  ;;  %v3970_v22 = vmax.f32 %v3968_v28, %v3969_v55  ;;  %v4213_v63 = vmax.f32 %v4211_v50, %v4212_v9 }
 0x1ac   : > { %v4220_v58 = vmax.f32 %v4218_v42, %v4219_v20  ;;  %v3976_v4 = vrot.slane %v3975_v46, 2  ;;  %v3987_v8 = vsel %vm1811_vm2, %v3125_v26, -inf  ;;  %v4001_v33 = vsel %vm1811_vm2, %v3126_v45, -inf }
 0x1ad   : > { %7098 = vst [vmem:[#allocation74_spill] sm:$0xff] %v5801_v31  ;;  %v998_v0 = vadd.f32 %v5607_v48, %v5511_v2  ;;  %v4208_v12 = vmax.f32 %v4206_v40, %v4207_v62  ;;  %v4227_v36 = vmax.f32 %v4225_v47, %v4226_v13  ;;  %v3995_v59 = vrot.slane %v3994_v54, 4 }
 0x1ae   : > { %vm1038_vm9 = vcmp.gt.f32.partialorder %v1006_v21, 0.0  ;;  %v5807_v14 = vmax.f32 %v3956_v16, %v3957_v7  ;;  %v3964_v32 = vrot.slane %v3963_v3, 1  ;;  %v3982_v17 = vmax.f32 %v3980_v23, %v3981_v60 }
 0x1af   : > { %v1070_v41 = vmul.f32 0.1, %v1006_v21  ;;  %v4214_v28 = vrot.slane %v4213_v63, 2  ;;  %v4221_v50 = vrot.slane %v4220_v58, 2  ;;  %v3988_v42 = vrot.slane %v3987_v8, 4 }
 0x1b0   : > { %v4002_v61 = vrot.slane %v4001_v33, 4  ;;  %v3971_v55 = vrot.slane %v3970_v22, 1  ;;  %vm1030_vm10 = vcmp.gt.f32.partialorder %v998_v0, 0.0  ;;  %v1062_v20 = vmul.f32 0.1, %v998_v0 }
 0x1b1   : > { %v1102_v9 = vsel %vm1038_vm9, %v1006_v21, %v1070_v41  ;;  %v3977_v26 = vmax.f32 %v3975_v46, %v3976_v4  ;;  %v4209_v45 = vrot.slane %v4208_v12, 1  ;;  %v4228_v2 = vrot.slane %v4227_v36, 2 }
 0x1b2   : > { %v3996_v40 = vmax.f32 %v3994_v54, %v3995_v59  ;;  %v3983_v47 = vrot.slane %v3982_v17, 2  ;;  %v3263_v62 = vcombine.high %v1102_v9, %v1102_v9  ;;  %v3270_v16 = vrot.slane %v1102_v9, %v5306_v11 }
 0x1b3   : > { %v1094_v13 = vsel %vm1030_vm10, %v998_v0, %v1062_v20  ;;  %v4215_v7 = vmax.f32 %v4213_v63, %v4214_v28  ;;  %v4222_v23 = vmax.f32 %v4220_v58, %v4221_v50  ;;  %v3989_v60 = vmax.f32 %v3987_v8, %v3988_v42 }
 0x1b4   : > { %v4003_v57 = vmax.f32 %v4001_v33, %v4002_v61  ;;  %v3277_v52 = vrot.slane %v3263_v62, %v5306_v11  ;;  %v3278_v34 = vcombine.high %v3270_v16, %v3270_v16  ;;  %v4232_v21 = vsel %vm1811_vm2, %v3270_v16, -inf }
 0x1b5   : > { %v3127_v41 = vcombine.high %v1094_v13, %v1094_v13  ;;  %v5812_v44 = vmax.f32 %v3963_v3, %v3964_v32  ;;  %v3978_v46 = vrot.slane %v3977_v26, 1  ;;  %v4229_v4 = vmax.f32 %v4227_v36, %v4228_v2 }
 0x1b6   : > { %v3997_v59 = vrot.slane %v3996_v40, 2  ;;  %v3984_v54 = vmax.f32 %v3982_v17, %v3983_v47  ;;  %v3279_v25 = vcombine.high %v3277_v52, %v3277_v52  ;;  %v4233_v43 = vrot.slane %v4232_v21, 4 }
 0x1b7   : > { %v4239_v0 = vsel %vm1811_vm2, %v3278_v34, -inf  ;;  %v3990_v63 = vrot.slane %v3989_v60, 2  ;;  %v4004_v58 = vrot.slane %v4003_v57, 2  ;;  %v4246_v8 = vsel %vm1811_vm2, %v3277_v52, -inf }
 0x1b8   : > { %v3134_v33 = vrot.slane %v1094_v13, %v5306_v11  ;;  %v5817_v28 = vmax.f32 %v4208_v12, %v4209_v45  ;;  %v4216_v50 = vrot.slane %v4215_v7, 1  ;;  %v4223_v42 = vrot.slane %v4222_v23, 1 }
 0x1b9   : > { %v3141_v3 = vrot.slane %v3127_v41, %v5306_v11  ;;  %v5820_v32 = vmax.f32 %v3970_v22, %v3971_v55  ;;  %v5822_v36 = vmax.f32 %v3977_v26, %v3978_v46  ;;  %v4230_v17 = vrot.slane %v4229_v4, 1 }
 0x1ba   : > { %7099 = vst [vmem:[#allocation75_spill] sm:$0xff] %v5817_v28  ;;  %v4240_v61 = vrot.slane %v4239_v0, 4  ;;  %v3998_v9 = vmax.f32 %v3996_v40, %v3997_v59  ;;  %v4234_v34 = vmax.f32 %v4232_v21, %v4233_v43  ;;  %v4247_v20 = vrot.slane %v4246_v8, 4 }
 0x1bb   : > { %7100 = vst [vmem:[#allocation76_spill] sm:$0xff] %v5822_v36  ;;  %v4253_v2 = vsel %vm1811_vm2, %v3279_v25, -inf  ;;  %v3985_v52 = vrot.slane %v3984_v54, 1  ;;  %v3991_v47 = vmax.f32 %v3989_v60, %v3990_v63  ;;  %v4005_v62 = vmax.f32 %v4003_v57, %v4004_v58 }
 0x1bc   : > { %v3142_v12 = vcombine.high %v3134_v33, %v3134_v33  ;;  %v5825_v45 = vmax.f32 %v4215_v7, %v4216_v50  ;;  %v5827_v16 = vmax.f32 %v4222_v23, %v4223_v42  ;;  %v3143_v55 = vcombine.high %v3141_v3, %v3141_v3 }
 0x1bd   : > { %v4241_v26 = vmax.f32 %v4239_v0, %v4240_v61  ;;  %v4254_v13 = vrot.slane %v4253_v2, 4  ;;  %v4008_v40 = vsel %vm1811_vm2, %v3134_v33, -inf  ;;  %v4022_v43 = vsel %vm1811_vm2, %v3141_v3, -inf }
 0x1be   : > { %7101 = vst [vmem:[#allocation77_spill] sm:$0xff] %v5825_v45  ;;  %7102 = vst [vmem:[#allocation78_spill] sm:$0xff] %v5827_v16  ;;  %v5833_v21 = vmax.f32 %v4229_v4, %v4230_v17  ;;  %v3999_v25 = vrot.slane %v3998_v9, 1  ;;  %v4235_v60 = vrot.slane %v4234_v34, 2  ;;  %v4248_v57 = vmax.f32 %v4246_v8, %v4247_v20 }
 0x1bf   : > { %v5835_v41 = vmax.f32 %v3984_v54, %v3985_v52  ;;  %v3992_v7 = vrot.slane %v3991_v47, 1  ;;  %v4006_v23 = vrot.slane %v4005_v62, 1  ;;  %v4015_v46 = vsel %vm1811_vm2, %v3142_v12, -inf }
 0x1c0   : > { %7103 = vst [vmem:[#allocation79_spill] sm:$0xff] %v5833_v21  ;;  %v4009_v59 = vrot.slane %v4008_v40, 4  ;;  %v4023_v63 = vrot.slane %v4022_v43, 4  ;;  %v4029_v0 = vsel %vm1811_vm2, %v3143_v55, -inf  ;;  %v1007_v58 = vadd.f32 %v5607_v48, %v5661_v10 }
 0x1c1   : > { %v4242_v8 = vrot.slane %v4241_v26, 2  ;;  %v4255_v54 = vmax.f32 %v4253_v2, %v4254_v13  ;;  %v5845_v50 = vmax.f32 %v3998_v9, %v3999_v25  ;;  %v4236_v42 = vmax.f32 %v4234_v34, %v4235_v60 }
 0x1c2   : > { %v4249_v3 = vrot.slane %v4248_v57, 2  ;;  %v4016_v17 = vrot.slane %v4015_v46, 4  ;;  %v5849_v20 = vmax.f32 %v3991_v47, %v3992_v7  ;;  %v5851_v52 = vmax.f32 %v4005_v62, %v4006_v23 }
 0x1c3   : > { %v4030_v10 = vrot.slane %v4029_v0, 4  ;;  %v4010_v55 = vmax.f32 %v4008_v40, %v4009_v59  ;;  %v4024_v33 = vmax.f32 %v4022_v43, %v4023_v63  ;;  %vm1039_vm11 = vcmp.gt.f32.partialorder %v1007_v58, 0.0 }
 0x1c4   : > { %v4243_v2 = vmax.f32 %v4241_v26, %v4242_v8  ;;  %v4256_v9 = vrot.slane %v4255_v54, 2  ;;  %v1071_v13 = vmul.f32 0.1, %v1007_v58  ;;  %v999_v34 = vadd.f32 %v5607_v48, %v5562_v18 }
 0x1c5   : > { %v4237_v47 = vrot.slane %v4236_v42, 1  ;;  %v4250_v60 = vmax.f32 %v4248_v57, %v4249_v3  ;;  %v4017_v62 = vmax.f32 %v4015_v46, %v4016_v17  ;;  %v4031_v7 = vmax.f32 %v4029_v0, %v4030_v10 }
 0x1c6   : > { %v1103_v23 = vsel %vm1039_vm11, %v1007_v58, %v1071_v13  ;;  %vm1031_vm12 = vcmp.gt.f32.partialorder %v999_v34, 0.0  ;;  %v1063_v61 = vmul.f32 0.1, %v999_v34  ;;  %v4011_v4 = vrot.slane %v4010_v55, 2 }
 0x1c7   : > { %v4025_v40 = vrot.slane %v4024_v33, 2  ;;  %v3280_v43 = vcombine.high %v1103_v23, %v1103_v23  ;;  %v3287_v26 = vrot.slane %v1103_v23, %v5306_v11  ;;  %v4244_v63 = vrot.slane %v4243_v2, 1 }
 0x1c8   : > { %v4257_v18 = vmax.f32 %v4255_v54, %v4256_v9  ;;  %v1095_v8 = vsel %vm1031_vm12, %v999_v34, %v1063_v61  ;;  %v4251_v22 = vrot.slane %v4250_v60, 1  ;;  %v4018_v25 = vrot.slane %v4017_v62, 2 }
 0x1c9   : > { %v3294_v57 = vrot.slane %v3280_v43, %v5306_v11  ;;  %v3295_v46 = vcombine.high %v3287_v26, %v3287_v26  ;;  %v4032_v0 = vrot.slane %v4031_v7, 2  ;;  %v4260_v58 = vsel %vm1811_vm2, %v3287_v26, -inf }
 0x1ca   : > { %v3144_v3 = vcombine.high %v1095_v8, %v1095_v8  ;;  %v1008_v17 = vadd.f32 %v5607_v48, %v5680_v1  ;;  %v5868_v13 = vmax.f32 %v4236_v42, %v4237_v47  ;;  %v4012_v23 = vmax.f32 %v4010_v55, %v4011_v4 }
 0x1cb   : > { %v4026_v54 = vmax.f32 %v4024_v33, %v4025_v40  ;;  %v4258_v61 = vrot.slane %v4257_v18, 1  ;;  %v3296_v9 = vcombine.high %v3294_v57, %v3294_v57  ;;  %v4267_v34 = vsel %vm1811_vm2, %v3295_v46, -inf }
 0x1cc   : > { %7104 = vst [vmem:[#allocation80_spill] sm:$0xff] %v5868_v13  ;;  %v3151_v43 = vrot.slane %v1095_v8, %v5306_v11  ;;  %v5872_v59 = vmax.f32 %v4243_v2, %v4244_v63  ;;  %v5874_v26 = vmax.f32 %v4250_v60, %v4251_v22  ;;  %v4019_v12 = vmax.f32 %v4017_v62, %v4018_v25 }
 0x1cd   : > { %v4261_v21 = vrot.slane %v4260_v58, 4  ;;  %v4033_v48 = vmax.f32 %v4031_v7, %v4032_v0  ;;  %v4274_v1 = vsel %vm1811_vm2, %v3294_v57, -inf  ;;  %v3158_v42 = vrot.slane %v3144_v3, %v5306_v11 }
 0x1ce   : > { %7105 = vst [vmem:[#allocation81_spill] sm:$0xff] %v5872_v59  ;;  %7106 = vst [vmem:[#allocation82_spill] sm:$0xff] %v5874_v26  ;;  %v1072_v47 = vmul.f32 0.1, %v1008_v17  ;;  %v4013_v33 = vrot.slane %v4012_v23, 1  ;;  %v4268_v55 = vrot.slane %v4267_v34, 4  ;;  %v5880_v40 = vmax.f32 %v4257_v18, %v4258_v61 }
 0x1cf   : > { %vm1040_vm13 = vcmp.gt.f32.partialorder %v1008_v17, 0.0  ;;  %v4027_v2 = vrot.slane %v4026_v54, 1  ;;  %v4281_v22 = vsel %vm1811_vm2, %v3296_v9, -inf  ;;  %v4036_v25 = vsel %vm1811_vm2, %v3151_v43, -inf }
 0x1d0   : > { %7107 = vst [vmem:[#allocation83_spill] sm:$0xff] %v5880_v40  ;;  %v4020_v62 = vrot.slane %v4019_v12, 1  ;;  %v4262_v7 = vmax.f32 %v4260_v58, %v4261_v21  ;;  %v4275_v63 = vrot.slane %v4274_v1, 4  ;;  %v4034_v8 = vrot.slane %v4033_v48, 1  ;;  %v5896_v21 = vld [vmem:[%s6918_s4] ss:$0 sm:$0xff] }
 0x1d1   : > { %v3159_v57 = vcombine.high %v3151_v43, %v3151_v43  ;;  %v3160_v46 = vcombine.high %v3158_v42, %v3158_v42  ;;  %v1104_v0 = vsel %vm1040_vm13, %v1008_v17, %v1072_v47  ;;  %v4269_v3 = vmax.f32 %v4267_v34, %v4268_v55 }
 0x1d2   : > { %v4282_v4 = vrot.slane %v4281_v22, 4  ;;  %v4037_v10 = vrot.slane %v4036_v25, 4  ;;  %v4050_v18 = vsel %vm1811_vm2, %v3158_v42, -inf  ;;  %v5889_v9 = vmax.f32 %v4012_v23, %v4013_v33 }
 0x1d3   : > { %v5891_v13 = vmax.f32 %v4026_v54, %v4027_v2  ;;  %v1000_v58 = vadd.f32 %v5896_v21, %v5634_v27  ;;  %v5902_v34 = vmax.f32 %v4019_v12, %v4020_v62  ;;  %v4263_v43 = vrot.slane %v4262_v7, 2 }
 0x1d4   : > { %v4276_v42 = vmax.f32 %v4274_v1, %v4275_v63  ;;  %v5904_v47 = vmax.f32 %v4033_v48, %v4034_v8  ;;  %v4043_v23 = vsel %vm1811_vm2, %v3159_v57, -inf  ;;  %v4051_v54 = vrot.slane %v4050_v18, 4 }
 0x1d5   : > { %7108 = vst [vmem:[#allocation84_spill] sm:$0xff] %v5891_v13  ;;  %v3297_v33 = vcombine.high %v1104_v0, %v1104_v0  ;;  %v4270_v55 = vrot.slane %v4269_v3, 2  ;;  %v4283_v2 = vmax.f32 %v4281_v22, %v4282_v4  ;;  %v4038_v61 = vmax.f32 %v4036_v25, %v4037_v10 }
 0x1d6   : > { %7109 = vst [vmem:[#allocation85_spill] sm:$0xff] %v5904_v47  ;;  %v4057_v60 = vsel %vm1811_vm2, %v3160_v46, -inf  ;;  %v3304_v17 = vrot.slane %v1104_v0, %v5306_v11  ;;  %vm1032_vm14 = vcmp.gt.f32.partialorder %v1000_v58, 0.0  ;;  %v4264_v1 = vmax.f32 %v4262_v7, %v4263_v43 }
 0x1d7   : > { %v3311_v12 = vrot.slane %v3297_v33, %v5306_v11  ;;  %v4277_v48 = vrot.slane %v4276_v42, 2  ;;  %v4044_v62 = vrot.slane %v4043_v23, 4  ;;  %v1064_v63 = vmul.f32 0.1, %v1000_v58 }
 0x1d8   : > { %v4052_v8 = vmax.f32 %v4050_v18, %v4051_v54  ;;  %v4058_v57 = vrot.slane %v4057_v60, 4  ;;  %v3312_v40 = vcombine.high %v3304_v17, %v3304_v17  ;;  %v4288_v4 = vsel %vm1811_vm2, %v3304_v17, -inf }
 0x1d9   : > { %v4271_v10 = vmax.f32 %v4269_v3, %v4270_v55  ;;  %v4284_v22 = vrot.slane %v4283_v2, 2  ;;  %v4039_v25 = vrot.slane %v4038_v61, 2  ;;  %v4302_v46 = vsel %vm1811_vm2, %v3311_v12, -inf }
 0x1da   : > { %v3313_v27 = vcombine.high %v3311_v12, %v3311_v12  ;;  %v4289_v33 = vrot.slane %v4288_v4, 4  ;;  %v1009_v7 = vadd.f32 %v5896_v21, %v5702_v37  ;;  %v4278_v43 = vmax.f32 %v4276_v42, %v4277_v48 }
 0x1db   : > { %v4045_v54 = vmax.f32 %v4043_v23, %v4044_v62  ;;  %v1096_v17 = vsel %vm1032_vm14, %v1000_v58, %v1064_v63  ;;  %v4265_v3 = vrot.slane %v4264_v1, 1  ;;  %v4059_v55 = vmax.f32 %v4057_v60, %v4058_v57 }
 0x1dc   : > { %v4295_v31 = vsel %vm1811_vm2, %v3312_v40, -inf  ;;  %v4303_v26 = vrot.slane %v4302_v46, 4  ;;  %v4272_v53 = vrot.slane %v4271_v10, 1  ;;  %v4285_v59 = vmax.f32 %v4283_v2, %v4284_v22 }
 0x1dd   : > { %v4040_v0 = vmax.f32 %v4038_v61, %v4039_v25  ;;  %v4053_v12 = vrot.slane %v4052_v8, 2  ;;  %v4290_v38 = vmax.f32 %v4288_v4, %v4289_v33  ;;  %v4309_v6 = vsel %vm1811_vm2, %v3313_v27, -inf }
 0x1de   : > { %v3161_v37 = vcombine.high %v1096_v17, %v1096_v17  ;;  %v1073_v5 = vmul.f32 0.1, %v1009_v7  ;;  %v4279_v16 = vrot.slane %v4278_v43, 1  ;;  %v4046_v18 = vrot.slane %v4045_v54, 2 }
 0x1df   : > { %v4296_v42 = vrot.slane %v4295_v31, 4  ;;  %vm1041_vm15 = vcmp.gt.f32.partialorder %v1009_v7, 0.0  ;;  %v4060_v60 = vrot.slane %v4059_v55, 2  ;;  %v4304_v23 = vmax.f32 %v4302_v46, %v4303_v26 }
 0x1e0   : > { %v3168_v40 = vrot.slane %v1096_v17, %v5306_v11  ;;  %v5926_v48 = vmax.f32 %v4264_v1, %v4265_v3  ;;  %v4286_v61 = vrot.slane %v4285_v59, 1  ;;  %v4054_v2 = vmax.f32 %v4052_v8, %v4053_v12 }
 0x1e1   : > { %v4310_v62 = vrot.slane %v4309_v6, 4  ;;  %v4041_v63 = vrot.slane %v4040_v0, 1  ;;  %v4291_v27 = vrot.slane %v4290_v38, 2  ;;  %v3175_v57 = vrot.slane %v3161_v37, %v5306_v11 }
 0x1e2   : > { %7110 = vst [vmem:[#allocation86_spill] sm:$0xff] %v5926_v48  ;;  %v1105_v4 = vsel %vm1041_vm15, %v1009_v7, %v1073_v5  ;;  %v5929_v22 = vmax.f32 %v4271_v10, %v4272_v53  ;;  %v5931_v25 = vmax.f32 %v4278_v43, %v4279_v16  ;;  %v4047_v33 = vmax.f32 %v4045_v54, %v4046_v18 }
 0x1e3   : > { %v4297_v58 = vmax.f32 %v4295_v31, %v4296_v42  ;;  %v4061_v56 = vmax.f32 %v4059_v55, %v4060_v60  ;;  %v4305_v26 = vrot.slane %v4304_v23, 2  ;;  %v3176_v46 = vcombine.high %v3168_v40, %v3168_v40 }
 0x1e4   : > { %7111 = vst [vmem:[#allocation87_spill] sm:$0xff] %v5929_v22  ;;  %7112 = vst [vmem:[#allocation88_spill] sm:$0xff] %v5931_v25  ;;  %v4064_v1 = vsel %vm1811_vm2, %v3168_v40, -inf  ;;  %v4055_v17 = vrot.slane %v4054_v2, 1  ;;  %v4311_v3 = vmax.f32 %v4309_v6, %v4310_v62  ;;  %v3314_v8 = vcombine.high %v1105_v4, %v1105_v4 }
 0x1e5   : > { %v3321_v12 = vrot.slane %v1105_v4, %v5306_v11  ;;  %v5935_v48 = vmax.f32 %v4285_v59, %v4286_v61  ;;  %v5937_v37 = vmax.f32 %v4040_v0, %v4041_v63  ;;  %v4292_v5 = vmax.f32 %v4290_v38, %v4291_v27 }
 0x1e6   : > { %v3177_v53 = vcombine.high %v3175_v57, %v3175_v57  ;;  %v4048_v16 = vrot.slane %v4047_v33, 1  ;;  %v4298_v10 = vrot.slane %v4297_v58, 2  ;;  %v4065_v7 = vrot.slane %v4064_v1, 4 }
 0x1e7   : > { %7113 = vst [vmem:[#allocation89_spill] sm:$0xff] %v5935_v48  ;;  %7114 = vst [vmem:[#allocation90_spill] sm:$0xff] %v5937_v37  ;;  %v3328_v31 = vrot.slane %v3314_v8, %v5306_v11  ;;  %v4062_v18 = vrot.slane %v4061_v56, 1  ;;  %v4306_v43 = vmax.f32 %v4304_v23, %v4305_v26  ;;  %v4071_v54 = vsel %vm1811_vm2, %v3176_v46, -inf }
 0x1e8   : > { %v1001_v6 = vadd.f32 %v5896_v21, %v5663_v15  ;;  %v5943_v55 = vmax.f32 %v4054_v2, %v4055_v17  ;;  %v4312_v59 = vrot.slane %v4311_v3, 2  ;;  %v4078_v0 = vsel %vm1811_vm2, %v3175_v57, -inf }
 0x1e9   : > { %v3329_v42 = vcombine.high %v3321_v12, %v3321_v12  ;;  %v4293_v38 = vrot.slane %v4292_v5, 1  ;;  %v4085_v60 = vsel %vm1811_vm2, %v3177_v53, -inf  ;;  %v3330_v40 = vcombine.high %v3328_v31, %v3328_v31 }
 0x1ea   : > { %7115 = vst [vmem:[#allocation91_spill] sm:$0xff] %v5943_v55  ;;  %v4316_v61 = vsel %vm1811_vm2, %v3321_v12, -inf  ;;  %v5948_v62 = vmax.f32 %v4047_v33, %v4048_v16  ;;  %v4299_v23 = vmax.f32 %v4297_v58, %v4298_v10  ;;  %v4066_v63 = vmax.f32 %v4064_v1, %v4065_v7  ;;  %v625_v10 = vpop.f32.mrf.mxu1 }
 0x1eb   : > { %v4072_v27 = vrot.slane %v4071_v54, 4  ;;  %v5950_v4 = vmax.f32 %v4061_v56, %v4062_v18  ;;  %v4307_v15 = vrot.slane %v4306_v43, 1  ;;  %v4079_v2 = vrot.slane %v4078_v0, 4 }
 0x1ec   : > { %7116 = vst [vmem:[#allocation92_spill] sm:$0xff] %v5948_v62  ;;  %vm1033_vm0 = vcmp.gt.f32.partialorder %v1001_v6, 0.0  ;;  %v4086_v26 = vrot.slane %v4085_v60, 4  ;;  %v4317_v46 = vrot.slane %v4316_v61, 4  ;;  %v4323_v57 = vsel %vm1811_vm2, %v3329_v42, -inf }
 0x1ed   : > { %7117 = vst [vmem:[#allocation93_spill] sm:$0xff] %v5950_v4  ;;  %v1065_v17 = vmul.f32 0.1, %v1001_v6  ;;  %v5953_v8 = vmax.f32 %v4292_v5, %v4293_v38  ;;  %v5955_v53 = vmax.f32 %v4311_v3, %v4312_v59  ;;  %v4330_v33 = vsel %vm1811_vm2, %v3328_v31, -inf }
 0x1ee   : > { %v4337_v58 = vsel %vm1811_vm2, %v3330_v40, -inf  ;;  %v4300_v1 = vrot.slane %v4299_v23, 1  ;;  %v4067_v12 = vrot.slane %v4066_v63, 2  ;;  %v4073_v56 = vmax.f32 %v4071_v54, %v4072_v27 }
 0x1ef   : > { %7118 = vst [vmem:[#allocation94_spill] sm:$0xff] %v5953_v8  ;;  %v1097_v16 = vsel %vm1033_vm0, %v1001_v6, %v1065_v17  ;;  %v4080_v7 = vmax.f32 %v4078_v0, %v4079_v2  ;;  %v4324_v18 = vrot.slane %v4323_v57, 4  ;;  %v4087_v42 = vmax.f32 %v4085_v60, %v4086_v26 }
 0x1f0   : > { %v3178_v48 = vcombine.high %v1097_v16, %v1097_v16  ;;  %v3185_v25 = vrot.slane %v1097_v16, %v5306_v11  ;;  %v4318_v22 = vmax.f32 %v4316_v61, %v4317_v46  ;;  %v4331_v5 = vrot.slane %v4330_v33, 4  ;;  %v577_v61 = vpop.f32.mrf.mxu0 }
 0x1f1   : > { %v4338_v38 = vrot.slane %v4337_v58, 4  ;;  %v1010_v40 = vadd.f32 %v5896_v21, %v625_v10  ;;  %v5963_v8 = vmax.f32 %v4306_v43, %v4307_v15  ;;  %v4068_v54 = vmax.f32 %v4066_v63, %v4067_v12 }
 0x1f2   : > { %v3192_v3 = vrot.slane %v3178_v48, %v5306_v11  ;;  %v3193_v59 = vcombine.high %v3185_v25, %v3185_v25  ;;  %v4092_v31 = vsel %vm1811_vm2, %v3185_v25, -inf  ;;  %v4074_v6 = vrot.slane %v4073_v56, 2 }
 0x1f3   : > { %7119 = vst [vmem:[#allocation95_spill] sm:$0xff] %v5963_v8  ;;  %v4093_v0 = vrot.slane %v4092_v31, 4  ;;  %v4325_v27 = vmax.f32 %v4323_v57, %v4324_v18  ;;  %v4081_v26 = vrot.slane %v4080_v7, 2  ;;  %v4088_v46 = vrot.slane %v4087_v42, 2 }
 0x1f4   : > { %v3194_v2 = vcombine.high %v3192_v3, %v3192_v3  ;;  %v4099_v17 = vsel %vm1811_vm2, %v3193_v59, -inf  ;;  %v4106_v60 = vsel %vm1811_vm2, %v3192_v3, -inf  ;;  %v4332_v48 = vmax.f32 %v4330_v33, %v4331_v5 }
 0x1f5   : > { %v4094_v16 = vmax.f32 %v4092_v31, %v4093_v0  ;;  %v4319_v45 = vrot.slane %v4318_v22, 2  ;;  %v4339_v25 = vmax.f32 %v4337_v58, %v4338_v38  ;;  %v1074_v43 = vmul.f32 0.1, %v1010_v40 }
 0x1f6   : > { %v4113_v10 = vsel %vm1811_vm2, %v3194_v2, -inf  ;;  %v4100_v15 = vrot.slane %v4099_v17, 4  ;;  %v4107_v63 = vrot.slane %v4106_v60, 4  ;;  %vm1042_vm1 = vcmp.gt.f32.partialorder %v1010_v40, 0.0 }
 0x1f7   : > { %v1002_v57 = vadd.f32 %v5896_v21, %v577_v61  ;;  %v4314_v12 = vrot.slane %v5955_v53, 1  ;;  %v4075_v18 = vmax.f32 %v4073_v56, %v4074_v6  ;;  %v4326_v59 = vrot.slane %v4325_v27, 2 }
 0x1f8   : > { %v4114_v3 = vrot.slane %v4113_v10, 4  ;;  %v5970_v8 = vmax.f32 %v4299_v23, %v4300_v1  ;;  %v4082_v51 = vmax.f32 %v4080_v7, %v4081_v26  ;;  %v4333_v33 = vrot.slane %v4332_v48, 2 }
 0x1f9   : > { %v4095_v5 = vrot.slane %v4094_v16, 2  ;;  %v4069_v31 = vrot.slane %v4068_v54, 1  ;;  %v4089_v58 = vmax.f32 %v4087_v42, %v4088_v46  ;;  %v4320_v38 = vmax.f32 %v4318_v22, %v4319_v45 }
 0x1fa   : > { %7120 = vst [vmem:[#allocation96_spill] sm:$0xff] %v5970_v8  ;;  %v1106_v0 = vsel %vm1042_vm1, %v1010_v40, %v1074_v43  ;;  %v4340_v2 = vrot.slane %v4339_v25, 2  ;;  %v4101_v28 = vmax.f32 %v4099_v17, %v4100_v15  ;;  %v4108_v29 = vmax.f32 %v4106_v60, %v4107_v63 }
 0x1fb   : > { %v1066_v47 = vmul.f32 0.1, %v1002_v57  ;;  %v4076_v36 = vrot.slane %v4075_v18, 1  ;;  %v4327_v21 = vmax.f32 %v4325_v27, %v4326_v59  ;;  %v4115_v61 = vmax.f32 %v4113_v10, %v4114_v3 }
 0x1fc   : > { %vm1034_vm3 = vcmp.gt.f32.partialorder %v1002_v57, 0.0  ;;  %v4083_v56 = vrot.slane %v4082_v51, 1  ;;  %v4334_v6 = vmax.f32 %v4332_v48, %v4333_v33  ;;  %v4096_v13 = vmax.f32 %v4094_v16, %v4095_v5 }
 0x1fd   : > { %v3331_v23 = vcombine.high %v1106_v0, %v1106_v0  ;;  %v5973_v1 = vmax.f32 %v5955_v53, %v4314_v12  ;;  %v4090_v7 = vrot.slane %v4089_v58, 1  ;;  %v4321_v26 = vrot.slane %v4320_v38, 1 }
 0x1fe   : > { %v3338_v45 = vrot.slane %v1106_v0, %v5306_v11  ;;  %v5976_v22 = vmax.f32 %v4339_v25, %v4340_v2  ;;  %v4102_v42 = vrot.slane %v4101_v28, 2  ;;  %v4109_v40 = vrot.slane %v4108_v29, 2 }
 0x1ff   : > { %7121 = vst [vmem:[#allocation97_spill] sm:$0xff] %v5973_v1  ;;  %v1098_v17 = vsel %vm1034_vm3, %v1002_v57, %v1066_v47  ;;  %v5978_v60 = vmax.f32 %v4068_v54, %v4069_v31  ;;  %v5980_v27 = vmax.f32 %v4075_v18, %v4076_v36  ;;  %v4328_v46 = vrot.slane %v4327_v21, 1  ;;  %v4848_v57 = vpop.f32.mrf.mxu1 }
 0x200   : > { %7122 = vst [vmem:[#allocation98_spill] sm:$0xff] %v5976_v22  ;;  %v4116_v48 = vrot.slane %v4115_v61, 2  ;;  %v5982_v16 = vmax.f32 %v4082_v51, %v4083_v56  ;;  %v4335_v10 = vrot.slane %v4334_v6, 1  ;;  %v4097_v53 = vrot.slane %v4096_v13, 1 }
 0x201   : > { %v3345_v43 = vrot.slane %v3331_v23, %v5306_v11  ;;  %v5985_v15 = vmax.f32 %v4089_v58, %v4090_v7  ;;  %v3346_v63 = vcombine.high %v3338_v45, %v3338_v45  ;;  %v4344_v25 = vsel %vm1811_vm2, %v3338_v45, -inf }
 0x202   : > { %v3195_v12 = vcombine.high %v1098_v17, %v1098_v17  ;;  %v5988_v59 = vmax.f32 %v4320_v38, %v4321_v26  ;;  %v4103_v36 = vmax.f32 %v4101_v28, %v4102_v42  ;;  %v4110_v54 = vmax.f32 %v4108_v29, %v4109_v40  ;;  %v6002_v38 = vld [vmem:[%s6917_s3] ss:$0 sm:$0xff] }
 0x203   : > { %7123 = vst [vmem:[#allocation99_spill] sm:$0xff] %v5985_v15  ;;  %v5991_v18 = vmax.f32 %v4327_v21, %v4328_v46  ;;  %v4117_v51 = vmax.f32 %v4115_v61, %v4116_v48  ;;  %v3202_v3 = vrot.slane %v1098_v17, %v5306_v11  ;;  %v5995_v5 = vmax.f32 %v4334_v6, %v4335_v10 }
 0x204   : > { %7124 = vst [vmem:[#allocation100_spill] sm:$0xff] %v5988_v59  ;;  %v3209_v33 = vrot.slane %v3195_v12, %v5306_v11  ;;  %v5997_v31 = vmax.f32 %v4096_v13, %v4097_v53  ;;  %v3347_v58 = vcombine.high %v3345_v43, %v3345_v43  ;;  %v4345_v0 = vrot.slane %v4344_v25, 4  ;;  %v717_v13 = vpop.f32.mrf.mxu1 }
 0x205   : > { %7125 = vst [vmem:[#allocation101_spill] sm:$0xff] %v5991_v18  ;;  %7126 = vst [vmem:[#allocation102_spill] sm:$0xff] %v5995_v5  ;;  %v4351_v29 = vsel %vm1811_vm2, %v3346_v63, -inf  ;;  %v3210_v28 = vcombine.high %v3202_v3, %v3202_v3  ;;  %v4120_v21 = vsel %vm1811_vm2, %v3202_v3, -inf  ;;  %v4104_v61 = vrot.slane %v4103_v36, 1 }
 0x206   : > { %7127 = vst [vmem:[#allocation103_spill] sm:$0xff] %v5997_v31  ;;  %v3211_v2 = vcombine.high %v3209_v33, %v3209_v33  ;;  %v4111_v56 = vrot.slane %v4110_v54, 1  ;;  %v4358_v6 = vsel %vm1811_vm2, %v3345_v43, -inf  ;;  %v4121_v23 = vrot.slane %v4120_v21, 4 }
 0x207   : > { %v4118_v7 = vrot.slane %v4117_v51, 1  ;;  %v4127_v26 = vsel %vm1811_vm2, %v3210_v28, -inf  ;;  %v4134_v45 = vsel %vm1811_vm2, %v3209_v33, -inf  ;;  %v723_v42 = vadd.f32 %v4848_v57, %v6002_v38 }
 0x208   : > { %v4346_v40 = vmax.f32 %v4344_v25, %v4345_v0  ;;  %v4352_v17 = vrot.slane %v4351_v29, 4  ;;  %v4122_v46 = vmax.f32 %v4120_v21, %v4121_v23  ;;  %v4141_v48 = vsel %vm1811_vm2, %v3211_v2, -inf }
 0x209   : > { %v4365_v10 = vsel %vm1811_vm2, %v3347_v58, -inf  ;;  %v4128_v53 = vrot.slane %v4127_v26, 4  ;;  %v4135_v63 = vrot.slane %v4134_v45, 4  ;;  %v718_v43 = vadd.f32 %v6002_v38, %v717_v13 }
 0x20a   : > { %v6013_v12 = vmax.f32 %v4103_v36, %v4104_v61  ;;  %v6015_v3 = vmax.f32 %v4110_v54, %v4111_v56  ;;  %v4359_v28 = vrot.slane %v4358_v6, 4  ;;  %v6019_v57 = vmax.f32 %v4117_v51, %v4118_v7  ;;  %v4851_v7 = vpop.f32.mrf.mxu1 }
 0x20b   : > { %v4123_v25 = vrot.slane %v4122_v46, 2  ;;  %v4142_v0 = vrot.slane %v4141_v48, 4  ;;  %vm877_vm4 = vcmp.gt.f32.partialorder %v723_v42, 0.0  ;;  %v4347_v2 = vrot.slane %v4346_v40, 2 }
 0x20c   : > { %7128 = vst [vmem:[#allocation104_spill] sm:$0xff] %v6013_v12  ;;  %7129 = vst [vmem:[#allocation105_spill] sm:$0xff] %v6015_v3  ;;  %v6021_v21 = vmax.f32 %v4351_v29, %v4352_v17  ;;  %v4366_v58 = vrot.slane %v4365_v10, 4  ;;  %v909_v23 = vmul.f32 0.1, %v723_v42  ;;  %v4129_v47 = vmax.f32 %v4127_v26, %v4128_v53 }
 0x20d   : > { %7130 = vst [vmem:[#allocation106_spill] sm:$0xff] %v6019_v57  ;;  %v4136_v13 = vmax.f32 %v4134_v45, %v4135_v63  ;;  %vm876_vm5 = vcmp.gt.f32.partialorder %v718_v43, 0.0  ;;  %v908_v36 = vmul.f32 0.1, %v718_v43  ;;  %v6027_v51 = vmax.f32 %v4358_v6, %v4359_v28 }
 0x20e   : > { %7131 = vst [vmem:[#allocation107_spill] sm:$0xff] %v6021_v21  ;;  %v941_v56 = vsel %vm877_vm4, %v723_v42, %v909_v23  ;;  %v4124_v17 = vmax.f32 %v4122_v46, %v4123_v25  ;;  %v4143_v33 = vmax.f32 %v4141_v48, %v4142_v0  ;;  %v6031_v26 = vmax.f32 %v4346_v40, %v4347_v2  ;;  %v727_v25 = vpop.f32.mrf.mxu1 }
 0x20f   : > { %7132 = vst [vmem:[#allocation108_spill] sm:$0xff] %v6027_v51  ;;  %v1156_v1 = vcombine.high %v941_v56, %v941_v56  ;;  %v1163_v53 = vrot.slane %v941_v56, %v5306_v11  ;;  %v940_v63 = vsel %vm876_vm5, %v718_v43, %v908_v36  ;;  %v6035_v54 = vmax.f32 %v4365_v10, %v4366_v58 }
 0x210   : > { %7133 = vst [vmem:[#allocation109_spill] sm:$0xff] %v6031_v26  ;;  %v4130_v61 = vrot.slane %v4129_v47, 2  ;;  %v4137_v6 = vrot.slane %v4136_v13, 2  ;;  %v1139_v48 = vcombine.high %v940_v63, %v940_v63  ;;  %v4125_v40 = vrot.slane %v4124_v17, 1 }
 0x211   : > { %7134 = vst [vmem:[#allocation110_spill] sm:$0xff] %v6035_v54  ;;  %v1170_v42 = vrot.slane %v1156_v1, %v5306_v11  ;;  %v1171_v23 = vcombine.high %v1163_v53, %v1163_v53  ;;  %v1840_v46 = vsel %vm1811_vm2, %v1163_v53, -inf  ;;  %v4144_v0 = vrot.slane %v4143_v33, 2 }
 0x212   : > { %v733_v45 = vadd.f32 %v4851_v7, %v6002_v38  ;;  %v1841_v56 = vrot.slane %v1840_v46, 4  ;;  %v1146_v58 = vrot.slane %v940_v63, %v5306_v11  ;;  %v6044_v1 = vmax.f32 %v4129_v47, %v4130_v61 }
 0x213   : > { %v1172_v2 = vcombine.high %v1170_v42, %v1170_v42  ;;  %v1847_v10 = vsel %vm1811_vm2, %v1171_v23, -inf  ;;  %v1854_v43 = vsel %vm1811_vm2, %v1170_v42, -inf  ;;  %v6046_v36 = vmax.f32 %v4136_v13, %v4137_v6 }
 0x214   : > { %v1848_v28 = vrot.slane %v1847_v10, 4  ;;  %v728_v53 = vadd.f32 %v6002_v38, %v727_v25  ;;  %v1842_v29 = vmax.f32 %v1840_v46, %v1841_v56  ;;  %v1855_v8 = vrot.slane %v1854_v43, 4 }
 0x215   : > { %v1861_v5 = vsel %vm1811_vm2, %v1172_v2, -inf  ;;  %v1153_v7 = vrot.slane %v1139_v48, %v5306_v11  ;;  %v1154_v23 = vcombine.high %v1146_v58, %v1146_v58  ;;  %v1812_v42 = vsel %vm1811_vm2, %v1146_v58, -inf }
 0x216   : > { %v1849_v18 = vmax.f32 %v1847_v10, %v1848_v28  ;;  %v1862_v59 = vrot.slane %v1861_v5, 4  ;;  %v1843_v26 = vrot.slane %v1842_v29, 2  ;;  %v1856_v63 = vmax.f32 %v1854_v43, %v1855_v8 }
 0x217   : > { %v1155_v47 = vcombine.high %v1153_v7, %v1153_v7  ;;  %v1813_v61 = vrot.slane %v1812_v42, 4  ;;  %v1819_v22 = vsel %vm1811_vm2, %v1154_v23, -inf  ;;  %v1826_v46 = vsel %vm1811_vm2, %v1153_v7, -inf }
 0x218   : > { %v1850_v13 = vrot.slane %v1849_v18, 2  ;;  %v1863_v6 = vmax.f32 %v1861_v5, %v1862_v59  ;;  %v1844_v25 = vmax.f32 %v1842_v29, %v1843_v26  ;;  %v1857_v56 = vrot.slane %v1856_v63, 2 }
 0x219   : > { %v1814_v2 = vmax.f32 %v1812_v42, %v1813_v61  ;;  %v1820_v51 = vrot.slane %v1819_v22, 4  ;;  %v1827_v10 = vrot.slane %v1826_v46, 4  ;;  %v1833_v54 = vsel %vm1811_vm2, %v1155_v47, -inf }
 0x21a   : > { %v1851_v48 = vmax.f32 %v1849_v18, %v1850_v13  ;;  %v1864_v28 = vrot.slane %v1863_v6, 2  ;;  %v6055_v58 = vmax.f32 %v4143_v33, %v4144_v0  ;;  %v1858_v8 = vmax.f32 %v1856_v63, %v1857_v56 }
 0x21b   : > { %v1815_v43 = vrot.slane %v1814_v2, 2  ;;  %v1821_v21 = vmax.f32 %v1819_v22, %v1820_v51  ;;  %v6057_v57 = vmax.f32 %v4124_v17, %v4125_v40  ;;  %v1828_v5 = vmax.f32 %v1826_v46, %v1827_v10 }
 0x21c   : > { %v1865_v59 = vmax.f32 %v1863_v6, %v1864_v28  ;;  %v1834_v23 = vrot.slane %v1833_v54, 4  ;;  %v1845_v7 = vrot.slane %v1844_v25, 1  ;;  %vm879_vm6 = vcmp.gt.f32.partialorder %v733_v45, 0.0 }
 0x21d   : > { %v1816_v29 = vmax.f32 %v1814_v2, %v1815_v43  ;;  %v1822_v26 = vrot.slane %v1821_v21, 2  ;;  %v1852_v42 = vrot.slane %v1851_v48, 1  ;;  %v1829_v61 = vrot.slane %v1828_v5, 2 }
 0x21e   : > { %v1835_v13 = vmax.f32 %v1833_v54, %v1834_v23  ;;  %v1859_v47 = vrot.slane %v1858_v8, 1  ;;  %v1866_v33 = vrot.slane %v1865_v59, 1  ;;  %v911_v63 = vmul.f32 0.1, %v733_v45 }
 0x21f   : > { %v1823_v0 = vmax.f32 %v1821_v21, %v1822_v26  ;;  %v1817_v56 = vrot.slane %v1816_v29, 1  ;;  %v1830_v22 = vmax.f32 %v1828_v5, %v1829_v61  ;;  %vm878_vm7 = vcmp.gt.f32.partialorder %v728_v53, 0.0 }
 0x220   : > { %v1836_v51 = vrot.slane %v1835_v13, 2  ;;  %v6060_v17 = vmax.f32 %v1844_v25, %v1845_v7  ;;  %v943_v6 = vsel %vm879_vm6, %v733_v45, %v911_v63  ;;  %v910_v46 = vmul.f32 0.1, %v728_v53 }
 0x221   : > { %v1824_v40 = vrot.slane %v1823_v0, 1  ;;  %v1831_v2 = vrot.slane %v1830_v22, 1  ;;  %v1190_v10 = vcombine.high %v943_v6, %v943_v6  ;;  %v1197_v43 = vrot.slane %v943_v6, %v5306_v11 }
 0x222   : > { %v6062_v28 = vmax.f32 %v1835_v13, %v1836_v51  ;;  %v6065_v54 = vmax.f32 %v1851_v48, %v1852_v42  ;;  %v6067_v23 = vmax.f32 %v1858_v8, %v1859_v47  ;;  %v6069_v21 = vmax.f32 %v1865_v59, %v1866_v33 }
 0x223   : > { %v942_v5 = vsel %vm878_vm7, %v728_v53, %v910_v46  ;;  %v6071_v26 = vmax.f32 %v1816_v29, %v1817_v56  ;;  %v6073_v25 = vmax.f32 %v1823_v0, %v1824_v40  ;;  %v1204_v45 = vrot.slane %v1190_v10, %v5306_v11 }
 0x224   : > { %v1205_v7 = vcombine.high %v1197_v43, %v1197_v43  ;;  %v6076_v61 = vmax.f32 %v1830_v22, %v1831_v2  ;;  %v1896_v13 = vsel %vm1811_vm2, %v1197_v43, -inf  ;;  %v1173_v63 = vcombine.high %v942_v5, %v942_v5 }
 0x225   : > { %v1180_v48 = vrot.slane %v942_v5, %v5306_v11  ;;  %v1206_v42 = vcombine.high %v1204_v45, %v1204_v45  ;;  %v1897_v59 = vrot.slane %v1896_v13, 4  ;;  %v1910_v47 = vsel %vm1811_vm2, %v1204_v45, -inf }
 0x226   : > { %v1903_v53 = vsel %vm1811_vm2, %v1205_v7, -inf  ;;  %v1187_v33 = vrot.slane %v1173_v63, %v5306_v11  ;;  %v1911_v22 = vrot.slane %v1910_v47, 4  ;;  %vm4564_vm8 = vcmask 1041409  }
 0x227   : > { %v1904_v29 = vrot.slane %v1903_v53, 4  ;;  %v1188_v0 = vcombine.high %v1180_v48, %v1180_v48  ;;  %v1898_v56 = vmax.f32 %v1896_v13, %v1897_v59  ;;  %v1917_v51 = vsel %vm1811_vm2, %v1206_v42, -inf }
 0x228   : > { %v1868_v40 = vsel %vm1811_vm2, %v1180_v48, -inf  ;;  %v1918_v46 = vrot.slane %v1917_v51, 4  ;;  %v1189_v2 = vcombine.high %v1187_v33, %v1187_v33  ;;  %v1912_v5 = vmax.f32 %v1910_v47, %v1911_v22 }
 0x229   : > { %v1905_v6 = vmax.f32 %v1903_v53, %v1904_v29  ;;  %v1869_v10 = vrot.slane %v1868_v40, 4  ;;  %v1899_v43 = vrot.slane %v1898_v56, 2  ;;  %v1875_v7 = vsel %vm1811_vm2, %v1188_v0, -inf  ;;  %v4854_v0 = vpop.f32.mrf.mxu1 }
 0x22a   : > { %v1882_v18 = vsel %vm1811_vm2, %v1187_v33, -inf  ;;  %v1919_v8 = vmax.f32 %v1917_v51, %v1918_v46  ;;  %v1876_v4 = vrot.slane %v1875_v7, 4  ;;  %v1913_v59 = vrot.slane %v1912_v5, 2 }
 0x22b   : > { %v1906_v45 = vrot.slane %v1905_v6, 2  ;;  %v1870_v63 = vmax.f32 %v1868_v40, %v1869_v10  ;;  %v1900_v13 = vmax.f32 %v1898_v56, %v1899_v43  ;;  %v1883_v3 = vrot.slane %v1882_v18, 4 }
 0x22c   : > { %v1889_v42 = vsel %vm1811_vm2, %v1189_v2, -inf  ;;  %v1920_v53 = vrot.slane %v1919_v8, 2  ;;  %v1877_v55 = vmax.f32 %v1875_v7, %v1876_v4  ;;  %v1914_v62 = vmax.f32 %v1912_v5, %v1913_v59  ;;  %v737_v7 = vpop.f32.mrf.mxu1 }
 0x22d   : > { %v1907_v48 = vmax.f32 %v1905_v6, %v1906_v45  ;;  %v1871_v29 = vrot.slane %v1870_v63, 2  ;;  %v1901_v12 = vrot.slane %v1900_v13, 1  ;;  %v1884_v47 = vmax.f32 %v1882_v18, %v1883_v3 }
 0x22e   : > { %v1890_v22 = vrot.slane %v1889_v42, 4  ;;  %v1921_v33 = vmax.f32 %v1919_v8, %v1920_v53  ;;  %v1878_v51 = vrot.slane %v1877_v55, 2  ;;  %v1915_v46 = vrot.slane %v1914_v62, 1 }
 0x22f   : > { %v1908_v31 = vrot.slane %v1907_v48, 1  ;;  %v1872_v37 = vmax.f32 %v1870_v63, %v1871_v29  ;;  %v1902_v40 = vmax.f32 %v1900_v13, %v1901_v12  ;;  %v1885_v56 = vrot.slane %v1884_v47, 2 }
 0x230   : > { %v1891_v10 = vmax.f32 %v1889_v42, %v1890_v22  ;;  %v1922_v2 = vrot.slane %v1921_v33, 1  ;;  %v1879_v45 = vmax.f32 %v1877_v55, %v1878_v51  ;;  %vm4566_vm9 = vcmask 1042434   ;;  %v7138_v22 = vld [vmem:[#allocation16_spill] sm:$0xff] }
 0x231   : > { %v1909_v43 = vmax.f32 %v1907_v48, %v1908_v31  ;;  %v1873_v6 = vrot.slane %v1872_v37, 1  ;;  %v1916_v4 = vmax.f32 %v1914_v62, %v1915_v46  ;;  %v2712_v5 = vmax.f32 %v6060_v17, %v1902_v40  ;;  %v4857_v31 = vpop.f32.mrf.mxu1  ;;  %v7140_v46 = vld [vmem:[#allocation10_spill] sm:$0xff] }
 0x232   : > { %v1886_v3 = vmax.f32 %v1884_v47, %v1885_v56  ;;  %v1892_v18 = vrot.slane %v1891_v10, 2  ;;  %v1923_v59 = vmax.f32 %v1921_v33, %v1922_v2  ;;  %v1880_v12 = vrot.slane %v1879_v45, 1  ;;  %v7137_v47 = vld [vmem:[#allocation9_spill] sm:$0xff] }
 0x233   : > { %v2713_v8 = vmax.f32 %v6065_v54, %v1909_v43  ;;  %v1874_v63 = vmax.f32 %v1872_v37, %v1873_v6  ;;  %v2714_v13 = vmax.f32 %v6067_v23, %v1916_v4  ;;  %vm4568_vm10 = vcmask 1043459   ;;  %v7141_v56 = vld [vmem:[#allocation17_spill] sm:$0xff]  ;;  %v7143_v43 = vld [vmem:[#allocation11_spill] sm:$0xff]  ;;  %v7147_v4 = vld [vmem:[#allocation12_spill] sm:$0xff] }
 0x234   : > { %v1887_v42 = vrot.slane %v1886_v3, 1  ;;  %v1893_v53 = vmax.f32 %v1891_v10, %v1892_v18  ;;  %v7135_v55 = vrot.slane %v6062_v28, 1  ;;  %v2715_v17 = vmax.f32 %v6069_v21, %v1923_v59  ;;  %v7144_v21 = vld [vmem:[#allocation18_spill] sm:$0xff] }
 0x235   : > { %v1881_v48 = vmax.f32 %v1879_v45, %v1880_v12  ;;  %v2708_v29 = vmax.f32 %v6071_v26, %v1874_v63  ;;  %v7136_v54 = vmax.f32 %v5337_v35, %v5393_v19  ;;  %v7139_v23 = vmax.f32 %v7137_v47, %v7138_v22  ;;  %v7146_v45 = vld [vmem:[#allocation5_spill] sm:$0xff]  ;;  %v7149_v59 = vld [vmem:[#allocation6_spill] sm:$0xff]  ;;  %v7156_v22 = vld [vmem:[#allocation15_spill] sm:$0xff] }
 0x236   : > { %v1839_v62 = vmax.f32 %v6062_v28, %v7135_v55  ;;  %v1888_v51 = vmax.f32 %v1886_v3, %v1887_v42  ;;  %v1894_v40 = vrot.slane %v1893_v53, 1  ;;  %v7142_v10 = vmax.f32 %v7140_v46, %v7141_v56  ;;  %v747_v3 = vpop.f32.mrf.mxu1  ;;  %v7153_v55 = vld [vmem:[#allocation14_spill] sm:$0xff] }
 0x237   : > { %v4440_v37 = vadd.f32 %v7136_v54, %v2712_v5  ;;  %v4441_v33 = vadd.f32 %v7139_v23, %v2713_v8  ;;  %v7145_v2 = vmax.f32 %v7143_v43, %v7144_v21  ;;  %v2709_v26 = vmax.f32 %v6073_v25, %v1881_v48  ;;  %v7150_v8 = vld [vmem:[#allocation13_spill] sm:$0xff] }
 0x238   : > { %v4442_v28 = vadd.f32 %v7142_v10, %v2714_v13  ;;  %vm4570_vm11 = vcmask 1044484   ;;  %v1895_v35 = vmax.f32 %v1893_v53, %v1894_v40  ;;  %v2710_v19 = vmax.f32 %v6076_v61, %v1888_v51  ;;  %v7152_v61 = vld [vmem:[#allocation7_spill] sm:$0xff] }
 0x239   : > { %v4443_v6 = vadd.f32 %v7145_v2, %v2715_v17  ;;  %v7148_v5 = vmax.f32 %v7146_v45, %v7147_v4  ;;  %vm4572_vm12 = vcmask 1045509   ;;  %v7151_v63 = vmax.f32 %v7149_v59, %v7150_v8 }
 0x23a   : > { %v743_v13 = vadd.f32 %v4854_v0, %v6002_v38  ;;  %v738_v42 = vadd.f32 %v6002_v38, %v737_v7  ;;  %v753_v25 = vadd.f32 %v4857_v31, %v6002_v38  ;;  %v2711_v53 = vmax.f32 %v1839_v62, %v1895_v35  ;;  %v7155_v0 = vld [vmem:[#allocation8_spill] sm:$0xff] }
 0x23b   : > { %v4436_v18 = vadd.f32 %v7148_v5, %v2708_v29  ;;  %v4437_v12 = vadd.f32 %v7151_v63, %v2709_v26  ;;  %v7154_v17 = vmax.f32 %v7152_v61, %v7153_v55  ;;  %vm4574_vm13 = vcmask 1046534   ;;  %v4860_v29 = vpop.f32.mrf.mxu1 }
 0x23c   : > { %vm4576_vm14 = vcmask 1047559   ;;  %vm881_vm15 = vcmp.gt.f32.partialorder %v743_v13, 0.0  ;;  %v913_v47 = vmul.f32 0.1, %v743_v13  ;;  %vm880_vm0 = vcmp.gt.f32.partialorder %v738_v42, 0.0 }
 0x23d   : > { %v4438_v48 = vadd.f32 %v7154_v17, %v2710_v19  ;;  %v4565_v54 = vsel %vm4564_vm8, %v4437_v12, %v4436_v18  ;;  %v7157_v7 = vmax.f32 %v7155_v0, %v7156_v22  ;;  %v912_v51 = vmul.f32 0.1, %v738_v42 }
 0x23e   : > { %vm883_vm1 = vcmp.gt.f32.partialorder %v753_v25, 0.0  ;;  %v945_v62 = vsel %vm881_vm15, %v743_v13, %v913_v47  ;;  %v915_v40 = vmul.f32 0.1, %v753_v25  ;;  %v6132_v46 = vadd.f32 %v6002_v38, %v747_v3 }
 0x23f   : > { %v4439_v23 = vadd.f32 %v7157_v7, %v2711_v53  ;;  %v4567_v31 = vsel %vm4566_vm9, %v4438_v48, %v4565_v54  ;;  %v6135_v56 = vadd.f32 %v4860_v29, %v6002_v38  ;;  %v1224_v43 = vcombine.high %v945_v62, %v945_v62 }
 0x240   : > { %v1231_v21 = vrot.slane %v945_v62, %v5306_v11  ;;  %v944_v2 = vsel %vm880_vm0, %v738_v42, %v912_v51  ;;  %v6141_v45 = vsel %vm883_vm1, %v753_v25, %v915_v40  ;;  %vm882_vm3 = vcmp.gt.f32.partialorder %v6132_v46, 0.0 }
 0x241   : > { %v4569_v10 = vsel %vm4568_vm10, %v4439_v23, %v4567_v31  ;;  %v1207_v35 = vcombine.high %v944_v2, %v944_v2  ;;  %v1214_v19 = vrot.slane %v944_v2, %v5306_v11  ;;  %v1238_v5 = vrot.slane %v1224_v43, %v5306_v11 }
 0x242   : > { %v4571_v26 = vsel %vm4570_vm11, %v4440_v37, %v4569_v10  ;;  %v1239_v18 = vcombine.high %v1231_v21, %v1231_v21  ;;  %v1952_v3 = vsel %vm1811_vm2, %v1231_v21, -inf  ;;  %vm885_vm4 = vcmp.gt.f32.partialorder %v6135_v56, 0.0 }
 0x243   : > { %v4573_v4 = vsel %vm4572_vm12, %v4441_v33, %v4571_v26  ;;  %v1953_v8 = vrot.slane %v1952_v3, 4  ;;  %v1221_v63 = vrot.slane %v1207_v35, %v5306_v11  ;;  %v1222_v12 = vcombine.high %v1214_v19, %v1214_v19 }
 0x244   : > { %v4575_v59 = vsel %vm4574_vm13, %v4442_v28, %v4573_v4  ;;  %v1240_v13 = vcombine.high %v1238_v5, %v1238_v5  ;;  %v1959_v42 = vsel %vm1811_vm2, %v1239_v18, -inf  ;;  %v1966_v25 = vsel %vm1811_vm2, %v1238_v5, -inf }
 0x245   : > { %v4577_v37 = vsel %vm4576_vm14, %v4443_v6, %v4575_v59  ;;  %v1954_v33 = vmax.f32 %v1952_v3, %v1953_v8  ;;  %v1960_v53 = vrot.slane %v1959_v42, 4  ;;  %v1967_v61 = vrot.slane %v1966_v25, 4 }
 0x246   : > { %4635 = vst [vmem:[%s6151_s6] sm:$0xff] %v4577_v37  ;;  %v1223_v55 = vcombine.high %v1221_v63, %v1221_v63  ;;  %v1973_v28 = vsel %vm1811_vm2, %v1240_v13, -inf  ;;  %v1924_v17 = vsel %vm1811_vm2, %v1214_v19, -inf  ;;  %v1931_v48 = vsel %vm1811_vm2, %v1222_v12, -inf }
 0x247   : > { %v1938_v6 = vsel %vm1811_vm2, %v1221_v63, -inf  ;;  %v1955_v29 = vrot.slane %v1954_v33, 2  ;;  %v1961_v54 = vmax.f32 %v1959_v42, %v1960_v53  ;;  %v1968_v47 = vmax.f32 %v1966_v25, %v1967_v61 }
 0x248   : > { %v1974_v0 = vrot.slane %v1973_v28, 4  ;;  %v1925_v22 = vrot.slane %v1924_v17, 4  ;;  %v1932_v7 = vrot.slane %v1931_v48, 4  ;;  %v1939_v23 = vrot.slane %v1938_v6, 4 }
 0x249   : > { %v1945_v31 = vsel %vm1811_vm2, %v1223_v55, -inf  ;;  %v1956_v51 = vmax.f32 %v1954_v33, %v1955_v29  ;;  %v1962_v62 = vrot.slane %v1961_v54, 2  ;;  %v1969_v40 = vrot.slane %v1968_v47, 2 }
 0x24a   : > { %v1975_v10 = vmax.f32 %v1973_v28, %v1974_v0  ;;  %v1926_v43 = vmax.f32 %v1924_v17, %v1925_v22  ;;  %v1933_v21 = vmax.f32 %v1931_v48, %v1932_v7  ;;  %v1940_v2 = vmax.f32 %v1938_v6, %v1939_v23 }
 0x24b   : > { %v1946_v26 = vrot.slane %v1945_v31, 4  ;;  %v1957_v35 = vrot.slane %v1956_v51, 1  ;;  %v1963_v19 = vmax.f32 %v1961_v54, %v1962_v62  ;;  %v1970_v4 = vmax.f32 %v1968_v47, %v1969_v40 }
 0x24c   : > { %v1976_v5 = vrot.slane %v1975_v10, 2  ;;  %v1927_v18 = vrot.slane %v1926_v43, 2  ;;  %v1934_v3 = vrot.slane %v1933_v21, 2  ;;  %v1941_v59 = vrot.slane %v1940_v2, 2 }
 0x24d   : > { %v1947_v8 = vmax.f32 %v1945_v31, %v1946_v26  ;;  %v1964_v63 = vrot.slane %v1963_v19, 1  ;;  %v1971_v12 = vrot.slane %v1970_v4, 1  ;;  %v914_v13 = vmul.f32 0.1, %v6132_v46 }
 0x24e   : > { %v1977_v37 = vmax.f32 %v1975_v10, %v1976_v5  ;;  %v1928_v42 = vmax.f32 %v1926_v43, %v1927_v18  ;;  %v1935_v25 = vmax.f32 %v1933_v21, %v1934_v3  ;;  %v1942_v33 = vmax.f32 %v1940_v2, %v1941_v59 }
 0x24f   : > { %v1948_v53 = vrot.slane %v1947_v8, 2  ;;  %v6161_v61 = vmax.f32 %v1956_v51, %v1957_v35  ;;  %v6163_v55 = vmax.f32 %v1963_v19, %v1964_v63  ;;  %v1258_v17 = vcombine.high %v6141_v45, %v6141_v45 }
 0x250   : > { %v1978_v28 = vrot.slane %v1977_v37, 1  ;;  %v1929_v48 = vrot.slane %v1928_v42, 1  ;;  %v1936_v6 = vrot.slane %v1935_v25, 1  ;;  %v1943_v29 = vrot.slane %v1942_v33, 1 }
 0x251   : > { %v1949_v54 = vmax.f32 %v1947_v8, %v1948_v53  ;;  %v6167_v47 = vmax.f32 %v1970_v4, %v1971_v12  ;;  %v1265_v0 = vrot.slane %v6141_v45, %v5306_v11  ;;  %v1272_v22 = vrot.slane %v1258_v17, %v5306_v11 }
 0x252   : > { %v946_v7 = vsel %vm882_vm3, %v6132_v46, %v914_v13  ;;  %v6175_v23 = vmax.f32 %v1977_v37, %v1978_v28  ;;  %v6177_v31 = vmax.f32 %v1928_v42, %v1929_v48  ;;  %v6179_v51 = vmax.f32 %v1935_v25, %v1936_v6 }
 0x253   : > { %v1950_v62 = vrot.slane %v1949_v54, 1  ;;  %v1273_v40 = vcombine.high %v1265_v0, %v1265_v0  ;;  %v1274_v10 = vcombine.high %v1272_v22, %v1272_v22  ;;  %v2008_v43 = vsel %vm1811_vm2, %v1265_v0, -inf }
 0x254   : > { %v2022_v21 = vsel %vm1811_vm2, %v1272_v22, -inf  ;;  %v6183_v45 = vmax.f32 %v1942_v33, %v1943_v29  ;;  %v2009_v2 = vrot.slane %v2008_v43, 4  ;;  %v1241_v35 = vcombine.high %v946_v7, %v946_v7 }
 0x255   : > { %v2023_v26 = vrot.slane %v2022_v21, 4  ;;  %v6185_v19 = vmax.f32 %v1949_v54, %v1950_v62  ;;  %v2015_v46 = vsel %vm1811_vm2, %v1273_v40, -inf  ;;  %v2029_v4 = vsel %vm1811_vm2, %v1274_v10, -inf }
 0x256   : > { %v1248_v5 = vrot.slane %v946_v7, %v5306_v11  ;;  %v2010_v18 = vmax.f32 %v2008_v43, %v2009_v2  ;;  %v2016_v3 = vrot.slane %v2015_v46, 4  ;;  %v2030_v8 = vrot.slane %v2029_v4, 4 }
 0x257   : > { %v2024_v59 = vmax.f32 %v2022_v21, %v2023_v26  ;;  %v1255_v63 = vrot.slane %v1241_v35, %v5306_v11  ;;  %v917_v13 = vmul.f32 0.1, %v6135_v56 }
 0x258   : > { %v1256_v12 = vcombine.high %v1248_v5, %v1248_v5  ;;  %v1980_v37 = vsel %vm1811_vm2, %v1248_v5, -inf  ;;  %v2011_v42 = vrot.slane %v2010_v18, 2  ;;  %v2017_v25 = vmax.f32 %v2015_v46, %v2016_v3 }
 0x259   : > { %v2025_v33 = vrot.slane %v2024_v59, 2  ;;  %v2031_v53 = vmax.f32 %v2029_v4, %v2030_v8  ;;  %v1257_v28 = vcombine.high %v1255_v63, %v1255_v63  ;;  %v1981_v17 = vrot.slane %v1980_v37, 4 }
 0x25a   : > { %v1987_v48 = vsel %vm1811_vm2, %v1256_v12, -inf  ;;  %v1994_v6 = vsel %vm1811_vm2, %v1255_v63, -inf  ;;  %v2012_v29 = vmax.f32 %v2010_v18, %v2011_v42  ;;  %v2018_v54 = vrot.slane %v2017_v25, 2 }
 0x25b   : > { %v2026_v0 = vmax.f32 %v2024_v59, %v2025_v33  ;;  %v2032_v22 = vrot.slane %v2031_v53, 2  ;;  %v1982_v7 = vmax.f32 %v1980_v37, %v1981_v17  ;;  %v1988_v62 = vrot.slane %v1987_v48, 4 }
 0x25c   : > { %v1995_v40 = vrot.slane %v1994_v6, 4  ;;  %v2001_v10 = vsel %vm1811_vm2, %v1257_v28, -inf  ;;  %v2013_v43 = vrot.slane %v2012_v29, 1  ;;  %v2019_v21 = vmax.f32 %v2017_v25, %v2018_v54 }
 0x25d   : > { %v2027_v2 = vrot.slane %v2026_v0, 1  ;;  %v2033_v26 = vmax.f32 %v2031_v53, %v2032_v22  ;;  %v1983_v35 = vrot.slane %v1982_v7, 2  ;;  %v1989_v46 = vmax.f32 %v1987_v48, %v1988_v62  ;;  %v7158_v62 = vld [vmem:[#allocation23_spill] sm:$0xff] }
 0x25e   : > { %v1996_v4 = vmax.f32 %v1994_v6, %v1995_v40  ;;  %v2002_v5 = vrot.slane %v2001_v10, 4  ;;  %v2014_v3 = vmax.f32 %v2012_v29, %v2013_v43  ;;  %v2020_v8 = vrot.slane %v2019_v21, 1  ;;  %v757_v6 = vpop.f32.mrf.mxu1 }
 0x25f   : > { %v2028_v63 = vmax.f32 %v2026_v0, %v2027_v2  ;;  %v2034_v18 = vrot.slane %v2033_v26, 1  ;;  %v1984_v12 = vmax.f32 %v1982_v7, %v1983_v35  ;;  %v1990_v59 = vrot.slane %v1989_v46, 2  ;;  %v7159_v7 = vld [vmem:[#allocation31_spill] sm:$0xff] }
 0x260   : > { %v1997_v42 = vrot.slane %v1996_v4, 2  ;;  %v2003_v37 = vmax.f32 %v2001_v10, %v2002_v5  ;;  %v2021_v33 = vmax.f32 %v2019_v21, %v2020_v8  ;;  %v2720_v28 = vmax.f32 %v6161_v61, %v2014_v3  ;;  %v7161_v10 = vld [vmem:[#allocation25_spill] sm:$0xff] }
 0x261   : > { %v2035_v17 = vmax.f32 %v2033_v26, %v2034_v18  ;;  %v2722_v25 = vmax.f32 %v6167_v47, %v2028_v63  ;;  %v1985_v54 = vrot.slane %v1984_v12, 1  ;;  %v1991_v53 = vmax.f32 %v1989_v46, %v1990_v59  ;;  %v7162_v21 = vld [vmem:[#allocation33_spill] sm:$0xff]  ;;  %v7164_v46 = vld [vmem:[#allocation24_spill] sm:$0xff]  ;;  %v7167_v63 = vld [vmem:[#allocation26_spill] sm:$0xff] }
 0x262   : > { %v1998_v22 = vmax.f32 %v1996_v4, %v1997_v42  ;;  %v2004_v48 = vrot.slane %v2003_v37, 2  ;;  %v2721_v29 = vmax.f32 %v6163_v55, %v2021_v33  ;;  %v7160_v40 = vmax.f32 %v7158_v62, %v7159_v7  ;;  %v7165_v4 = vld [vmem:[#allocation32_spill] sm:$0xff]  ;;  %v7168_v55 = vld [vmem:[#allocation34_spill] sm:$0xff]  ;;  %v7170_v62 = vld [vmem:[#allocation19_spill] sm:$0xff] }
 0x263   : > { %v2723_v0 = vmax.f32 %v6175_v23, %v2035_v17  ;;  %v7163_v2 = vmax.f32 %v7161_v10, %v7162_v21  ;;  %v1986_v61 = vmax.f32 %v1984_v12, %v1985_v54  ;;  %v1992_v35 = vrot.slane %v1991_v53, 1  ;;  %v7171_v7 = vld [vmem:[#allocation27_spill] sm:$0xff]  ;;  %v7173_v10 = vld [vmem:[#allocation21_spill] sm:$0xff]  ;;  %v7174_v21 = vld [vmem:[#allocation28_spill] sm:$0xff] }
 0x264   : > { %v4448_v43 = vadd.f32 %v7160_v40, %v2720_v28  ;;  %v1999_v47 = vrot.slane %v1998_v22, 1  ;;  %v2005_v5 = vmax.f32 %v2003_v37, %v2004_v48  ;;  %v7166_v3 = vmax.f32 %v7164_v46, %v7165_v4 }
 0x265   : > { %v4450_v26 = vadd.f32 %v7163_v2, %v2722_v25  ;;  %v7169_v18 = vmax.f32 %v7167_v63, %v7168_v55  ;;  %v949_v59 = vsel %vm885_vm4, %v6135_v56, %v917_v13  ;;  %v758_v42 = vadd.f32 %v6002_v38, %v757_v6  ;;  %v7179_v55 = vld [vmem:[#allocation22_spill] sm:$0xff] }
 0x266   : > { %v4449_v8 = vadd.f32 %v7166_v3, %v2721_v29  ;;  %v1993_v33 = vmax.f32 %v1991_v53, %v1992_v35  ;;  %v2000_v17 = vmax.f32 %v1998_v22, %v1999_v47  ;;  %v2006_v12 = vrot.slane %v2005_v5, 1  ;;  %v7176_v35 = vld [vmem:[#allocation20_spill] sm:$0xff] }
 0x267   : > { %v4451_v23 = vadd.f32 %v7169_v18, %v2723_v0  ;;  %v2716_v28 = vmax.f32 %v6177_v31, %v1986_v61  ;;  %v1292_v37 = vcombine.high %v949_v59, %v949_v59  ;;  %v1299_v25 = vrot.slane %v949_v59, %v5306_v11  ;;  %v7180_v18 = vld [vmem:[#allocation30_spill] sm:$0xff] }
 0x268   : > { %vm884_vm5 = vcmp.gt.f32.partialorder %v758_v42, 0.0  ;;  %v916_v54 = vmul.f32 0.1, %v758_v42  ;;  %v2007_v48 = vmax.f32 %v2005_v5, %v2006_v12  ;;  %v2717_v29 = vmax.f32 %v6179_v51, %v1993_v33  ;;  %v7177_v51 = vld [vmem:[#allocation29_spill] sm:$0xff] }
 0x269   : > { %v2718_v0 = vmax.f32 %v6183_v45, %v2000_v17  ;;  %v7172_v56 = vmax.f32 %v7170_v62, %v7171_v7  ;;  %v1306_v53 = vrot.slane %v1292_v37, %v5306_v11  ;;  %v1307_v22 = vcombine.high %v1299_v25, %v1299_v25 }
 0x26a   : > { %v2064_v6 = vsel %vm1811_vm2, %v1299_v25, -inf  ;;  %v948_v31 = vsel %vm884_vm5, %v758_v42, %v916_v54  ;;  %v2719_v40 = vmax.f32 %v6185_v19, %v2007_v48  ;;  %v7175_v2 = vmax.f32 %v7173_v10, %v7174_v21 }
 0x26b   : > { %v4444_v13 = vadd.f32 %v7172_v56, %v2716_v28  ;;  %v7178_v47 = vmax.f32 %v7176_v35, %v7177_v51  ;;  %v2065_v5 = vrot.slane %v2064_v6, 4  ;;  %v1308_v46 = vcombine.high %v1306_v53, %v1306_v53 }
 0x26c   : > { %v4445_v61 = vadd.f32 %v7175_v2, %v2717_v29  ;;  %v2071_v4 = vsel %vm1811_vm2, %v1307_v22, -inf  ;;  %v2078_v3 = vsel %vm1811_vm2, %v1306_v53, -inf  ;;  %v1275_v63 = vcombine.high %v948_v31, %v948_v31 }
 0x26d   : > { %v4446_v45 = vadd.f32 %v7178_v47, %v2718_v0  ;;  %v7181_v59 = vmax.f32 %v7179_v55, %v7180_v18  ;;  %v2066_v33 = vmax.f32 %v2064_v6, %v2065_v5  ;;  %v2072_v17 = vrot.slane %v2071_v4, 4 }
 0x26e   : > { %v4578_v19 = vsel %vm4564_vm8, %v4445_v61, %v4444_v13  ;;  %v2079_v28 = vrot.slane %v2078_v3, 4  ;;  %v2085_v37 = vsel %vm1811_vm2, %v1308_v46, -inf  ;;  %v1282_v25 = vrot.slane %v948_v31, %v5306_v11  ;;  %v4863_v61 = vpop.f32.mrf.mxu1 }
 0x26f   : > { %v4447_v42 = vadd.f32 %v7181_v59, %v2719_v40  ;;  %v4579_v12 = vsel %vm4566_vm9, %v4446_v45, %v4578_v19  ;;  %v2067_v48 = vrot.slane %v2066_v33, 2  ;;  %v2073_v29 = vmax.f32 %v2071_v4, %v2072_v17 }
 0x270   : > { %v2086_v0 = vrot.slane %v2085_v37, 4  ;;  %v2080_v7 = vmax.f32 %v2078_v3, %v2079_v28  ;;  %v1289_v56 = vrot.slane %v1275_v63, %v5306_v11  ;;  %v1290_v13 = vcombine.high %v1282_v25, %v1282_v25 }
 0x271   : > { %v4580_v54 = vsel %vm4568_vm10, %v4447_v42, %v4579_v12  ;;  %v2068_v22 = vmax.f32 %v2066_v33, %v2067_v48  ;;  %v2074_v6 = vrot.slane %v2073_v29, 2  ;;  %v2036_v2 = vsel %vm1811_vm2, %v1282_v25, -inf  ;;  %v767_v42 = vpop.f32.mrf.mxu1 }
 0x272   : > { %v4581_v62 = vsel %vm4570_vm11, %v4448_v43, %v4580_v54  ;;  %v2087_v40 = vmax.f32 %v2085_v37, %v2086_v0  ;;  %v2081_v31 = vrot.slane %v2080_v7, 2  ;;  %v1291_v21 = vcombine.high %v1289_v56, %v1289_v56 }
 0x273   : > { %v4582_v53 = vsel %vm4572_vm12, %v4449_v8, %v4581_v62  ;;  %v2069_v43 = vrot.slane %v2068_v22, 1  ;;  %v2075_v51 = vmax.f32 %v2073_v29, %v2074_v6  ;;  %v2037_v5 = vrot.slane %v2036_v2, 4 }
 0x274   : > { %v4583_v10 = vsel %vm4574_vm13, %v4450_v26, %v4582_v53  ;;  %v2088_v47 = vrot.slane %v2087_v40, 2  ;;  %v2082_v45 = vmax.f32 %v2080_v7, %v2081_v31  ;;  %v2043_v8 = vsel %vm1811_vm2, %v1290_v13, -inf }
 0x275   : > { %v4584_v35 = vsel %vm4576_vm14, %v4451_v23, %v4583_v10  ;;  %v2050_v46 = vsel %vm1811_vm2, %v1289_v56, -inf  ;;  %v2076_v26 = vrot.slane %v2075_v51, 1  ;;  %v2044_v63 = vrot.slane %v2043_v8, 4 }
 0x276   : > { %4636 = vst [vmem:[%s6151_s6 + $0x8] sm:$0xff] %v4584_v35  ;;  %v2089_v3 = vmax.f32 %v2087_v40, %v2088_v47  ;;  %v2038_v18 = vmax.f32 %v2036_v2, %v2037_v5  ;;  %v2051_v59 = vrot.slane %v2050_v46, 4  ;;  %v2057_v23 = vsel %vm1811_vm2, %v1291_v21, -inf  ;;  %v4866_v40 = vpop.f32.mrf.mxu1 }
 0x277   : > { %v6255_v19 = vmax.f32 %v2068_v22, %v2069_v43  ;;  %v2083_v33 = vrot.slane %v2082_v45, 1  ;;  %v2045_v17 = vmax.f32 %v2043_v8, %v2044_v63  ;;  %v2058_v12 = vrot.slane %v2057_v23, 4 }
 0x278   : > { %v6257_v28 = vmax.f32 %v2075_v51, %v2076_v26  ;;  %v2039_v37 = vrot.slane %v2038_v18, 2  ;;  %v2052_v25 = vmax.f32 %v2050_v46, %v2051_v59  ;;  %v773_v54 = vadd.f32 %v4863_v61, %v6002_v38 }
 0x279   : > { %v2090_v48 = vrot.slane %v2089_v3, 1  ;;  %v2046_v29 = vrot.slane %v2045_v17, 2  ;;  %v2059_v0 = vmax.f32 %v2057_v23, %v2058_v12  ;;  %v768_v62 = vadd.f32 %v6002_v38, %v767_v42 }
 0x27a   : > { %v2040_v7 = vmax.f32 %v2038_v18, %v2039_v37  ;;  %v2053_v56 = vrot.slane %v2052_v25, 2  ;;  %vm887_vm6 = vcmp.gt.f32.partialorder %v773_v54, 0.0  ;;  %v919_v13 = vmul.f32 0.1, %v773_v54 }
 0x27b   : > { %v2047_v53 = vmax.f32 %v2045_v17, %v2046_v29  ;;  %v2060_v22 = vrot.slane %v2059_v0, 2  ;;  %vm886_vm7 = vcmp.gt.f32.partialorder %v768_v62, 0.0  ;;  %v918_v6 = vmul.f32 0.1, %v768_v62 }
 0x27c   : > { %v6261_v10 = vmax.f32 %v2082_v45, %v2083_v33  ;;  %v2041_v31 = vrot.slane %v2040_v7, 1  ;;  %v2054_v21 = vmax.f32 %v2052_v25, %v2053_v56  ;;  %v951_v2 = vsel %vm887_vm6, %v773_v54, %v919_v13 }
 0x27d   : > { %v2048_v61 = vrot.slane %v2047_v53, 1  ;;  %v6263_v35 = vmax.f32 %v2059_v0, %v2060_v22  ;;  %v1326_v43 = vcombine.high %v951_v2, %v951_v2  ;;  %v1333_v51 = vrot.slane %v951_v2, %v5306_v11 }
 0x27e   : > { %v6266_v47 = vmax.f32 %v2089_v3, %v2090_v48  ;;  %v2055_v5 = vrot.slane %v2054_v21, 1  ;;  %v950_v8 = vsel %vm886_vm7, %v768_v62, %v918_v6  ;;  %v6269_v46 = vadd.f32 %v4866_v40, %v6002_v38 }
 0x27f   : > { %v6271_v26 = vmax.f32 %v2040_v7, %v2041_v31  ;;  %v6273_v45 = vmax.f32 %v2047_v53, %v2048_v61  ;;  %v1340_v63 = vrot.slane %v1326_v43, %v5306_v11  ;;  %v1341_v18 = vcombine.high %v1333_v51, %v1333_v51 }
 0x280   : > { %v2062_v59 = vrot.slane %v6263_v35, 1  ;;  %v2120_v23 = vsel %vm1811_vm2, %v1333_v51, -inf  ;;  %v1309_v42 = vcombine.high %v950_v8, %v950_v8  ;;  %v1316_v3 = vrot.slane %v950_v8, %v5306_v11 }
 0x281   : > { %v6279_v33 = vmax.f32 %v2054_v21, %v2055_v5  ;;  %v1342_v17 = vcombine.high %v1340_v63, %v1340_v63  ;;  %v2121_v12 = vrot.slane %v2120_v23, 4  ;;  %v2127_v38 = vsel %vm1811_vm2, %v1341_v18, -inf }
 0x282   : > { %v2128_v37 = vrot.slane %v2127_v38, 4  ;;  %v2134_v25 = vsel %vm1811_vm2, %v1340_v63, -inf  ;;  %v1323_v54 = vrot.slane %v1309_v42, %v5306_v11  ;;  %v1324_v48 = vcombine.high %v1316_v3, %v1316_v3 }
 0x283   : > { %v2122_v29 = vmax.f32 %v2120_v23, %v2121_v12  ;;  %v2135_v0 = vrot.slane %v2134_v25, 4  ;;  %v2141_v62 = vsel %vm1811_vm2, %v1342_v17, -inf  ;;  %v2092_v7 = vsel %vm1811_vm2, %v1316_v3, -inf }
 0x284   : > { %v2129_v56 = vmax.f32 %v2127_v38, %v2128_v37  ;;  %v2142_v13 = vrot.slane %v2141_v62, 4  ;;  %v1325_v53 = vcombine.high %v1323_v54, %v1323_v54  ;;  %v2093_v22 = vrot.slane %v2092_v7, 4 }
 0x285   : > { %v2123_v6 = vrot.slane %v2122_v29, 2  ;;  %v2136_v40 = vmax.f32 %v2134_v25, %v2135_v0  ;;  %v2099_v31 = vsel %vm1811_vm2, %v1324_v48, -inf  ;;  %v2106_v21 = vsel %vm1811_vm2, %v1323_v54, -inf }
 0x286   : > { %v2130_v2 = vrot.slane %v2129_v56, 2  ;;  %v2143_v61 = vmax.f32 %v2141_v62, %v2142_v13  ;;  %v2094_v43 = vmax.f32 %v2092_v7, %v2093_v22  ;;  %v2100_v51 = vrot.slane %v2099_v31, 4 }
 0x287   : > { %v2124_v5 = vmax.f32 %v2122_v29, %v2123_v6  ;;  %v2137_v8 = vrot.slane %v2136_v40, 2  ;;  %v2107_v63 = vrot.slane %v2106_v21, 4  ;;  %v2113_v18 = vsel %vm1811_vm2, %v1325_v53, -inf }
 0x288   : > { %v2131_v23 = vmax.f32 %v2129_v56, %v2130_v2  ;;  %v2144_v42 = vrot.slane %v2143_v61, 2  ;;  %v2095_v3 = vrot.slane %v2094_v43, 2  ;;  %v2101_v17 = vmax.f32 %v2099_v31, %v2100_v51 }
 0x289   : > { %vm889_vm15 = vcmp.gt.f32.partialorder %v6269_v46, 0.0  ;;  %v2125_v12 = vrot.slane %v2124_v5, 1  ;;  %v2138_v38 = vmax.f32 %v2136_v40, %v2137_v8  ;;  %v2108_v37 = vmax.f32 %v2106_v21, %v2107_v63 }
 0x28a   : > { %v2114_v25 = vrot.slane %v2113_v18, 4  ;;  %v2132_v54 = vrot.slane %v2131_v23, 1  ;;  %v2145_v48 = vmax.f32 %v2143_v61, %v2144_v42  ;;  %v2096_v0 = vmax.f32 %v2094_v43, %v2095_v3  ;;  %v7182_v3 = vld [vmem:[#allocation39_spill] sm:$0xff] }
 0x28b   : > { %v2102_v62 = vrot.slane %v2101_v17, 2  ;;  %v2126_v7 = vmax.f32 %v2124_v5, %v2125_v12  ;;  %v2139_v29 = vrot.slane %v2138_v38, 1  ;;  %v2109_v13 = vrot.slane %v2108_v37, 2 }
 0x28c   : > { %v2115_v22 = vmax.f32 %v2113_v18, %v2114_v25  ;;  %v2133_v6 = vmax.f32 %v2131_v23, %v2132_v54  ;;  %v2146_v53 = vrot.slane %v2145_v48, 1  ;;  %v2097_v56 = vrot.slane %v2096_v0, 1  ;;  %v777_v23 = vpop.f32.mrf.mxu1  ;;  %v7185_v25 = vld [vmem:[#allocation40_spill] sm:$0xff] }
 0x28d   : > { %v2103_v2 = vmax.f32 %v2101_v17, %v2102_v62  ;;  %v2140_v55 = vmax.f32 %v2138_v38, %v2139_v29  ;;  %v2728_v31 = vmax.f32 %v6255_v19, %v2126_v7  ;;  %v2110_v51 = vmax.f32 %v2108_v37, %v2109_v13  ;;  %v7183_v17 = vld [vmem:[#allocation45_spill] sm:$0xff]  ;;  %v7192_v7 = vld [vmem:[#allocation50_spill] sm:$0xff] }
 0x28e   : > { %v2116_v4 = vrot.slane %v2115_v22, 2  ;;  %v2147_v40 = vmax.f32 %v2145_v48, %v2146_v53  ;;  %v2729_v21 = vmax.f32 %v6257_v28, %v2133_v6  ;;  %v2098_v8 = vmax.f32 %v2096_v0, %v2097_v56  ;;  %v7186_v28 = vld [vmem:[#allocation46_spill] sm:$0xff]  ;;  %v4869_v53 = vpop.f32.mrf.mxu1 }
 0x28f   : > { %v2104_v61 = vrot.slane %v2103_v2, 1  ;;  %v2063_v43 = vmax.f32 %v6263_v35, %v2062_v59  ;;  %v2730_v5 = vmax.f32 %v6261_v10, %v2140_v55  ;;  %v2111_v63 = vrot.slane %v2110_v51, 1  ;;  %v7188_v10 = vld [vmem:[#allocation47_spill] sm:$0xff] }
 0x290   : > { %v2117_v18 = vmax.f32 %v2115_v22, %v2116_v4  ;;  %v2731_v42 = vmax.f32 %v6266_v47, %v2147_v40  ;;  %v7184_v12 = vmax.f32 %v7182_v3, %v7183_v17  ;;  %v2724_v37 = vmax.f32 %v6271_v26, %v2098_v8  ;;  %v7189_v4 = vld [vmem:[#allocation48_spill] sm:$0xff]  ;;  %v7191_v47 = vld [vmem:[#allocation49_spill] sm:$0xff]  ;;  %v7201_v17 = vld [vmem:[#allocation42_spill] sm:$0xff] }
 0x291   : > { %v2105_v38 = vmax.f32 %v2103_v2, %v2104_v61  ;;  %v7187_v54 = vmax.f32 %v7185_v25, %v7186_v28  ;;  %v2112_v0 = vmax.f32 %v2110_v51, %v2111_v63  ;;  %v921_v55 = vmul.f32 0.1, %v6269_v46  ;;  %v6313_v26 = vld [vmem:[%s6917_s3] ss:$0 sm:$0xff]  ;;  %v7198_v61 = vld [vmem:[#allocation43_spill] sm:$0xff] }
 0x292   : > { %v4456_v19 = vadd.f32 %v7184_v12, %v2728_v31  ;;  %v2118_v35 = vrot.slane %v2117_v18, 1  ;;  %v7190_v59 = vmax.f32 %v7188_v10, %v7189_v4  ;;  %v7193_v29 = vmax.f32 %v7191_v47, %v7192_v7  ;;  %v7194_v31 = vld [vmem:[#allocation35_spill] sm:$0xff]  ;;  %v7195_v51 = vld [vmem:[#allocation41_spill] sm:$0xff] }
 0x293   : > { %v4457_v48 = vadd.f32 %v7187_v54, %v2729_v21  ;;  %v2725_v22 = vmax.f32 %v6273_v45, %v2105_v38  ;;  %v778_v6 = vadd.f32 %v6313_v26, %v777_v23  ;;  %v2726_v2 = vmax.f32 %v6279_v33, %v2112_v0  ;;  %v7197_v45 = vld [vmem:[#allocation36_spill] sm:$0xff]  ;;  %v7203_v0 = vld [vmem:[#allocation38_spill] sm:$0xff] }
 0x294   : > { %v4458_v62 = vadd.f32 %v7190_v59, %v2730_v5  ;;  %v4459_v13 = vadd.f32 %v7193_v29, %v2731_v42  ;;  %v2119_v56 = vmax.f32 %v2117_v18, %v2118_v35  ;;  %v7196_v40 = vmax.f32 %v7194_v31, %v7195_v51  ;;  %v7200_v18 = vld [vmem:[#allocation37_spill] sm:$0xff]  ;;  %v7204_v35 = vld [vmem:[#allocation44_spill] sm:$0xff] }
 0x295   : > { %v953_v8 = vsel %vm889_vm15, %v6269_v46, %v921_v55  ;;  %v7199_v5 = vmax.f32 %v7197_v45, %v7198_v61  ;;  %vm888_vm0 = vcmp.gt.f32.partialorder %v778_v6, 0.0  ;;  %v7202_v33 = vmax.f32 %v7200_v18, %v7201_v17 }
 0x296   : > { %v4452_v21 = vadd.f32 %v7196_v40, %v2724_v37  ;;  %v1360_v42 = vcombine.high %v953_v8, %v953_v8  ;;  %v1367_v3 = vrot.slane %v953_v8, %v5306_v11  ;;  %v2727_v23 = vmax.f32 %v2063_v43, %v2119_v56 }
 0x297   : > { %v4453_v63 = vadd.f32 %v7199_v5, %v2725_v22  ;;  %v4454_v12 = vadd.f32 %v7202_v33, %v2726_v2  ;;  %v920_v38 = vmul.f32 0.1, %v778_v6  ;;  %v6331_v37 = vadd.f32 %v6313_v26, %v4869_v53 }
 0x298   : > { %v1374_v46 = vrot.slane %v1360_v42, %v5306_v11  ;;  %v1375_v28 = vcombine.high %v1367_v3, %v1367_v3  ;;  %v2176_v54 = vsel %vm1811_vm2, %v1367_v3, -inf  ;;  %v7205_v55 = vmax.f32 %v7203_v0, %v7204_v35 }
 0x299   : > { %v4585_v25 = vsel %vm4564_vm8, %v4453_v63, %v4452_v21  ;;  %v2177_v4 = vrot.slane %v2176_v54, 4  ;;  %v952_v59 = vsel %vm888_vm0, %v778_v6, %v920_v38  ;;  %vm891_vm1 = vcmp.gt.f32.partialorder %v6331_v37, 0.0 }
 0x29a   : > { %v4455_v10 = vadd.f32 %v7205_v55, %v2727_v23  ;;  %v4586_v43 = vsel %vm4566_vm9, %v4454_v12, %v4585_v25  ;;  %v1376_v47 = vcombine.high %v1374_v46, %v1374_v46  ;;  %v2183_v7 = vsel %vm1811_vm2, %v1375_v28, -inf }
 0x29b   : > { %v2190_v29 = vsel %vm1811_vm2, %v1374_v46, -inf  ;;  %v1343_v22 = vcombine.high %v952_v59, %v952_v59  ;;  %v2178_v56 = vmax.f32 %v2176_v54, %v2177_v4  ;;  %v2184_v2 = vrot.slane %v2183_v7, 4 }
 0x29c   : > { %v4587_v53 = vsel %vm4568_vm10, %v4455_v10, %v4586_v43  ;;  %v2191_v31 = vrot.slane %v2190_v29, 4  ;;  %v2197_v40 = vsel %vm1811_vm2, %v1376_v47, -inf  ;;  %v1350_v21 = vrot.slane %v952_v59, %v5306_v11 }
 0x29d   : > { %v4588_v51 = vsel %vm4570_vm11, %v4456_v19, %v4587_v53  ;;  %v1357_v6 = vrot.slane %v1343_v22, %v5306_v11  ;;  %v2179_v45 = vrot.slane %v2178_v56, 2  ;;  %v2185_v61 = vmax.f32 %v2183_v7, %v2184_v2  ;;  %v787_v22 = vpop.f32.mrf.mxu1 }
 0x29e   : > { %v4589_v8 = vsel %vm4572_vm12, %v4457_v48, %v4588_v51  ;;  %v2192_v5 = vmax.f32 %v2190_v29, %v2191_v31  ;;  %v2198_v42 = vrot.slane %v2197_v40, 4  ;;  %v1358_v3 = vcombine.high %v1350_v21, %v1350_v21 }
 0x29f   : > { %v4590_v63 = vsel %vm4574_vm13, %v4458_v62, %v4589_v8  ;;  %v1359_v23 = vcombine.high %v1357_v6, %v1357_v6  ;;  %v2180_v19 = vmax.f32 %v2178_v56, %v2179_v45  ;;  %v2186_v17 = vrot.slane %v2185_v61, 2  ;;  %v4872_v45 = vpop.f32.mrf.mxu1 }
 0x2a0   : > { %v4591_v18 = vsel %vm4576_vm14, %v4459_v13, %v4590_v63  ;;  %v2193_v33 = vrot.slane %v2192_v5, 2  ;;  %v2199_v12 = vmax.f32 %v2197_v40, %v2198_v42  ;;  %v2148_v38 = vsel %vm1811_vm2, %v1350_v21, -inf }
 0x2a1   : > { %4637 = vst [vmem:[%s6151_s6 + $0x10] sm:$0xff] %v4591_v18  ;;  %v2155_v25 = vsel %vm1811_vm2, %v1358_v3, -inf  ;;  %v2162_v48 = vsel %vm1811_vm2, %v1357_v6, -inf  ;;  %v2181_v46 = vrot.slane %v2180_v19, 1  ;;  %v2187_v28 = vmax.f32 %v2185_v61, %v2186_v17 }
 0x2a2   : > { %v2194_v54 = vmax.f32 %v2192_v5, %v2193_v33  ;;  %v2149_v62 = vrot.slane %v2148_v38, 4  ;;  %v2200_v0 = vrot.slane %v2199_v12, 2  ;;  %v2156_v35 = vrot.slane %v2155_v25, 4 }
 0x2a3   : > { %v2163_v55 = vrot.slane %v2162_v48, 4  ;;  %v2169_v13 = vsel %vm1811_vm2, %v1359_v23, -inf  ;;  %v2188_v10 = vrot.slane %v2187_v28, 1  ;;  %v7206_v53 = vrot.slane %v6044_v1, 1 }
 0x2a4   : > { %v2195_v43 = vrot.slane %v2194_v54, 1  ;;  %v2150_v4 = vmax.f32 %v2148_v38, %v2149_v62  ;;  %v2201_v59 = vmax.f32 %v2199_v12, %v2200_v0  ;;  %v2157_v47 = vmax.f32 %v2155_v25, %v2156_v35 }
 0x2a5   : > { %v2164_v7 = vmax.f32 %v2162_v48, %v2163_v55  ;;  %v2170_v29 = vrot.slane %v2169_v13, 4  ;;  %v6359_v56 = vmax.f32 %v6044_v1, %v7206_v53  ;;  %v6361_v2 = vmax.f32 %v2180_v19, %v2181_v46 }
 0x2a6   : > { %v2151_v31 = vrot.slane %v2150_v4, 2  ;;  %v923_v51 = vmul.f32 0.1, %v6331_v37  ;;  %v6364_v40 = vmax.f32 %v2187_v28, %v2188_v10  ;;  %v2158_v21 = vrot.slane %v2157_v47, 2 }
 0x2a7   : > { %v2165_v6 = vrot.slane %v2164_v7, 2  ;;  %v2171_v8 = vmax.f32 %v2169_v13, %v2170_v29  ;;  %v6366_v61 = vmax.f32 %v2194_v54, %v2195_v43  ;;  %v788_v1 = vadd.f32 %v6313_v26, %v787_v22 }
 0x2a8   : > { %v2152_v5 = vmax.f32 %v2150_v4, %v2151_v31  ;;  %v955_v63 = vsel %vm891_vm1, %v6331_v37, %v923_v51  ;;  %v2202_v42 = vrot.slane %v2201_v59, 1  ;;  %v2159_v3 = vmax.f32 %v2157_v47, %v2158_v21 }
 0x2a9   : > { %v2166_v23 = vmax.f32 %v2164_v7, %v2165_v6  ;;  %v2172_v18 = vrot.slane %v2171_v8, 2  ;;  %v1394_v17 = vcombine.high %v955_v63, %v955_v63  ;;  %v1401_v33 = vrot.slane %v955_v63, %v5306_v11 }
 0x2aa   : > { %v2153_v19 = vrot.slane %v2152_v5, 1  ;;  %v6374_v12 = vadd.f32 %v6313_v26, %v4872_v45  ;;  %v2160_v38 = vrot.slane %v2159_v3, 1  ;;  %vm890_vm3 = vcmp.gt.f32.partialorder %v788_v1, 0.0 }
 0x2ab   : > { %v2167_v25 = vrot.slane %v2166_v23, 1  ;;  %v922_v48 = vmul.f32 0.1, %v788_v1  ;;  %v2173_v46 = vmax.f32 %v2171_v8, %v2172_v18  ;;  %v1408_v37 = vrot.slane %v1394_v17, %v5306_v11 }
 0x2ac   : > { %v1409_v28 = vcombine.high %v1401_v33, %v1401_v33  ;;  %v2232_v54 = vsel %vm1811_vm2, %v1401_v33, -inf  ;;  %v6378_v62 = vmax.f32 %v2201_v59, %v2202_v42  ;;  %v6380_v0 = vmax.f32 %v2152_v5, %v2153_v19 }
 0x2ad   : > { %v6382_v35 = vmax.f32 %v2159_v3, %v2160_v38  ;;  %v2233_v55 = vrot.slane %v2232_v54, 4  ;;  %v1410_v13 = vcombine.high %v1408_v37, %v1408_v37  ;;  %v2246_v43 = vsel %vm1811_vm2, %v1408_v37, -inf }
 0x2ae   : > { %v2239_v10 = vsel %vm1811_vm2, %v1409_v28, -inf  ;;  %v954_v4 = vsel %vm890_vm3, %v788_v1, %v922_v48  ;;  %v6386_v47 = vmax.f32 %v2166_v23, %v2167_v25  ;;  %v2247_v22 = vrot.slane %v2246_v43, 4 }
 0x2af   : > { %v2234_v7 = vmax.f32 %v2232_v54, %v2233_v55  ;;  %v2240_v29 = vrot.slane %v2239_v10, 4  ;;  %v2174_v53 = vrot.slane %v2173_v46, 1  ;;  %v2253_v59 = vsel %vm1811_vm2, %v1410_v13, -inf }
 0x2b0   : > { %v1377_v31 = vcombine.high %v954_v4, %v954_v4  ;;  %v1384_v51 = vrot.slane %v954_v4, %v5306_v11  ;;  %v2248_v8 = vmax.f32 %v2246_v43, %v2247_v22  ;;  %v2254_v45 = vrot.slane %v2253_v59, 4 }
 0x2b1   : > { %v2235_v21 = vrot.slane %v2234_v7, 2  ;;  %v2241_v6 = vmax.f32 %v2239_v10, %v2240_v29  ;;  %vm893_vm4 = vcmp.gt.f32.partialorder %v6374_v12, 0.0  ;;  %v925_v42 = vmul.f32 0.1, %v6374_v12 }
 0x2b2   : > { %v1391_v5 = vrot.slane %v1377_v31, %v5306_v11  ;;  %v1392_v63 = vcombine.high %v1384_v51, %v1384_v51  ;;  %v2204_v1 = vsel %vm1811_vm2, %v1384_v51, -inf  ;;  %v2249_v18 = vrot.slane %v2248_v8, 2 }
 0x2b3   : > { %v2236_v3 = vmax.f32 %v2234_v7, %v2235_v21  ;;  %v2242_v23 = vrot.slane %v2241_v6, 2  ;;  %v2255_v19 = vmax.f32 %v2253_v59, %v2254_v45  ;;  %v2205_v33 = vrot.slane %v2204_v1, 4 }
 0x2b4   : > { %v1393_v17 = vcombine.high %v1391_v5, %v1391_v5  ;;  %v2211_v38 = vsel %vm1811_vm2, %v1392_v63, -inf  ;;  %v2218_v25 = vsel %vm1811_vm2, %v1391_v5, -inf  ;;  %v2250_v28 = vmax.f32 %v2248_v8, %v2249_v18 }
 0x2b5   : > { %v2237_v48 = vrot.slane %v2236_v3, 1  ;;  %v2243_v37 = vmax.f32 %v2241_v6, %v2242_v23  ;;  %v2256_v54 = vrot.slane %v2255_v19, 2  ;;  %v2206_v55 = vmax.f32 %v2204_v1, %v2205_v33 }
 0x2b6   : > { %v2212_v13 = vrot.slane %v2211_v38, 4  ;;  %v2219_v10 = vrot.slane %v2218_v25, 4  ;;  %v2225_v43 = vsel %vm1811_vm2, %v1393_v17, -inf  ;;  %v2251_v29 = vrot.slane %v2250_v28, 1 }
 0x2b7   : > { %v2238_v4 = vmax.f32 %v2236_v3, %v2237_v48  ;;  %v2244_v7 = vrot.slane %v2243_v37, 1  ;;  %v2257_v22 = vmax.f32 %v2255_v19, %v2256_v54  ;;  %v2207_v59 = vrot.slane %v2206_v55, 2  ;;  %v797_v54 = vpop.f32.mrf.mxu1 }
 0x2b8   : > { %v2213_v31 = vmax.f32 %v2211_v38, %v2212_v13  ;;  %v2220_v51 = vmax.f32 %v2218_v25, %v2219_v10  ;;  %v2226_v21 = vrot.slane %v2225_v43, 4  ;;  %v2252_v63 = vmax.f32 %v2250_v28, %v2251_v29  ;;  %v7207_v28 = vld [vmem:[#allocation55_spill] sm:$0xff]  ;;  %v7210_v10 = vld [vmem:[#allocation56_spill] sm:$0xff] }
 0x2b9   : > { %v2245_v45 = vmax.f32 %v2243_v37, %v2244_v7  ;;  %v2258_v5 = vrot.slane %v2257_v22, 1  ;;  %v2736_v6 = vmax.f32 %v6361_v2, %v2238_v4  ;;  %v2208_v8 = vmax.f32 %v2206_v55, %v2207_v59  ;;  %v7208_v13 = vld [vmem:[#allocation63_spill] sm:$0xff]  ;;  %v7211_v4 = vld [vmem:[#allocation64_spill] sm:$0xff]  ;;  %v7214_v59 = vld [vmem:[#allocation65_spill] sm:$0xff] }
 0x2ba   : > { %v2214_v23 = vrot.slane %v2213_v31, 2  ;;  %v2221_v1 = vrot.slane %v2220_v51, 2  ;;  %v2227_v18 = vmax.f32 %v2225_v43, %v2226_v21  ;;  %v2175_v33 = vmax.f32 %v2173_v46, %v2174_v53 }
 0x2bb   : > { %v2259_v15 = vmax.f32 %v2257_v22, %v2258_v5  ;;  %v2737_v3 = vmax.f32 %v6364_v40, %v2245_v45  ;;  %v2738_v17 = vmax.f32 %v6366_v61, %v2252_v63  ;;  %v2209_v19 = vrot.slane %v2208_v8, 1  ;;  %v7213_v22 = vld [vmem:[#allocation57_spill] sm:$0xff] }
 0x2bc   : > { %v2215_v48 = vmax.f32 %v2213_v31, %v2214_v23  ;;  %v2222_v38 = vmax.f32 %v2220_v51, %v2221_v1  ;;  %v2228_v25 = vrot.slane %v2227_v18, 2  ;;  %v7209_v2 = vmax.f32 %v7207_v28, %v7208_v13  ;;  %v7219_v13 = vld [vmem:[#allocation53_spill] sm:$0xff] }
 0x2bd   : > { %v2739_v37 = vmax.f32 %v6378_v62, %v2259_v15  ;;  %v7212_v43 = vmax.f32 %v7210_v10, %v7211_v4  ;;  %v957_v40 = vsel %vm893_vm4, %v6374_v12, %v925_v42  ;;  %v2210_v61 = vmax.f32 %v2208_v8, %v2209_v19 }
 0x2be   : > { %v4464_v55 = vadd.f32 %v7209_v2, %v2736_v6  ;;  %v2216_v53 = vrot.slane %v2215_v48, 1  ;;  %v2223_v7 = vrot.slane %v2222_v38, 1  ;;  %v2229_v29 = vmax.f32 %v2227_v18, %v2228_v25  ;;  %v7220_v2 = vld [vmem:[#allocation60_spill] sm:$0xff] }
 0x2bf   : > { %v4465_v46 = vadd.f32 %v7212_v43, %v2737_v3  ;;  %v7215_v31 = vmax.f32 %v7213_v22, %v7214_v59  ;;  %v1428_v62 = vcombine.high %v957_v40, %v957_v40  ;;  %v1435_v51 = vrot.slane %v957_v40, %v5306_v11  ;;  %v7216_v3 = vld [vmem:[#allocation51_spill] sm:$0xff]  ;;  %v7222_v43 = vld [vmem:[#allocation52_spill] sm:$0xff]  ;;  %v7223_v40 = vld [vmem:[#allocation61_spill] sm:$0xff] }
 0x2c0   : > { %v798_v21 = vadd.f32 %v6313_v26, %v797_v54  ;;  %v2217_v45 = vmax.f32 %v2215_v48, %v2216_v53  ;;  %v2224_v63 = vmax.f32 %v2222_v38, %v2223_v7  ;;  %v2230_v5 = vrot.slane %v2229_v29, 1  ;;  %v7225_v59 = vld [vmem:[#allocation54_spill] sm:$0xff] }
 0x2c1   : > { %v4466_v15 = vadd.f32 %v7215_v31, %v2738_v17  ;;  %v2732_v6 = vmax.f32 %v6380_v0, %v2210_v61  ;;  %v1442_v12 = vrot.slane %v1428_v62, %v5306_v11  ;;  %v1443_v42 = vcombine.high %v1435_v51, %v1435_v51  ;;  %v7217_v17 = vld [vmem:[#allocation58_spill] sm:$0xff] }
 0x2c2   : > { %v2288_v8 = vsel %vm1811_vm2, %v1435_v51, -inf  ;;  %vm892_vm5 = vcmp.gt.f32.partialorder %v798_v21, 0.0  ;;  %v2231_v23 = vmax.f32 %v2229_v29, %v2230_v5  ;;  %v2733_v1 = vmax.f32 %v6382_v35, %v2217_v45  ;;  %v7226_v31 = vld [vmem:[#allocation62_spill] sm:$0xff] }
 0x2c3   : > { %v2734_v18 = vmax.f32 %v6386_v47, %v2224_v63  ;;  %v7218_v19 = vmax.f32 %v7216_v3, %v7217_v17  ;;  %v1444_v48 = vcombine.high %v1442_v12, %v1442_v12  ;;  %v2289_v38 = vrot.slane %v2288_v8, 4  ;;  %v7228_v3 = vld [vmem:[#allocation59_spill] sm:$0xff]  ;;  %v7229_v17 = vld [vmem:[#allocation66_spill] sm:$0xff] }
 0x2c4   : > { %v2295_v54 = vsel %vm1811_vm2, %v1443_v42, -inf  ;;  %v2302_v0 = vsel %vm1811_vm2, %v1442_v12, -inf  ;;  %v2735_v28 = vmax.f32 %v2175_v33, %v2231_v23  ;;  %v7221_v10 = vmax.f32 %v7219_v13, %v7220_v2  ;;  %v4875_v2 = vpop.f32.mrf.mxu1 }
 0x2c5   : > { %v4460_v25 = vadd.f32 %v7218_v19, %v2732_v6  ;;  %v7224_v35 = vmax.f32 %v7222_v43, %v7223_v40  ;;  %v2296_v47 = vrot.slane %v2295_v54, 4  ;;  %v2290_v53 = vmax.f32 %v2288_v8, %v2289_v38 }
 0x2c6   : > { %v4461_v4 = vadd.f32 %v7221_v10, %v2733_v1  ;;  %v2303_v7 = vrot.slane %v2302_v0, 4  ;;  %v2309_v29 = vsel %vm1811_vm2, %v1444_v48, -inf  ;;  %v924_v22 = vmul.f32 0.1, %v798_v21 }
 0x2c7   : > { %v4462_v61 = vadd.f32 %v7224_v35, %v2734_v18  ;;  %v7227_v62 = vmax.f32 %v7225_v59, %v7226_v31  ;;  %v2297_v45 = vmax.f32 %v2295_v54, %v2296_v47  ;;  %v2310_v63 = vrot.slane %v2309_v29, 4 }
 0x2c8   : > { %v4592_v33 = vsel %vm4564_vm8, %v4461_v4, %v4460_v25  ;;  %v2291_v6 = vrot.slane %v2290_v53, 2  ;;  %v2304_v12 = vmax.f32 %v2302_v0, %v2303_v7  ;;  %v956_v42 = vsel %vm892_vm5, %v798_v21, %v924_v22 }
 0x2c9   : > { %v4463_v51 = vadd.f32 %v7227_v62, %v2735_v28  ;;  %v4593_v5 = vsel %vm4566_vm9, %v4462_v61, %v4592_v33  ;;  %v2298_v23 = vrot.slane %v2297_v45, 2  ;;  %v2311_v1 = vmax.f32 %v2309_v29, %v2310_v63  ;;  %v807_v62 = vpop.f32.mrf.mxu1 }
 0x2ca   : > { %v1411_v18 = vcombine.high %v956_v42, %v956_v42  ;;  %v7230_v19 = vmax.f32 %v7228_v3, %v7229_v17  ;;  %v2305_v25 = vrot.slane %v2304_v12, 2  ;;  %v1418_v54 = vrot.slane %v956_v42, %v5306_v11 }
 0x2cb   : > { %v4594_v8 = vsel %vm4568_vm10, %v4463_v51, %v4593_v5  ;;  %v2292_v0 = vmax.f32 %v2290_v53, %v2291_v6  ;;  %v2312_v13 = vrot.slane %v2311_v1, 2  ;;  %v2299_v43 = vmax.f32 %v2297_v45, %v2298_v23 }
 0x2cc   : > { %v4467_v48 = vadd.f32 %v7230_v19, %v2739_v37  ;;  %v4595_v38 = vsel %vm4570_vm11, %v4464_v55, %v4594_v8  ;;  %v1425_v21 = vrot.slane %v1411_v18, %v5306_v11  ;;  %v1426_v37 = vcombine.high %v1418_v54, %v1418_v54 }
 0x2cd   : > { %v4596_v28 = vsel %vm4572_vm12, %v4465_v46, %v4595_v38  ;;  %v7231_v55 = vrot.slane %v6046_v36, 1  ;;  %v2306_v46 = vmax.f32 %v2304_v12, %v2305_v25  ;;  %v7232_v47 = vrot.slane %v6055_v58, 1 }
 0x2ce   : > { %v4597_v4 = vsel %vm4574_vm13, %v4466_v15, %v4596_v28  ;;  %v1427_v61 = vcombine.high %v1425_v21, %v1425_v21  ;;  %v2260_v15 = vsel %vm1811_vm2, %v1418_v54, -inf  ;;  %v2267_v29 = vsel %vm1811_vm2, %v1426_v37, -inf }
 0x2cf   : > { %v6452_v40 = vmax.f32 %v6046_v36, %v7231_v55  ;;  %v4598_v35 = vsel %vm4576_vm14, %v4467_v48, %v4597_v4  ;;  %v6458_v53 = vmax.f32 %v6055_v58, %v7232_v47  ;;  %v2293_v22 = vrot.slane %v2292_v0, 1  ;;  %v4878_v55 = vpop.f32.mrf.mxu1 }
 0x2d0   : > { %4638 = vst [vmem:[%s6151_s6 + $0x18] sm:$0xff] %v4598_v35  ;;  %v2313_v36 = vmax.f32 %v2311_v1, %v2312_v13  ;;  %v2261_v59 = vrot.slane %v2260_v15, 4  ;;  %v2268_v31 = vrot.slane %v2267_v29, 4  ;;  %v2300_v51 = vrot.slane %v2299_v43, 1 }
 0x2d1   : > { %v2274_v33 = vsel %vm1811_vm2, %v1425_v21, -inf  ;;  %v2281_v45 = vsel %vm1811_vm2, %v1427_v61, -inf  ;;  %v813_v58 = vadd.f32 %v6313_v26, %v4875_v2  ;;  %v2307_v63 = vrot.slane %v2306_v46, 1 }
 0x2d2   : > { %v2262_v5 = vmax.f32 %v2260_v15, %v2261_v59  ;;  %v2269_v6 = vmax.f32 %v2267_v29, %v2268_v31  ;;  %v2275_v12 = vrot.slane %v2274_v33, 4  ;;  %v2282_v42 = vrot.slane %v2281_v45, 4 }
 0x2d3   : > { %vm895_vm6 = vcmp.gt.f32.partialorder %v813_v58, 0.0  ;;  %v927_v8 = vmul.f32 0.1, %v813_v58  ;;  %v808_v23 = vadd.f32 %v6313_v26, %v807_v62  ;;  %v2314_v1 = vrot.slane %v2313_v36, 1 }
 0x2d4   : > { %v2263_v18 = vrot.slane %v2262_v5, 2  ;;  %v2270_v3 = vrot.slane %v2269_v6, 2  ;;  %v2276_v17 = vmax.f32 %v2274_v33, %v2275_v12  ;;  %v2283_v19 = vmax.f32 %v2281_v45, %v2282_v42 }
 0x2d5   : > { %v959_v48 = vsel %vm895_vm6, %v813_v58, %v927_v8  ;;  %vm894_vm7 = vcmp.gt.f32.partialorder %v808_v23, 0.0  ;;  %v926_v38 = vmul.f32 0.1, %v808_v23  ;;  %v6469_v25 = vmax.f32 %v2292_v0, %v2293_v22 }
 0x2d6   : > { %v2264_v54 = vmax.f32 %v2262_v5, %v2263_v18  ;;  %v2277_v28 = vrot.slane %v2276_v17, 2  ;;  %v1462_v13 = vcombine.high %v959_v48, %v959_v48  ;;  %v6471_v21 = vmax.f32 %v2269_v6, %v2270_v3 }
 0x2d7   : > { %v2284_v2 = vrot.slane %v2283_v19, 2  ;;  %v1469_v4 = vrot.slane %v959_v48, %v5306_v11  ;;  %v958_v37 = vsel %vm894_vm7, %v808_v23, %v926_v38  ;;  %v6474_v35 = vmax.f32 %v2299_v43, %v2300_v51 }
 0x2d8   : > { %v6476_v61 = vmax.f32 %v2306_v46, %v2307_v63  ;;  %v2265_v47 = vrot.slane %v2264_v54, 1  ;;  %v1476_v15 = vrot.slane %v1462_v13, %v5306_v11  ;;  %v6479_v29 = vmax.f32 %v2313_v36, %v2314_v1 }
 0x2d9   : > { %v2278_v0 = vmax.f32 %v2276_v17, %v2277_v28  ;;  %v1477_v22 = vcombine.high %v1469_v4, %v1469_v4  ;;  %v2344_v59 = vsel %vm1811_vm2, %v1469_v4, -inf  ;;  %v2285_v31 = vmax.f32 %v2283_v19, %v2284_v2 }
 0x2da   : > { %v1478_v62 = vcombine.high %v1476_v15, %v1476_v15  ;;  %v1445_v33 = vcombine.high %v958_v37, %v958_v37  ;;  %v6483_v45 = vadd.f32 %v6313_v26, %v4878_v55  ;;  %v2272_v43 = vrot.slane %v6471_v21, 1 }
 0x2db   : > { %v2345_v51 = vrot.slane %v2344_v59, 4  ;;  %v2351_v46 = vsel %vm1811_vm2, %v1477_v22, -inf  ;;  %v2358_v58 = vsel %vm1811_vm2, %v1476_v15, -inf  ;;  %v6488_v63 = vmax.f32 %v2264_v54, %v2265_v47 }
 0x2dc   : > { %v2352_v36 = vrot.slane %v2351_v46, 4  ;;  %v2359_v5 = vrot.slane %v2358_v58, 4  ;;  %v2365_v6 = vsel %vm1811_vm2, %v1478_v62, -inf  ;;  %v2279_v12 = vrot.slane %v2278_v0, 1 }
 0x2dd   : > { %v2346_v42 = vmax.f32 %v2344_v59, %v2345_v51  ;;  %v2366_v8 = vrot.slane %v2365_v6, 4  ;;  %v1452_v23 = vrot.slane %v958_v37, %v5306_v11  ;;  %v2286_v1 = vrot.slane %v2285_v31, 1 }
 0x2de   : > { %v2353_v18 = vmax.f32 %v2351_v46, %v2352_v36  ;;  %v2360_v3 = vmax.f32 %v2358_v58, %v2359_v5  ;;  %v1459_v17 = vrot.slane %v1445_v33, %v5306_v11  ;;  %vm897_vm15 = vcmp.gt.f32.partialorder %v6483_v45, 0.0 }
 0x2df   : > { %v2347_v19 = vrot.slane %v2346_v42, 2  ;;  %v2367_v48 = vmax.f32 %v2365_v6, %v2366_v8  ;;  %v1460_v38 = vcombine.high %v1452_v23, %v1452_v23  ;;  %v2316_v54 = vsel %vm1811_vm2, %v1452_v23, -inf }
 0x2e0   : > { %v2354_v28 = vrot.slane %v2353_v18, 2  ;;  %v2361_v13 = vrot.slane %v2360_v3, 2  ;;  %v1461_v2 = vcombine.high %v1459_v17, %v1459_v17  ;;  %v2317_v4 = vrot.slane %v2316_v54, 4 }
 0x2e1   : > { %v2348_v55 = vmax.f32 %v2346_v42, %v2347_v19  ;;  %v2368_v47 = vrot.slane %v2367_v48, 2  ;;  %v2323_v37 = vsel %vm1811_vm2, %v1460_v38, -inf  ;;  %v2330_v15 = vsel %vm1811_vm2, %v1459_v17, -inf }
 0x2e2   : > { %v2355_v22 = vmax.f32 %v2353_v18, %v2354_v28  ;;  %v2362_v59 = vmax.f32 %v2360_v3, %v2361_v13  ;;  %v2318_v62 = vmax.f32 %v2316_v54, %v2317_v4  ;;  %v2324_v33 = vrot.slane %v2323_v37, 4 }
 0x2e3   : > { %v2349_v51 = vrot.slane %v2348_v55, 1  ;;  %v2369_v46 = vmax.f32 %v2367_v48, %v2368_v47  ;;  %v2331_v58 = vrot.slane %v2330_v15, 4  ;;  %v2337_v36 = vsel %vm1811_vm2, %v1461_v2, -inf }
 0x2e4   : > { %v2356_v5 = vrot.slane %v2355_v22, 1  ;;  %v2363_v6 = vrot.slane %v2362_v59, 1  ;;  %v2319_v8 = vrot.slane %v2318_v62, 2  ;;  %v2325_v23 = vmax.f32 %v2323_v37, %v2324_v33 }
 0x2e5   : > { %v2350_v7 = vmax.f32 %v2348_v55, %v2349_v51  ;;  %v2370_v42 = vrot.slane %v2369_v46, 1  ;;  %v2332_v19 = vmax.f32 %v2330_v15, %v2331_v58  ;;  %v2338_v10 = vrot.slane %v2337_v36, 4 }
 0x2e6   : > { %v6498_v38 = vmax.f32 %v2355_v22, %v2356_v5  ;;  %v6500_v17 = vmax.f32 %v2362_v59, %v2363_v6  ;;  %v2320_v18 = vmax.f32 %v2318_v62, %v2319_v8  ;;  %v2326_v3 = vrot.slane %v2325_v23, 2 }
 0x2e7   : > { %v6502_v54 = vmax.f32 %v2369_v46, %v2370_v42  ;;  %v2333_v48 = vrot.slane %v2332_v19, 2  ;;  %v2339_v28 = vmax.f32 %v2337_v36, %v2338_v10  ;;  %v929_v13 = vmul.f32 0.1, %v6483_v45  ;;  %v817_v46 = vpop.f32.mrf.mxu1 }
 0x2e8   : > { %v2273_v2 = vmax.f32 %v6471_v21, %v2272_v43  ;;  %v2280_v4 = vmax.f32 %v2278_v0, %v2279_v12  ;;  %v2321_v47 = vrot.slane %v2320_v18, 1  ;;  %v2327_v55 = vmax.f32 %v2325_v23, %v2326_v3 }
 0x2e9   : > { %v2287_v37 = vmax.f32 %v2285_v31, %v2286_v1  ;;  %v2744_v15 = vmax.f32 %v6469_v25, %v2350_v7  ;;  %v2334_v22 = vmax.f32 %v2332_v19, %v2333_v48  ;;  %v2340_v33 = vrot.slane %v2339_v28, 2 }
 0x2ea   : > { %v2745_v59 = vmax.f32 %v6474_v35, %v6498_v38  ;;  %v2746_v62 = vmax.f32 %v6476_v61, %v6500_v17  ;;  %v2322_v51 = vmax.f32 %v2320_v18, %v2321_v47  ;;  %v2328_v10 = vrot.slane %v2327_v55, 1 }
 0x2eb   : > { %v2747_v21 = vmax.f32 %v6479_v29, %v6502_v54  ;;  %v2335_v0 = vrot.slane %v2334_v22, 1  ;;  %v2341_v43 = vmax.f32 %v2339_v28, %v2340_v33  ;;  %v961_v7 = vsel %vm897_vm15, %v6483_v45, %v929_v13  ;;  %v4881_v28 = vpop.f32.mrf.mxu1 }
 0x2ec   : > { %v2329_v25 = vmax.f32 %v2327_v55, %v2328_v10  ;;  %v2740_v31 = vmax.f32 %v6488_v63, %v2322_v51  ;;  %v1496_v12 = vcombine.high %v961_v7, %v961_v7  ;;  %v1503_v35 = vrot.slane %v961_v7, %v5306_v11 }
 0x2ed   : > { %v7233_v61 = vmax.f32 %v5807_v14, %v5889_v9  ;;  %v2336_v58 = vmax.f32 %v2334_v22, %v2335_v0  ;;  %v2342_v36 = vrot.slane %v2341_v43, 1  ;;  %v818_v29 = vadd.f32 %v6313_v26, %v817_v46 }
 0x2ee   : > { %v2741_v5 = vmax.f32 %v2273_v2, %v2329_v25  ;;  %v7234_v6 = vmax.f32 %v5770_v49, %v5835_v41  ;;  %v1510_v45 = vrot.slane %v1496_v12, %v5306_v11  ;;  %v1511_v23 = vcombine.high %v1503_v35, %v1503_v35 }
 0x2ef   : > { %v4472_v1 = vadd.f32 %v7233_v61, %v2744_v15  ;;  %v2343_v63 = vmax.f32 %v2341_v43, %v2342_v36  ;;  %v2742_v42 = vmax.f32 %v2280_v4, %v2336_v58  ;;  %v2400_v19 = vsel %vm1811_vm2, %v1503_v35, -inf  ;;  %v7241_v35 = vld [vmem:[#allocation76_spill] sm:$0xff]  ;;  %v7242_v61 = vld [vmem:[#allocation85_spill] sm:$0xff] }
 0x2f0   : > { %v4468_v8 = vadd.f32 %v7234_v6, %v2740_v31  ;;  %vm896_vm0 = vcmp.gt.f32.partialorder %v818_v29, 0.0  ;;  %v7235_v14 = vmax.f32 %v5772_v39, %v5849_v20  ;;  %v1512_v38 = vcombine.high %v1510_v45, %v1510_v45 }
 0x2f1   : > { %v2401_v17 = vrot.slane %v2400_v19, 4  ;;  %v2407_v18 = vsel %vm1811_vm2, %v1511_v23, -inf  ;;  %v2743_v3 = vmax.f32 %v2287_v37, %v2343_v63  ;;  %v7236_v49 = vmax.f32 %v5782_v24, %v5845_v50 }
 0x2f2   : > { %v4469_v9 = vadd.f32 %v7235_v14, %v2741_v5  ;;  %v2408_v54 = vrot.slane %v2407_v18, 4  ;;  %v2414_v48 = vsel %vm1811_vm2, %v1510_v45, -inf  ;;  %v2421_v39 = vsel %vm1811_vm2, %v1512_v38, -inf }
 0x2f3   : > { %v4470_v41 = vadd.f32 %v7236_v49, %v2742_v42  ;;  %v2402_v2 = vmax.f32 %v2400_v19, %v2401_v17  ;;  %v2415_v4 = vrot.slane %v2414_v48, 4  ;;  %v7237_v20 = vmax.f32 %v5788_v30, %v5851_v52  ;;  %v7239_v30 = vld [vmem:[#allocation84_spill] sm:$0xff]  ;;  %v7244_v42 = vld [vmem:[#allocation99_spill] sm:$0xff] }
 0x2f4   : > { %v4599_v13 = vsel %vm4564_vm8, %v4469_v9, %v4468_v8  ;;  %v2409_v37 = vmax.f32 %v2407_v18, %v2408_v54  ;;  %v2422_v15 = vrot.slane %v2421_v39, 4  ;;  %v928_v22 = vmul.f32 0.1, %v818_v29 }
 0x2f5   : > { %v4471_v47 = vadd.f32 %v7237_v20, %v2743_v3  ;;  %v4600_v55 = vsel %vm4566_vm9, %v4470_v41, %v4599_v13  ;;  %v2403_v24 = vrot.slane %v2402_v2, 2  ;;  %v2416_v50 = vmax.f32 %v2414_v48, %v2415_v4  ;;  %v827_v20 = vpop.f32.mrf.mxu1 }
 0x2f6   : > { %v833_v33 = vadd.f32 %v6313_v26, %v4881_v28  ;;  %v7238_v51 = vmax.f32 %v5812_v44, %v5902_v34  ;;  %v2410_v0 = vrot.slane %v2409_v37, 2  ;;  %v2423_v43 = vmax.f32 %v2421_v39, %v2422_v15 }
 0x2f7   : > { %v4601_v46 = vsel %vm4568_vm10, %v4471_v47, %v4600_v55  ;;  %v7240_v52 = vmax.f32 %v5820_v32, %v7239_v30  ;;  %v2404_v31 = vmax.f32 %v2402_v2, %v2403_v24  ;;  %v960_v12 = vsel %vm896_vm0, %v818_v29, %v928_v22 }
 0x2f8   : > { %v4473_v10 = vadd.f32 %v7238_v51, %v2745_v59  ;;  %v4602_v25 = vsel %vm4570_vm11, %v4472_v1, %v4601_v46  ;;  %v7243_v58 = vmax.f32 %v7241_v35, %v7242_v61  ;;  %v2417_v34 = vrot.slane %v2416_v50, 2 }
 0x2f9   : > { %v4474_v7 = vadd.f32 %v7240_v52, %v2746_v62  ;;  %v1479_v59 = vcombine.high %v960_v12, %v960_v12  ;;  %v2411_v6 = vmax.f32 %v2409_v37, %v2410_v0  ;;  %v1486_v32 = vrot.slane %v960_v12, %v5306_v11 }
 0x2fa   : > { %v4475_v36 = vadd.f32 %v7243_v58, %v2747_v21  ;;  %v4603_v44 = vsel %vm4572_vm12, %v4473_v10, %v4602_v25  ;;  %v931_v62 = vmul.f32 0.1, %v833_v33  ;;  %v2424_v8 = vrot.slane %v2423_v43, 2 }
 0x2fb   : > { %v4604_v5 = vsel %vm4574_vm13, %v4474_v7, %v4603_v44  ;;  %v1493_v45 = vrot.slane %v1479_v59, %v5306_v11  ;;  %vm899_vm1 = vcmp.gt.f32.partialorder %v833_v33, 0.0  ;;  %v4418_v29 = vmax.f32 %v5982_v16, %v6452_v40 }
 0x2fc   : > { %v4605_v1 = vsel %vm4576_vm14, %v4475_v36, %v4604_v5  ;;  %v2405_v21 = vrot.slane %v2404_v31, 1  ;;  %v1494_v23 = vcombine.high %v1486_v32, %v1486_v32  ;;  %v2372_v63 = vsel %vm1811_vm2, %v1486_v32, -inf }
 0x2fd   : > { %4639 = vst [vmem:[%s6151_s6 + $0x20] sm:$0xff] %v4605_v1  ;;  %v4419_v19 = vmax.f32 %v7244_v42, %v6458_v53  ;;  %v2418_v14 = vmax.f32 %v2416_v50, %v2417_v34  ;;  %v1495_v9 = vcombine.high %v1493_v45, %v1493_v45  ;;  %v2373_v38 = vrot.slane %v2372_v63, 4 }
 0x2fe   : > { %v2412_v17 = vrot.slane %v2411_v6, 1  ;;  %v2379_v18 = vsel %vm1811_vm2, %v1494_v23, -inf  ;;  %v2386_v3 = vsel %vm1811_vm2, %v1493_v45, -inf  ;;  %v963_v49 = vsel %vm899_vm1, %v833_v33, %v931_v62  ;;  %v4884_v45 = vpop.f32.mrf.mxu1 }
 0x2ff   : > { %v2425_v41 = vmax.f32 %v2423_v43, %v2424_v8  ;;  %v2374_v54 = vmax.f32 %v2372_v63, %v2373_v38  ;;  %v2380_v48 = vrot.slane %v2379_v18, 4  ;;  %v2387_v28 = vrot.slane %v2386_v3, 4 }
 0x300   : > { %v6567_v13 = vmax.f32 %v2404_v31, %v2405_v21  ;;  %v2393_v2 = vsel %vm1811_vm2, %v1495_v9, -inf  ;;  %v1530_v4 = vcombine.high %v963_v49, %v963_v49  ;;  %v1537_v39 = vrot.slane %v963_v49, %v5306_v11 }
 0x301   : > { %v2375_v47 = vrot.slane %v2374_v54, 2  ;;  %v2381_v55 = vmax.f32 %v2379_v18, %v2380_v48  ;;  %v2388_v37 = vmax.f32 %v2386_v3, %v2387_v28  ;;  %v2394_v15 = vrot.slane %v2393_v2, 4 }
 0x302   : > { %v2419_v24 = vrot.slane %v2418_v14, 1  ;;  %v1544_v50 = vrot.slane %v1530_v4, %v5306_v11  ;;  %v1545_v22 = vcombine.high %v1537_v39, %v1537_v39  ;;  %v2456_v33 = vsel %vm1811_vm2, %v1537_v39, -inf }
 0x303   : > { %v2382_v51 = vrot.slane %v2381_v55, 2  ;;  %v2389_v10 = vrot.slane %v2388_v37, 2  ;;  %v2395_v46 = vmax.f32 %v2393_v2, %v2394_v15  ;;  %v828_v0 = vadd.f32 %v6313_v26, %v827_v20 }
 0x304   : > { %v1546_v43 = vcombine.high %v1544_v50, %v1544_v50  ;;  %v2457_v30 = vrot.slane %v2456_v33, 4  ;;  %v2463_v52 = vsel %vm1811_vm2, %v1545_v22, -inf  ;;  %v2470_v7 = vsel %vm1811_vm2, %v1544_v50, -inf }
 0x305   : > { %v6576_v25 = vmax.f32 %v2411_v6, %v2412_v17  ;;  %v2376_v31 = vmax.f32 %v2374_v54, %v2375_v47  ;;  %v2383_v12 = vmax.f32 %v2381_v55, %v2382_v51  ;;  %v2396_v35 = vrot.slane %v2395_v46, 2  ;;  %v837_v51 = vpop.f32.mrf.mxu1 }
 0x306   : > { %v2458_v61 = vmax.f32 %v2456_v33, %v2457_v30  ;;  %v2464_v58 = vrot.slane %v2463_v52, 4  ;;  %v2471_v36 = vrot.slane %v2470_v7, 4  ;;  %v2477_v44 = vsel %vm1811_vm2, %v1546_v43, -inf }
 0x307   : > { %v6579_v34 = vmax.f32 %v2418_v14, %v2419_v24  ;;  %v2426_v59 = vrot.slane %v2425_v41, 1  ;;  %v2390_v5 = vmax.f32 %v2388_v37, %v2389_v10  ;;  %vm898_vm3 = vcmp.gt.f32.partialorder %v828_v0, 0.0 }
 0x308   : > { %v2459_v32 = vrot.slane %v2458_v61, 2  ;;  %v2465_v62 = vmax.f32 %v2463_v52, %v2464_v58  ;;  %v2472_v1 = vmax.f32 %v2470_v7, %v2471_v36  ;;  %v2478_v8 = vrot.slane %v2477_v44, 4 }
 0x309   : > { %v2377_v6 = vrot.slane %v2376_v31, 1  ;;  %v2384_v21 = vrot.slane %v2383_v12, 1  ;;  %v2397_v23 = vmax.f32 %v2395_v46, %v2396_v35  ;;  %v930_v63 = vmul.f32 0.1, %v828_v0 }
 0x30a   : > { %v2460_v9 = vmax.f32 %v2458_v61, %v2459_v32  ;;  %v2466_v38 = vrot.slane %v2465_v62, 2  ;;  %v2473_v17 = vrot.slane %v2472_v1, 2  ;;  %v2479_v18 = vmax.f32 %v2477_v44, %v2478_v8 }
 0x30b   : > { %v6581_v3 = vmax.f32 %v2425_v41, %v2426_v59  ;;  %v2391_v14 = vrot.slane %v2390_v5, 1  ;;  %v962_v49 = vsel %vm898_vm3, %v828_v0, %v930_v63  ;;  %v843_v54 = vadd.f32 %v6313_v26, %v4884_v45 }
 0x30c   : > { %v2461_v48 = vrot.slane %v2460_v9, 1  ;;  %v2467_v28 = vmax.f32 %v2465_v62, %v2466_v38  ;;  %v2474_v2 = vmax.f32 %v2472_v1, %v2473_v17  ;;  %v2480_v4 = vrot.slane %v2479_v18, 2 }
 0x30d   : > { %v6585_v39 = vmax.f32 %v2376_v31, %v2377_v6  ;;  %v6587_v20 = vmax.f32 %v2383_v12, %v2384_v21  ;;  %v1513_v47 = vcombine.high %v962_v49, %v962_v49  ;;  %v1520_v55 = vrot.slane %v962_v49, %v5306_v11 }
 0x30e   : > { %v2398_v37 = vrot.slane %v2397_v23, 1  ;;  %v2468_v15 = vrot.slane %v2467_v28, 1  ;;  %v2481_v41 = vmax.f32 %v2479_v18, %v2480_v4  ;;  %v933_v24 = vmul.f32 0.1, %v843_v54 }
 0x30f   : > { %v1527_v50 = vrot.slane %v1513_v47, %v5306_v11  ;;  %v1528_v22 = vcombine.high %v1520_v55, %v1520_v55  ;;  %v2428_v33 = vsel %vm1811_vm2, %v1520_v55, -inf  ;;  %vm901_vm4 = vcmp.gt.f32.partialorder %v843_v54, 0.0 }
 0x310   : > { %v6592_v10 = vmax.f32 %v2390_v5, %v2391_v14  ;;  %v6594_v46 = vmax.f32 %v2460_v9, %v2461_v48  ;;  %v2475_v0 = vrot.slane %v2474_v2, 1  ;;  %v2482_v43 = vrot.slane %v2481_v41, 1 }
 0x311   : > { %v1529_v30 = vcombine.high %v1527_v50, %v1527_v50  ;;  %v2429_v52 = vrot.slane %v2428_v33, 4  ;;  %v2435_v7 = vsel %vm1811_vm2, %v1528_v22, -inf  ;;  %v2442_v31 = vsel %vm1811_vm2, %v1527_v50, -inf }
 0x312   : > { %v6598_v12 = vmax.f32 %v2397_v23, %v2398_v37  ;;  %v6600_v35 = vmax.f32 %v2467_v28, %v2468_v15  ;;  %v965_v61 = vsel %vm901_vm4, %v843_v54, %v933_v24  ;;  %v838_v58 = vadd.f32 %v6313_v26, %v837_v51 }
 0x313   : > { %v2430_v36 = vmax.f32 %v2428_v33, %v2429_v52  ;;  %v2436_v44 = vrot.slane %v2435_v7, 4  ;;  %v2443_v59 = vrot.slane %v2442_v31, 4  ;;  %v2449_v5 = vsel %vm1811_vm2, %v1529_v30, -inf }
 0x314   : > { %v6604_v32 = vmax.f32 %v2474_v2, %v2475_v0  ;;  %v6606_v62 = vmax.f32 %v2481_v41, %v2482_v43  ;;  %v2752_v1 = vmax.f32 %v6567_v13, %v6594_v46  ;;  %v2450_v8 = vrot.slane %v2449_v5, 4 }
 0x315   : > { %v2431_v45 = vrot.slane %v2430_v36, 2  ;;  %v2437_v6 = vmax.f32 %v2435_v7, %v2436_v44  ;;  %v2444_v21 = vmax.f32 %v2442_v31, %v2443_v59  ;;  %v1564_v23 = vcombine.high %v965_v61, %v965_v61 }
 0x316   : > { %v2753_v26 = vmax.f32 %v6576_v25, %v6600_v35  ;;  %v2451_v63 = vmax.f32 %v2449_v5, %v2450_v8  ;;  %v1571_v9 = vrot.slane %v965_v61, %v5306_v11  ;;  %vm900_vm5 = vcmp.gt.f32.partialorder %v838_v58, 0.0 }
 0x317   : > { %v2432_v38 = vmax.f32 %v2430_v36, %v2431_v45  ;;  %v2438_v17 = vrot.slane %v2437_v6, 2  ;;  %v2445_v18 = vrot.slane %v2444_v21, 2  ;;  %v1578_v14 = vrot.slane %v1564_v23, %v5306_v11 }
 0x318   : > { %v2452_v49 = vrot.slane %v2451_v63, 2  ;;  %v1579_v54 = vcombine.high %v1571_v9, %v1571_v9  ;;  %v2512_v13 = vsel %vm1811_vm2, %v1571_v9, -inf  ;;  %v932_v48 = vmul.f32 0.1, %v838_v58 }
 0x319   : > { %v2433_v28 = vrot.slane %v2432_v38, 1  ;;  %v2439_v2 = vmax.f32 %v2437_v6, %v2438_v17  ;;  %v2446_v4 = vmax.f32 %v2444_v21, %v2445_v18  ;;  %v1580_v47 = vcombine.high %v1578_v14, %v1578_v14  ;;  %v7245_v6 = vld [vmem:[#allocation90_spill] sm:$0xff]  ;;  %v7246_v21 = vld [vmem:[#allocation103_spill] sm:$0xff]  ;;  %v7249_v17 = vld [vmem:[#allocation104_spill] sm:$0xff] }
 0x31a   : > { %v2453_v55 = vmax.f32 %v2451_v63, %v2452_v49  ;;  %v2513_v25 = vrot.slane %v2512_v13, 4  ;;  %v2519_v37 = vsel %vm1811_vm2, %v1579_v54, -inf  ;;  %v2526_v15 = vsel %vm1811_vm2, %v1578_v14, -inf  ;;  %v7255_v54 = vld [vmem:[#allocation93_spill] sm:$0xff] }
 0x31b   : > { %v2434_v41 = vmax.f32 %v2432_v38, %v2433_v28  ;;  %v2440_v24 = vrot.slane %v2439_v2, 1  ;;  %v2447_v50 = vrot.slane %v2446_v4, 1  ;;  %v2520_v22 = vrot.slane %v2519_v37, 4  ;;  %v7248_v38 = vld [vmem:[#allocation92_spill] sm:$0xff] }
 0x31c   : > { %v2454_v33 = vrot.slane %v2453_v55, 1  ;;  %v2514_v51 = vmax.f32 %v2512_v13, %v2513_v25  ;;  %v2527_v46 = vrot.slane %v2526_v15, 4  ;;  %v2533_v0 = vsel %vm1811_vm2, %v1580_v47, -inf  ;;  %v7256_v13 = vld [vmem:[#allocation106_spill] sm:$0xff] }
 0x31d   : > { %v2441_v43 = vmax.f32 %v2439_v2, %v2440_v24  ;;  %v2448_v30 = vmax.f32 %v2446_v4, %v2447_v50  ;;  %v2748_v52 = vmax.f32 %v6585_v39, %v2434_v41  ;;  %v2521_v7 = vmax.f32 %v2519_v37, %v2520_v22 }
 0x31e   : > { %v2455_v31 = vmax.f32 %v2453_v55, %v2454_v33  ;;  %v2515_v35 = vrot.slane %v2514_v51, 2  ;;  %v2528_v61 = vmax.f32 %v2526_v15, %v2527_v46  ;;  %v2534_v36 = vrot.slane %v2533_v0, 4  ;;  %v4887_v55 = vpop.f32.mrf.mxu1 }
 0x31f   : > { %v2754_v44 = vmax.f32 %v6579_v34, %v6604_v32  ;;  %v2755_v59 = vmax.f32 %v6581_v3, %v6606_v62  ;;  %v2749_v5 = vmax.f32 %v6587_v20, %v2441_v43  ;;  %v2750_v8 = vmax.f32 %v6592_v10, %v2448_v30  ;;  %v7251_v34 = vld [vmem:[#allocation91_spill] sm:$0xff]  ;;  %v7252_v32 = vld [vmem:[#allocation105_spill] sm:$0xff] }
 0x320   : > { %v2751_v45 = vmax.f32 %v6598_v12, %v2455_v31  ;;  %v7247_v39 = vmax.f32 %v7245_v6, %v7246_v21  ;;  %v2522_v63 = vrot.slane %v2521_v7, 2  ;;  %v2535_v9 = vmax.f32 %v2533_v0, %v2534_v36  ;;  %v847_v40 = vpop.f32.mrf.mxu1  ;;  %v6668_v36 = vld [vmem:[%s6917_s3] ss:$0 sm:$0xff] }
 0x321   : > { %v7250_v18 = vmax.f32 %v7248_v38, %v7249_v17  ;;  %v7253_v49 = vmax.f32 %v7251_v34, %v7252_v32  ;;  %v2516_v62 = vmax.f32 %v2514_v51, %v2515_v35  ;;  %v964_v20 = vsel %vm900_vm5, %v838_v58, %v932_v48 }
 0x322   : > { %v4476_v23 = vadd.f32 %v7247_v39, %v2748_v52  ;;  %v7254_v10 = vmax.f32 %v5978_v60, %v6057_v57  ;;  %v7257_v28 = vmax.f32 %v7255_v54, %v7256_v13  ;;  %v2529_v4 = vrot.slane %v2528_v61, 2 }
 0x323   : > { %v4477_v14 = vadd.f32 %v7250_v18, %v2749_v5  ;;  %v4478_v3 = vadd.f32 %v7253_v49, %v2750_v8  ;;  %v2536_v47 = vrot.slane %v2535_v9, 2  ;;  %v7258_v25 = vmax.f32 %v5980_v27, %v6359_v56  ;;  %v4890_v5 = vpop.f32.mrf.mxu1 }
 0x324   : > { %v4480_v12 = vadd.f32 %v7254_v10, %v2752_v1  ;;  %v4479_v2 = vadd.f32 %v7257_v28, %v2751_v45  ;;  %v1547_v41 = vcombine.high %v964_v20, %v964_v20  ;;  %v1554_v58 = vrot.slane %v964_v20, %v5306_v11 }
 0x325   : > { %v4481_v37 = vadd.f32 %v7258_v25, %v2753_v26  ;;  %v4606_v15 = vsel %vm4564_vm8, %v4477_v14, %v4476_v23  ;;  %v4482_v60 = vadd.f32 %v4418_v29, %v2754_v44  ;;  %v4483_v57 = vadd.f32 %v4419_v19, %v2755_v59  ;;  %v857_v20 = vpop.f32.mrf.mxu1 }
 0x326   : > { %v4607_v1 = vsel %vm4566_vm9, %v4478_v3, %v4606_v15  ;;  %v2523_v48 = vmax.f32 %v2521_v7, %v2522_v63  ;;  %v2517_v27 = vrot.slane %v2516_v62, 1  ;;  %v1561_v56 = vrot.slane %v1547_v41, %v5306_v11 }
 0x327   : > { %v4608_v24 = vsel %vm4568_vm10, %v4479_v2, %v4607_v1  ;;  %v1562_v26 = vcombine.high %v1554_v58, %v1554_v58  ;;  %v2530_v22 = vmax.f32 %v2528_v61, %v2529_v4  ;;  %v2537_v33 = vmax.f32 %v2535_v9, %v2536_v47  ;;  %v7259_v9 = vld [vmem:[#allocation107_spill] sm:$0xff] }
 0x328   : > { %v4609_v50 = vsel %vm4570_vm11, %v4480_v12, %v4608_v24  ;;  %v2484_v16 = vsel %vm1811_vm2, %v1554_v58, -inf  ;;  %v1563_v29 = vcombine.high %v1561_v56, %v1561_v56  ;;  %v2524_v46 = vrot.slane %v2523_v48, 1 }
 0x329   : > { %v4610_v53 = vsel %vm4572_vm12, %v4481_v37, %v4609_v50  ;;  %v2485_v42 = vrot.slane %v2484_v16, 4  ;;  %v2491_v19 = vsel %vm1811_vm2, %v1562_v26, -inf  ;;  %v2498_v43 = vsel %vm1811_vm2, %v1561_v56, -inf }
 0x32a   : > { %v4611_v51 = vsel %vm4574_vm13, %v4482_v60, %v4610_v53  ;;  %v2492_v0 = vrot.slane %v2491_v19, 4  ;;  %v2499_v7 = vrot.slane %v2498_v43, 4  ;;  %v2505_v31 = vsel %vm1811_vm2, %v1563_v29, -inf }
 0x32b   : > { %v4612_v30 = vsel %vm4576_vm14, %v4483_v57, %v4611_v51  ;;  %v2486_v52 = vmax.f32 %v2484_v16, %v2485_v42  ;;  %v2506_v61 = vrot.slane %v2505_v31, 4  ;;  %v853_v44 = vadd.f32 %v6668_v36, %v4887_v55 }
 0x32c   : > { %4640 = vst [vmem:[%s6151_s6 + $0x28] sm:$0xff] %v4612_v30  ;;  %v2493_v35 = vmax.f32 %v2491_v19, %v2492_v0  ;;  %v848_v59 = vadd.f32 %v6668_v36, %v847_v40  ;;  %v2531_v8 = vrot.slane %v2530_v22, 1  ;;  %v2538_v45 = vrot.slane %v2537_v33, 1 }
 0x32d   : > { %v2487_v6 = vrot.slane %v2486_v52, 2  ;;  %v2500_v21 = vmax.f32 %v2498_v43, %v2499_v7  ;;  %v2507_v23 = vmax.f32 %v2505_v31, %v2506_v61  ;;  %vm903_vm6 = vcmp.gt.f32.partialorder %v853_v44, 0.0 }
 0x32e   : > { %v2494_v39 = vrot.slane %v2493_v35, 2  ;;  %v935_v63 = vmul.f32 0.1, %v853_v44  ;;  %v7260_v38 = vrot.slane %v7259_v9, 2  ;;  %vm902_vm7 = vcmp.gt.f32.partialorder %v848_v59, 0.0 }
 0x32f   : > { %v6677_v18 = vmax.f32 %v2486_v52, %v2487_v6  ;;  %v934_v14 = vmul.f32 0.1, %v848_v59  ;;  %v6679_v34 = vmax.f32 %v2516_v62, %v2517_v27  ;;  %v2501_v49 = vrot.slane %v2500_v21, 2 }
 0x330   : > { %v6675_v17 = vmax.f32 %v7259_v9, %v7260_v38  ;;  %v6681_v32 = vmax.f32 %v2493_v35, %v2494_v39  ;;  %v967_v3 = vsel %vm903_vm6, %v853_v44, %v935_v63  ;;  %v6683_v10 = vmax.f32 %v2523_v48, %v2524_v46 }
 0x331   : > { %v2508_v12 = vrot.slane %v2507_v23, 2  ;;  %v1598_v54 = vcombine.high %v967_v3, %v967_v3  ;;  %v1605_v13 = vrot.slane %v967_v3, %v5306_v11  ;;  %v6686_v28 = vmax.f32 %v2530_v22, %v2531_v8 }
 0x332   : > { %v6688_v2 = vmax.f32 %v2537_v33, %v2538_v45  ;;  %v966_v4 = vsel %vm902_vm7, %v848_v59, %v934_v14  ;;  %v6691_v47 = vadd.f32 %v6668_v36, %v4890_v5  ;;  %v2489_v62 = vrot.slane %v6677_v18, 1 }
 0x333   : > { %v1612_v55 = vrot.slane %v1598_v54, %v5306_v11  ;;  %v1613_v25 = vcombine.high %v1605_v13, %v1605_v13  ;;  %v6696_v37 = vadd.f32 %v6668_v36, %v857_v20  ;;  %v2496_v15 = vrot.slane %v6681_v32, 1 }
 0x334   : > { %v2502_v41 = vmax.f32 %v2500_v21, %v2501_v49  ;;  %v2568_v58 = vsel %vm1811_vm2, %v1605_v13, -inf  ;;  %v1581_v60 = vcombine.high %v966_v4, %v966_v4  ;;  %v2509_v57 = vmax.f32 %v2507_v23, %v2508_v12 }
 0x335   : > { %v1614_v1 = vcombine.high %v1612_v55, %v1612_v55  ;;  %v2569_v48 = vrot.slane %v2568_v58, 4  ;;  %v2575_v24 = vsel %vm1811_vm2, %v1613_v25, -inf  ;;  %v2582_v56 = vsel %vm1811_vm2, %v1612_v55, -inf }
 0x336   : > { %v2576_v27 = vrot.slane %v2575_v24, 4  ;;  %v1588_v26 = vrot.slane %v966_v4, %v5306_v11  ;;  %v937_v50 = vmul.f32 0.1, %v6691_v47  ;;  %v2583_v33 = vrot.slane %v2582_v56, 4 }
 0x337   : > { %v2570_v22 = vmax.f32 %v2568_v58, %v2569_v48  ;;  %v2589_v16 = vsel %vm1811_vm2, %v1614_v1, -inf  ;;  %v1595_v40 = vrot.slane %v1581_v60, %v5306_v11  ;;  %vm905_vm15 = vcmp.gt.f32.partialorder %v6691_v47, 0.0 }
 0x338   : > { %v2577_v53 = vmax.f32 %v2575_v24, %v2576_v27  ;;  %v2590_v29 = vrot.slane %v2589_v16, 4  ;;  %v1596_v42 = vcombine.high %v1588_v26, %v1588_v26  ;;  %v2540_v19 = vsel %vm1811_vm2, %v1588_v26, -inf }
 0x339   : > { %v2571_v51 = vrot.slane %v2570_v22, 2  ;;  %v2584_v46 = vmax.f32 %v2582_v56, %v2583_v33  ;;  %v1597_v0 = vcombine.high %v1595_v40, %v1595_v40  ;;  %v2541_v43 = vrot.slane %v2540_v19, 4 }
 0x33a   : > { %v2578_v30 = vrot.slane %v2577_v53, 2  ;;  %v2591_v52 = vmax.f32 %v2589_v16, %v2590_v29  ;;  %v2547_v7 = vsel %vm1811_vm2, %v1596_v42, -inf  ;;  %v2554_v31 = vsel %vm1811_vm2, %v1595_v40, -inf }
 0x33b   : > { %v2572_v35 = vmax.f32 %v2570_v22, %v2571_v51  ;;  %v2585_v61 = vrot.slane %v2584_v46, 2  ;;  %v2542_v44 = vmax.f32 %v2540_v19, %v2541_v43  ;;  %v2548_v59 = vrot.slane %v2547_v7, 4 }
 0x33c   : > { %v2579_v5 = vmax.f32 %v2577_v53, %v2578_v30  ;;  %v2592_v8 = vrot.slane %v2591_v52, 2  ;;  %v2555_v45 = vrot.slane %v2554_v31, 4  ;;  %v2561_v6 = vsel %vm1811_vm2, %v1597_v0, -inf }
 0x33d   : > { %v2573_v21 = vrot.slane %v2572_v35, 1  ;;  %v2586_v39 = vmax.f32 %v2584_v46, %v2585_v61  ;;  %v2543_v23 = vrot.slane %v2542_v44, 2  ;;  %v2549_v63 = vmax.f32 %v2547_v7, %v2548_v59 }
 0x33e   : > { %v2580_v9 = vrot.slane %v2579_v5, 1  ;;  %v2593_v38 = vmax.f32 %v2591_v52, %v2592_v8  ;;  %v2556_v14 = vmax.f32 %v2554_v31, %v2555_v45  ;;  %v2562_v49 = vrot.slane %v2561_v6, 4  ;;  %v7262_v52 = vld [vmem:[#allocation75_spill] sm:$0xff] }
 0x33f   : > { %v2503_v3 = vrot.slane %v2502_v41, 1  ;;  %v2587_v20 = vrot.slane %v2586_v39, 1  ;;  %v2544_v12 = vmax.f32 %v2542_v44, %v2543_v23  ;;  %v2550_v54 = vrot.slane %v2549_v63, 2 }
 0x340   : > { %v2510_v13 = vrot.slane %v2509_v57, 1  ;;  %v2574_v4 = vmax.f32 %v2572_v35, %v2573_v21  ;;  %v2557_v55 = vrot.slane %v2556_v14, 2  ;;  %v2563_v25 = vmax.f32 %v2561_v6, %v2562_v49  ;;  %v7267_v6 = vld [vmem:[#allocation69_spill] sm:$0xff]  ;;  %v7268_v21 = vld [vmem:[#allocation78_spill] sm:$0xff] }
 0x341   : > { %v2490_v58 = vmax.f32 %v6677_v18, %v2489_v62  ;;  %v2594_v60 = vrot.slane %v2593_v38, 1  ;;  %v2545_v1 = vrot.slane %v2544_v12, 1  ;;  %v2551_v48 = vmax.f32 %v2549_v63, %v2550_v54 }
 0x342   : > { %v2497_v24 = vmax.f32 %v6681_v32, %v2496_v15  ;;  %v2581_v27 = vmax.f32 %v2579_v5, %v2580_v9  ;;  %v2558_v56 = vmax.f32 %v2556_v14, %v2557_v55  ;;  %v2564_v26 = vrot.slane %v2563_v25, 2 }
 0x343   : > { %v2504_v22 = vmax.f32 %v2502_v41, %v2503_v3  ;;  %v2588_v33 = vmax.f32 %v2586_v39, %v2587_v20  ;;  %v2546_v16 = vmax.f32 %v2544_v12, %v2545_v1  ;;  %v2552_v40 = vrot.slane %v2551_v48, 1  ;;  %v7270_v20 = vld [vmem:[#allocation70_spill] sm:$0xff]  ;;  %v7271_v12 = vld [vmem:[#allocation79_spill] sm:$0xff] }
 0x344   : > { %v2511_v53 = vmax.f32 %v2509_v57, %v2510_v13  ;;  %v2760_v29 = vmax.f32 %v6679_v34, %v2574_v4  ;;  %v2559_v42 = vrot.slane %v2558_v56, 1  ;;  %v2565_v19 = vmax.f32 %v2563_v25, %v2564_v26  ;;  %v7261_v57 = vld [vmem:[#allocation67_spill] sm:$0xff]  ;;  %v7277_v26 = vld [vmem:[#allocation72_spill] sm:$0xff] }
 0x345   : > { %v2595_v51 = vmax.f32 %v2593_v38, %v2594_v60  ;;  %v2553_v46 = vmax.f32 %v2551_v48, %v2552_v40  ;;  %v2756_v18 = vmax.f32 %v2490_v58, %v2546_v16  ;;  %v969_v62 = vsel %vm905_vm15, %v6691_v47, %v937_v50  ;;  %v7264_v50 = vld [vmem:[#allocation68_spill] sm:$0xff]  ;;  %v7273_v58 = vld [vmem:[#allocation110_spill] sm:$0xff]  ;;  %v7274_v1 = vld [vmem:[#allocation71_spill] sm:$0xff] }
 0x346   : > { %v2761_v32 = vmax.f32 %v6683_v10, %v2581_v27  ;;  %v2560_v15 = vmax.f32 %v2558_v56, %v2559_v42  ;;  %v2566_v0 = vrot.slane %v2565_v19, 1  ;;  %v1632_v41 = vcombine.high %v969_v62, %v969_v62  ;;  %v7265_v10 = vld [vmem:[#allocation77_spill] sm:$0xff]  ;;  %v7275_v48 = vld [vmem:[#allocation80_spill] sm:$0xff] }
 0x347   : > { %v2762_v43 = vmax.f32 %v6686_v28, %v2588_v33  ;;  %v2757_v30 = vmax.f32 %v2497_v24, %v2553_v46  ;;  %v7263_v34 = vmax.f32 %v7261_v57, %v7262_v52  ;;  %v1639_v31 = vrot.slane %v969_v62, %v5306_v11 }
 0x348   : > { %v2567_v35 = vmax.f32 %v2565_v19, %v2566_v0  ;;  %v2758_v61 = vmax.f32 %v2504_v22, %v2560_v15  ;;  %v1646_v44 = vrot.slane %v1632_v41, %v5306_v11  ;;  %v936_v47 = vmul.f32 0.1, %v6696_v37  ;;  %v7278_v22 = vld [vmem:[#allocation81_spill] sm:$0xff]  ;;  %v7283_v15 = vld [vmem:[#allocation108_spill] sm:$0xff] }
 0x349   : > { %v4484_v7 = vadd.f32 %v7263_v34, %v2756_v18  ;;  %v7266_v59 = vmax.f32 %v7264_v50, %v7265_v10  ;;  %v1647_v8 = vcombine.high %v1639_v31, %v1639_v31  ;;  %v2624_v28 = vsel %vm1811_vm2, %v1639_v31, -inf  ;;  %v7280_v19 = vld [vmem:[#allocation73_spill] sm:$0xff]  ;;  %v4893_v31 = vpop.f32.mrf.mxu1 }
 0x34a   : > { %vm904_vm0 = vcmp.gt.f32.partialorder %v6696_v37, 0.0  ;;  %v2759_v45 = vmax.f32 %v2511_v53, %v2567_v35  ;;  %v7269_v39 = vmax.f32 %v7267_v6, %v7268_v21  ;;  %v1648_v63 = vcombine.high %v1646_v44, %v1646_v44  ;;  %v7288_v35 = vld [vmem:[#allocation98_spill] sm:$0xff]  ;;  %v7290_v10 = vld [vmem:[#allocation109_spill] sm:$0xff] }
 0x34b   : > { %v4485_v5 = vadd.f32 %v7266_v59, %v2757_v30  ;;  %v2625_v9 = vrot.slane %v2624_v28, 4  ;;  %v2763_v38 = vmax.f32 %v6688_v2, %v2595_v51  ;;  %v2631_v49 = vsel %vm1811_vm2, %v1647_v8, -inf  ;;  %v7281_v51 = vld [vmem:[#allocation82_spill] sm:$0xff] }
 0x34c   : > { %v4486_v23 = vadd.f32 %v7269_v39, %v2758_v61  ;;  %v2638_v3 = vsel %vm1811_vm2, %v1646_v44, -inf  ;;  %v7272_v54 = vmax.f32 %v7270_v20, %v7271_v12  ;;  %v2632_v55 = vrot.slane %v2631_v49, 4  ;;  %v7285_v30 = vld [vmem:[#allocation74_spill] sm:$0xff]  ;;  %v7294_v20 = vld [vmem:[#allocation87_spill] sm:$0xff] }
 0x34d   : > { %v4613_v14 = vsel %vm4564_vm8, %v4485_v5, %v4484_v7  ;;  %v968_v25 = vsel %vm904_vm0, %v6696_v37, %v936_v47  ;;  %v4368_v60 = vrot.slane %v7273_v58, 2  ;;  %v7276_v2 = vmax.f32 %v7274_v1, %v7275_v48  ;;  %v7292_v6 = vld [vmem:[#allocation86_spill] sm:$0xff] }
 0x34e   : > { %v4487_v13 = vadd.f32 %v7272_v54, %v2759_v45  ;;  %v4614_v4 = vsel %vm4566_vm9, %v4486_v23, %v4613_v14  ;;  %v2639_v27 = vrot.slane %v2638_v3, 4  ;;  %v2645_v56 = vsel %vm1811_vm2, %v1648_v63, -inf  ;;  %v7291_v45 = vld [vmem:[#allocation100_spill] sm:$0xff]  ;;  %v7295_v54 = vld [vmem:[#allocation102_spill] sm:$0xff] }
 0x34f   : > { %v4488_v24 = vadd.f32 %v7276_v2, %v2760_v29  ;;  %v7279_v33 = vmax.f32 %v7277_v26, %v7278_v22  ;;  %v2626_v53 = vmax.f32 %v2624_v28, %v2625_v9  ;;  %v2646_v42 = vrot.slane %v2645_v56, 4 }
 0x350   : > { %v4615_v40 = vsel %vm4568_vm10, %v4487_v13, %v4614_v4  ;;  %v7282_v37 = vmax.f32 %v7280_v19, %v7281_v51  ;;  %v1615_v62 = vcombine.high %v968_v25, %v968_v25  ;;  %v1622_v29 = vrot.slane %v968_v25, %v5306_v11  ;;  %v7296_v13 = vld [vmem:[#allocation88_spill] sm:$0xff] }
 0x351   : > { %v4489_v16 = vadd.f32 %v7279_v33, %v2761_v32  ;;  %v4616_v18 = vsel %vm4570_vm11, %v4488_v24, %v4615_v40  ;;  %v7284_v0 = vrot.slane %v7283_v15, 2  ;;  %v7286_v32 = vld [vmem:[#allocation83_spill] sm:$0xff]  ;;  %v2633_v7 = vmax.f32 %v2631_v49, %v2632_v55  ;;  %v867_v24 = vpop.f32.mrf.mxu1 }
 0x352   : > { %v4490_v46 = vadd.f32 %v7282_v37, %v2762_v43  ;;  %v7287_v57 = vmax.f32 %v7285_v30, %v7286_v32  ;;  %v7289_v43 = vrot.slane %v7288_v35, 1  ;;  %v2640_v47 = vmax.f32 %v2638_v3, %v2639_v27  ;;  %v7293_v3 = vld [vmem:[#allocation101_spill] sm:$0xff] }
 0x353   : > { %v4362_v41 = vmax.f32 %v7283_v15, %v7284_v0  ;;  %v4617_v34 = vsel %vm4572_vm12, %v4489_v16, %v4616_v18  ;;  %v2647_v50 = vmax.f32 %v2645_v56, %v2646_v42  ;;  %v4349_v59 = vrot.slane %v7290_v10, 1 }
 0x354   : > { %v4491_v52 = vadd.f32 %v7287_v57, %v2763_v38  ;;  %v6766_v61 = vmax.f32 %v7288_v35, %v7289_v43  ;;  %v4618_v44 = vsel %vm4574_vm13, %v4490_v46, %v4617_v34  ;;  %v4369_v5 = vmax.f32 %v7273_v58, %v4368_v60  ;;  %v7297_v58 = vld [vmem:[#allocation89_spill] sm:$0xff] }
 0x355   : > { %v2627_v28 = vrot.slane %v2626_v53, 2  ;;  %v4428_v21 = vmax.f32 %v7292_v6, %v7291_v45  ;;  %v1629_v39 = vrot.slane %v1615_v62, %v5306_v11  ;;  %v1630_v23 = vcombine.high %v1622_v29, %v1622_v29 }
 0x356   : > { %v4619_v8 = vsel %vm4576_vm14, %v4491_v52, %v4618_v44  ;;  %v873_v63 = vadd.f32 %v6668_v36, %v4893_v31  ;;  %v4356_v9 = vrot.slane %v6675_v17, 1  ;;  %v4363_v38 = vrot.slane %v4362_v41, 1 }
 0x357   : > { %4641 = vst [vmem:[%s6151_s6 + $0x30] sm:$0xff] %v4619_v8  ;;  %v2634_v14 = vrot.slane %v2633_v7, 2  ;;  %v2596_v49 = vsel %vm1811_vm2, %v1622_v29, -inf  ;;  %v4429_v12 = vmax.f32 %v7294_v20, %v7293_v3  ;;  %v4430_v4 = vmax.f32 %v7296_v13, %v7295_v54  ;;  %v7299_v3 = vld [vmem:[#allocation96_spill] sm:$0xff] }
 0x358   : > { %v2641_v55 = vrot.slane %v2640_v47, 2  ;;  %v2648_v25 = vrot.slane %v2647_v50, 2  ;;  %v6786_v1 = vmax.f32 %v7290_v10, %v4349_v59  ;;  %v4370_v48 = vrot.slane %v4369_v5, 1 }
 0x359   : > { %v6788_v2 = vmax.f32 %v2626_v53, %v2627_v28  ;;  %v1631_v27 = vcombine.high %v1629_v39, %v1629_v39  ;;  %v2597_v56 = vrot.slane %v2596_v49, 4  ;;  %v2603_v26 = vsel %vm1811_vm2, %v1630_v23, -inf }
 0x35a   : > { %vm907_vm1 = vcmp.gt.f32.partialorder %v873_v63, 0.0  ;;  %v6792_v22 = vmax.f32 %v6675_v17, %v4356_v9  ;;  %v6794_v33 = vmax.f32 %v4362_v41, %v4363_v38  ;;  %v6796_v16 = vmax.f32 %v2633_v7, %v2634_v14 }
 0x35b   : > { %v939_v40 = vmul.f32 0.1, %v873_v63  ;;  %v6798_v42 = vmax.f32 %v2640_v47, %v2641_v55  ;;  %v6800_v19 = vmax.f32 %v2647_v50, %v2648_v25  ;;  %v2610_v53 = vsel %vm1811_vm2, %v1629_v39, -inf }
 0x35c   : > { %v868_v51 = vadd.f32 %v6668_v36, %v867_v24  ;;  %v6804_v37 = vmax.f32 %v4369_v5, %v4370_v48  ;;  %v2629_v46 = vrot.slane %v6788_v2, 1  ;;  %v2604_v18 = vrot.slane %v2603_v26, 4 }
 0x35d   : > { %v971_v17 = vsel %vm907_vm1, %v873_v63, %v939_v40  ;;  %v2598_v62 = vmax.f32 %v2596_v49, %v2597_v56  ;;  %v2617_v29 = vsel %vm1811_vm2, %v1631_v27, -inf  ;;  %v2636_v41 = vrot.slane %v6796_v16, 1 }
 0x35e   : > { %v1666_v15 = vcombine.high %v971_v17, %v971_v17  ;;  %v1673_v0 = vrot.slane %v971_v17, %v5306_v11  ;;  %v2611_v30 = vrot.slane %v2610_v53, 4  ;;  %vm906_vm3 = vcmp.gt.f32.partialorder %v868_v51, 0.0 }
 0x35f   : > { %v938_v32 = vmul.f32 0.1, %v868_v51  ;;  %v2643_v57 = vrot.slane %v6798_v42, 1  ;;  %v2650_v36 = vrot.slane %v6800_v19, 1  ;;  %v2605_v7 = vmax.f32 %v2603_v26, %v2604_v18 }
 0x360   : > { %v1680_v52 = vrot.slane %v1666_v15, %v5306_v11  ;;  %v1681_v34 = vcombine.high %v1673_v0, %v1673_v0  ;;  %v2618_v31 = vrot.slane %v2617_v29, 4  ;;  %v2680_v35 = vsel %vm1811_vm2, %v1673_v0, -inf }
 0x361   : > { %v970_v43 = vsel %vm906_vm3, %v868_v51, %v938_v32  ;;  %v2599_v44 = vrot.slane %v2598_v62, 2  ;;  %v2681_v50 = vrot.slane %v2680_v35, 4  ;;  %v2612_v59 = vmax.f32 %v2610_v53, %v2611_v30 }
 0x362   : > { %v1682_v47 = vcombine.high %v1680_v52, %v1680_v52  ;;  %v2687_v10 = vsel %vm1811_vm2, %v1681_v34, -inf  ;;  %v2694_v8 = vsel %vm1811_vm2, %v1680_v52, -inf  ;;  %v1649_v28 = vcombine.high %v970_v43, %v970_v43 }
 0x363   : > { %v2688_v5 = vrot.slane %v2687_v10, 4  ;;  %v2682_v39 = vmax.f32 %v2680_v35, %v2681_v50  ;;  %v2695_v23 = vrot.slane %v2694_v8, 4  ;;  %v1656_v9 = vrot.slane %v970_v43, %v5306_v11 }
 0x364   : > { %v2701_v63 = vsel %vm1811_vm2, %v1682_v47, -inf  ;;  %v2606_v38 = vrot.slane %v2605_v7, 2  ;;  %v1663_v55 = vrot.slane %v1649_v28, %v5306_v11  ;;  %v2619_v25 = vmax.f32 %v2617_v29, %v2618_v31 }
 0x365   : > { %v2689_v14 = vmax.f32 %v2687_v10, %v2688_v5  ;;  %v2702_v49 = vrot.slane %v2701_v63, 4  ;;  %v2696_v48 = vmax.f32 %v2694_v8, %v2695_v23  ;;  %v1664_v24 = vcombine.high %v1656_v9, %v1656_v9 }
 0x366   : > { %v2652_v27 = vsel %vm1811_vm2, %v1656_v9, -inf  ;;  %v2683_v56 = vrot.slane %v2682_v39, 2  ;;  %v1665_v40 = vcombine.high %v1663_v55, %v1663_v55  ;;  %v2613_v51 = vrot.slane %v2612_v59, 2 }
 0x367   : > { %v2703_v26 = vmax.f32 %v2701_v63, %v2702_v49  ;;  %v2653_v53 = vrot.slane %v2652_v27, 4  ;;  %v2690_v18 = vrot.slane %v2689_v14, 2  ;;  %v2659_v17 = vsel %vm1811_vm2, %v1664_v24, -inf }
 0x368   : > { %v2666_v15 = vsel %vm1811_vm2, %v1663_v55, -inf  ;;  %v2600_v0 = vmax.f32 %v2598_v62, %v2599_v44  ;;  %v2697_v30 = vrot.slane %v2696_v48, 2  ;;  %v2660_v52 = vrot.slane %v2659_v17, 4 }
 0x369   : > { %v2654_v32 = vmax.f32 %v2652_v27, %v2653_v53  ;;  %v2620_v11 = vrot.slane %v2619_v25, 2  ;;  %v2704_v29 = vrot.slane %v2703_v26, 2  ;;  %v2667_v34 = vrot.slane %v2666_v15, 4 }
 0x36a   : > { %v2673_v31 = vsel %vm1811_vm2, %v1665_v40, -inf  ;;  %v2607_v35 = vmax.f32 %v2605_v7, %v2606_v38  ;;  %v2684_v43 = vmax.f32 %v2682_v39, %v2683_v56  ;;  %v2661_v50 = vmax.f32 %v2659_v17, %v2660_v52 }
 0x36b   : > { %v2655_v47 = vrot.slane %v2654_v32, 2  ;;  %v2614_v10 = vmax.f32 %v2612_v59, %v2613_v51  ;;  %v2691_v5 = vmax.f32 %v2689_v14, %v2690_v18  ;;  %v2668_v8 = vmax.f32 %v2666_v15, %v2667_v34 }
 0x36c   : > { %v2674_v28 = vrot.slane %v2673_v31, 4  ;;  %v2601_v23 = vrot.slane %v2600_v0, 1  ;;  %v2698_v63 = vmax.f32 %v2696_v48, %v2697_v30  ;;  %v2662_v62 = vrot.slane %v2661_v50, 2 }
 0x36d   : > { %v2656_v9 = vmax.f32 %v2654_v32, %v2655_v47  ;;  %v2621_v44 = vmax.f32 %v2619_v25, %v2620_v11  ;;  %v2705_v49 = vmax.f32 %v2703_v26, %v2704_v29  ;;  %v2669_v55 = vrot.slane %v2668_v8, 2 }
 0x36e   : > { %v2675_v24 = vmax.f32 %v2673_v31, %v2674_v28  ;;  %v2608_v27 = vrot.slane %v2607_v35, 1  ;;  %v2685_v53 = vrot.slane %v2684_v43, 1  ;;  %v2663_v40 = vmax.f32 %v2661_v50, %v2662_v62 }
 0x36f   : > { %v2657_v60 = vrot.slane %v2656_v9, 1  ;;  %v2615_v7 = vrot.slane %v2614_v10, 1  ;;  %v2692_v39 = vrot.slane %v2691_v5, 1  ;;  %v2670_v38 = vmax.f32 %v2668_v8, %v2669_v55 }
 0x370   : > { %v2676_v56 = vrot.slane %v2675_v24, 2  ;;  %v2602_v59 = vmax.f32 %v2600_v0, %v2601_v23  ;;  %v2699_v14 = vrot.slane %v2698_v63, 1  ;;  %v2664_v18 = vrot.slane %v2663_v40, 1 }
 0x371   : > { %v2658_v51 = vmax.f32 %v2656_v9, %v2657_v60  ;;  %v2622_v17 = vrot.slane %v2621_v44, 1  ;;  %v2706_v48 = vrot.slane %v2705_v49, 1  ;;  %v2671_v15 = vrot.slane %v2670_v38, 1  ;;  %v7301_v9 = vld [vmem:[#allocation95_spill] sm:$0xff] }
 0x372   : > { %v2677_v30 = vmax.f32 %v2675_v24, %v2676_v56  ;;  %v2609_v25 = vmax.f32 %v2607_v35, %v2608_v27  ;;  %v2686_v26 = vmax.f32 %v2684_v43, %v2685_v53  ;;  %v2665_v32 = vmax.f32 %v2663_v40, %v2664_v18 }
 0x373   : > { %v2764_v52 = vmax.f32 %v2602_v59, %v2658_v51  ;;  %v2616_v11 = vmax.f32 %v2614_v10, %v2615_v7  ;;  %v2693_v29 = vmax.f32 %v2691_v5, %v2692_v39  ;;  %v2672_v34 = vmax.f32 %v2670_v38, %v2671_v15 }
 0x374   : > { %v2678_v31 = vrot.slane %v2677_v30, 1  ;;  %v2630_v47 = vmax.f32 %v6788_v2, %v2629_v46  ;;  %v2637_v60 = vmax.f32 %v6796_v16, %v2636_v41  ;;  %v2700_v0 = vmax.f32 %v2698_v63, %v2699_v14 }
 0x375   : > { %v2765_v50 = vmax.f32 %v2609_v25, %v2665_v32  ;;  %v2623_v8 = vmax.f32 %v2621_v44, %v2622_v17  ;;  %v2707_v28 = vmax.f32 %v2705_v49, %v2706_v48  ;;  %v2766_v43 = vmax.f32 %v2616_v11, %v2672_v34 }
 0x376   : > { %v2679_v35 = vmax.f32 %v2677_v30, %v2678_v31  ;;  %v2644_v10 = vmax.f32 %v6798_v42, %v2643_v57  ;;  %v2768_v5 = vmax.f32 %v2630_v47, %v2686_v26  ;;  %v4492_v2 = vadd.f32 %v4428_v21, %v2764_v52  ;;  %v7298_v57 = vld [vmem:[#allocation94_spill] sm:$0xff] }
 0x377   : > { %v4493_v16 = vadd.f32 %v4429_v12, %v2765_v50  ;;  %v2651_v46 = vmax.f32 %v6800_v19, %v2650_v36  ;;  %v2769_v41 = vmax.f32 %v2637_v60, %v2693_v29  ;;  %v4494_v42 = vadd.f32 %v4430_v4, %v2766_v43  ;;  %v7302_v4 = vld [vmem:[#allocation97_spill] sm:$0xff] }
 0x378   : > { %v2767_v23 = vmax.f32 %v2623_v8, %v2679_v35  ;;  %v4432_v45 = vmax.f32 %v7298_v57, %v6786_v1  ;;  %v2770_v6 = vmax.f32 %v2644_v10, %v2700_v0  ;;  %v4433_v20 = vmax.f32 %v7299_v3, %v6792_v22 }
 0x379   : > { %v4620_v21 = vsel %vm4564_vm8, %v4493_v16, %v4492_v2  ;;  %v2771_v12 = vmax.f32 %v2651_v46, %v2707_v28  ;;  %v7300_v63 = vmax.f32 %v7297_v58, %v6766_v61  ;;  %v4434_v54 = vmax.f32 %v7301_v9, %v6794_v33 }
 0x37a   : > { %v4621_v36 = vsel %vm4566_vm9, %v4494_v42, %v4620_v21  ;;  %v4496_v13 = vadd.f32 %v4432_v45, %v2768_v5  ;;  %v4435_v1 = vmax.f32 %v7302_v4, %v6804_v37  ;;  %v4497_v22 = vadd.f32 %v4433_v20, %v2769_v41 }
 0x37b   : > { %v4495_v19 = vadd.f32 %v7300_v63, %v2767_v23  ;;  %v4498_v44 = vadd.f32 %v4434_v54, %v2770_v6 }
 0x37c   : > { %v4499_v58 = vadd.f32 %v4435_v1, %v2771_v12 }
 0x37d   : > { %v4622_v62 = vsel %vm4568_vm10, %v4495_v19, %v4621_v36 }
 0x37e   : > { %v4623_v61 = vsel %vm4570_vm11, %v4496_v13, %v4622_v62 }
 0x37f   : > { %v4624_v49 = vsel %vm4572_vm12, %v4497_v22, %v4623_v61 }
 0x380   : > { %v4625_v33 = vsel %vm4574_vm13, %v4498_v44, %v4624_v49 }
 0x381   : > { %v4626_v37 = vsel %vm4576_vm14, %v4499_v58, %v4625_v33 }
 0x382   : > { %4642 = vst [vmem:[%s6151_s6 + $0x38] sm:$0xff] %v4626_v37 }
 0x383   : > { %4970 = shalt.err (!%p4967_p3)
}
 0x384   : > { %s4971_s26 = scalar_lea.hbm %s6865_s15, 1024  ;;  %s4975_s7 = scalar_lea.hbm %s6919_s5, 2048 }
 0x385   : > { %p4972_p4 = scmp.ne.s32.totalorder %s6865_s15, %s4971_s26  ;;  %p4976_p9 = scmp.lt.s32.totalorder %s6865_s15, %s6919_s5 }
 0x386   : > { %p4977_p10 = scmp.lt.s32.totalorder %s4975_s7, %s4971_s26 }
 0x387   : > { %p4973_p7 = pnand %p4972_p4, %p5092_p5 }
 0x388   : > { %p4978_p11 = por %p4977_p10, %p4976_p9 }
 0x389   : > { %p4974_p8 = pneg %p4973_p7 }
 0x38b   : > { %p4979_p12 = pnand %p4978_p11, %p4974_p8 }
 0x38d   : > { %4982 = shalt.err (!%p4979_p12)
}
 0x38e   : > { %s5022_s10 = smov 128   ;;  %s5023_s12 = smov 8  }
 0x38f   : > { %4910 = dma.vmem_to_hbm [thread:$0]  (%p5092_p5), %s6867_s13, 1024, %s6865_s15, %s6874_s22, %s5022_s10, %s5022_s10, %s5023_s12  }
 0x390 PF: > { %p4916_p13 = scmp.ge.s32.totalorder %s5017_s21, 2  ;;  %s4672_s14 = sand.u32 1, %s5005_s18  }
 0x391   : > { %s4673_s30 = scalar_lea.sflag [#allocation3], %s4672_s14 }
 0x392   : > { %p4913_p0 = pnand %p4916_p13, %p5096_p6 }
 0x394   : > { %p4914_p1 = pneg %p4913_p0 }
 0x396   : > { %5000 = dma.done.wait (%p4914_p1), %s4673_s30, 1024  }
 0x397   : > { %5002 = vsyncadd (%p4914_p1), %s4673_s30, 4294966272  ;;  %p15_p2 = scmp.ge.s32.totalorder %s5079_s24, 4   ;;  %s7303_s18 = smov %s5009_s19 }
 0x398   : > { %s7304_s19 = smov %s5013_s20  ;;  %s7305_s20 = smov %s5090_s27 }
 0x399   : > { %s7306_s21 = smov %s5079_s24  ;;  %17 = sbr.rel (!%p15_p2) target bundleno = 3 (0x3), region = 75 }
 0x39e   :  { %4678 = vsyncpa [#allocation3], 1 }
 0x39f   :  { %4680 = vsyncpa [#allocation3 + $0x1], 1 }

</bundles_post_ra>
